<compile_context>
chip_gen: v5e
topology: v5e:2x2
jax: 0.10.0
libtpu: 0.0.40
codegen_flags: <defaults>
</compile_context>

<pallas_src>
import numpy as np
import jax
import jax.numpy as jnp
from jax.experimental import pallas as pl
from jax.experimental.pallas import tpu as pltpu

C1_IN, C1_OUT, K = 1, 6, 5
C2_IN, C2_OUT = 6, 16
H_IN = W_IN = 32
H1 = W1 = H_IN - K + 1          # 28 after conv1
P1 = H1 // 2                    # 14 after pool1
H2 = W2 = P1 - K + 1            # 10 after conv2
P2 = H2 // 2                    # 5  after pool2
FC_IN = C2_OUT * P2 * P2        # 400
FC_PAD = 128                    # lane-padded width for the FC stack / output
TB_MAX = 128                    # images per grid step (bump to 256 on v6e/v7x for wider MXU tiles)

LANES1 = C1_OUT * W1            # 168 : conv1 lane layout  co*28 + x
LANES1P = C1_OUT * P1           # 84  : pool1 lane layout  co*14 + x
LANES2 = C2_OUT * W2            # 160 : conv2 lane layout  co*10 + x
LANES2P = C2_OUT * P2           # 80  : pool2 lane layout  co*5  + x


def _round_up(n, m):
    return ((n + m - 1) // m) * m


def _toeplitz_conv1(w_conv1):
    """(5, 32, 168) with T[ky, xo+kx, co*28+xo] = w[co, 0, ky, kx]."""
    w = w_conv1[:, 0]                                   # (6, 5, 5)
    ky = jnp.arange(K)[:, None, None, None]
    co = jnp.arange(C1_OUT)[None, :, None, None]
    xo = jnp.arange(W1)[None, None, :, None]
    kx = jnp.arange(K)[None, None, None, :]
    t = jnp.zeros((K, W_IN, LANES1), jnp.float32)
    return t.at[ky, xo + kx, co * W1 + xo].set(w[co, ky, kx])


def _toeplitz_conv2(w_conv2):
    """(5, 84, 160) with T[ky, ci*14+xo+kx, co*10+xo] = w[co, ci, ky, kx]."""
    ky = jnp.arange(K)[:, None, None, None, None]
    co = jnp.arange(C2_OUT)[None, :, None, None, None]
    ci = jnp.arange(C2_IN)[None, None, :, None, None]
    xo = jnp.arange(W2)[None, None, None, :, None]
    kx = jnp.arange(K)[None, None, None, None, :]
    t = jnp.zeros((K, C2_IN * P1, LANES2), jnp.float32)
    return t.at[ky, ci * P1 + xo + kx, co * W2 + xo].set(w_conv2[co, ci, ky, kx])


def _pool_select(n_ch, w):
    """(n_ch*w, n_ch*(w//2)) matrix with 0.25 at [c*w + 2*xp + d, c*(w//2) + xp], d in {0,1}.

    Right-multiplying a height-pair-summed activation slab by this matrix performs the
    width half of a 2x2 average pool (the 1/4 scale is folded in)."""
    hw = w // 2
    m = np.zeros((n_ch * w, n_ch * hw), np.float32)
    ch = np.arange(n_ch)[:, None, None]
    xp = np.arange(hw)[None, :, None]
    d = np.arange(2)[None, None, :]
    m[ch * w + 2 * xp + d, ch * hw + xp] = 0.25
    return jnp.asarray(m)


def _lenet5_kernel(x4_ref, t1_ref, b1_ref, t2_ref, b2_ref, s1_ref, s2_ref,
                   wf1_ref, bf1_ref, wf2_ref, bf2_ref, wf3_ref, bf3_ref,
                   o_ref):
    f32 = jnp.float32
    x4 = x4_ref[...]                      # (4, 8, tb, 32): image rows grouped by (row mod 4)
    tb = x4.shape[2]
    b1 = b1_ref[...]                      # (1, 168)
    b2 = b2_ref[...]                      # (1, 160)
    s1 = s1_ref[...]                      # (168, 84)
    s2 = s2_ref[...]                      # (160, 80)

    # ---- conv1 (1->6, k=5): Toeplitz matmuls over the width axis on the MXU.
    # Output rows y are produced in four groups s = y mod 4 so the two average pools
    # downstream never need strided row access.
    acts1 = []
    for s in range(4):
        acc = None
        for ky in range(K):
            r, q = (s + ky) % 4, (s + ky) // 4
            slab = x4[r, q:q + 7].reshape(7 * tb, W_IN)              # (7*tb, 32)
            term = jnp.dot(slab, t1_ref[ky], preferred_element_type=f32)
            acc = term if acc is None else acc + term
        acts1.append(jnp.tanh(acc + b1))                             # (7*tb, 168)

    # ---- pool1: height pairs (4u,4u+1)->yp=2u and (4u+2,4u+3)->yp=2u+1 are plain adds;
    # width pairs + 0.25 scale via one batched selection matmul.
    h1e = jnp.dot(acts1[0] + acts1[1], s1, preferred_element_type=f32)   # yp even rows
    h1o = jnp.dot(acts1[2] + acts1[3], s1, preferred_element_type=f32)   # yp odd rows
    h1e = h1e.reshape(7, tb, LANES1P)
    h1o = h1o.reshape(7, tb, LANES1P)

    # ---- conv2 (6->16, k=5): same Toeplitz scheme, output rows grouped by parity.
    acts2 = []
    for p in range(2):
        acc = None
        for ky in range(K):
            par, q = (p + ky) % 2, (p + ky) // 2
            src = h1e if par == 0 else h1o
            slab = src[q:q + P2].reshape(P2 * tb, C2_IN * P1)        # (5*tb, 84)
            term = jnp.dot(slab, t2_ref[ky], preferred_element_type=f32)
            acc = term if acc is None else acc + term
        acts2.append(jnp.tanh(acc + b2))                             # (5*tb, 160)

    # ---- pool2 ----
    h2 = jnp.dot(acts2[0] + acts2[1], s2, preferred_element_type=f32)    # (5*tb, 80)
    h2 = h2.reshape(P2, tb, LANES2P)                                 # [y, b, co*5 + x]

    # ---- FC stack (no activations, per the module). The NCHW flatten is fused into fc1 by
    # pre-permuting/splitting the fc1 weight per y-row; everything is padded to 128 lanes.
    f1 = None
    for v in range(P2):
        term = jnp.dot(h2[v], wf1_ref[v], preferred_element_type=f32)    # (tb, 128)
        f1 = term if f1 is None else f1 + term
    f1 = f1 + bf1_ref[...]
    f2 = jnp.dot(f1, wf2_ref[...], preferred_element_type=f32) + bf2_ref[...]
    o_ref[...] = jnp.dot(f2, wf3_ref[...], preferred_element_type=f32) + bf3_ref[...]


def lenet5_forward(x, p):
    """x: (B, 1, 32, 32) float32 -> (B, 10) float32 logits."""
    B = x.shape[0]
    tb = min(TB_MAX, _round_up(B, 8))
    b_pad = _round_up(B, tb)

    x_sq = x[:, 0].astype(jnp.float32)                              # (B, 32, 32)
    if b_pad != B:
        x_sq = jnp.pad(x_sq, ((0, b_pad - B), (0, 0), (0, 0)))
    # Group image rows by (row mod 4) and put the batch on the sublane axis:
    #   x4[r, j, b, :] = x[b, 0, 4*j + r, :]
    x4 = x_sq.reshape(b_pad, 8, 4, W_IN).transpose(2, 1, 0, 3)      # (4, 8, B_pad, 32)

    t1 = _toeplitz_conv1(p["w_conv1"])                              # (5, 32, 168)
    t2 = _toeplitz_conv2(p["w_conv2"])                              # (5, 84, 160)
    s1 = _pool_select(C1_OUT, W1)                                   # (168, 84)
    s2 = _pool_select(C2_OUT, W2)                                   # (160, 80)
    b1r = jnp.repeat(p["b_conv1"], W1)[None, :]                     # (1, 168), lane co*28+x
    b2r = jnp.repeat(p["b_conv2"], W2)[None, :]                     # (1, 160), lane co*10+x

    # fc1 weight re-ordered to the kernel's (y, c, x) flatten order and split per y;
    # all FC widths zero-padded to 128 so every matmul / the final store is lane-dense.
    wf1 = p["w_fc1"].reshape(C2_OUT, P2, P2, 120).transpose(1, 0, 2, 3).reshape(P2, LANES2P, 120)
    wf1 = jnp.pad(wf1, ((0, 0), (0, 0), (0, FC_PAD - 120)))         # (5, 80, 128)
    bf1 = jnp.pad(p["b_fc1"], (0, FC_PAD - 120))[None, :]
    wf2 = jnp.pad(p["w_fc2"], ((0, FC_PAD - 120), (0, FC_PAD - 84)))
    bf2 = jnp.pad(p["b_fc2"], (0, FC_PAD - 84))[None, :]
    wf3 = jnp.pad(p["w_fc3"], ((0, FC_PAD - 84), (0, FC_PAD - 10)))
    bf3 = jnp.pad(p["b_fc3"], (0, FC_PAD - 10))[None, :]

    operands = (x4, t1, b1r, t2, b2r, s1, s2, wf1, bf1, wf2, bf2, wf3, bf3)

    flops_per_img = (
        2 * 4 * K * 7 * W_IN * LANES1                     # conv1 Toeplitz matmuls
        + 2 * 2 * 7 * LANES1 * LANES1P                    # pool1 width-select matmuls
        + 2 * 2 * K * P2 * (C2_IN * P1) * LANES2          # conv2 Toeplitz matmuls
        + 2 * P2 * LANES2 * LANES2P                       # pool2 width-select matmul
        + 2 * P2 * LANES2P * FC_PAD                       # fc1
        + 2 * 2 * FC_PAD * FC_PAD                         # fc2 + fc3
    )
    transc_per_img = 4 * 7 * LANES1 + 2 * P2 * LANES2
    weight_bytes = sum(int(np.prod(a.shape)) * 4 for a in operands[1:])
    cost = pl.CostEstimate(
        flops=int(b_pad * flops_per_img),
        transcendentals=int(b_pad * transc_per_img),
        bytes_accessed=int(b_pad * (H_IN * W_IN + FC_PAD) * 4 + weight_bytes),
    )

    out = pl.pallas_call(
        _lenet5_kernel,
        out_shape=jax.ShapeDtypeStruct((b_pad, FC_PAD), jnp.float32),
        grid=(b_pad // tb,),
        in_specs=[
            pl.BlockSpec((4, 8, tb, W_IN), lambda b: (0, 0, b, 0)),          # x, batch-tiled
            pl.BlockSpec((K, W_IN, LANES1), lambda b: (0, 0, 0)),            # T1
            pl.BlockSpec((1, LANES1), lambda b: (0, 0)),                     # conv1 bias row
            pl.BlockSpec((K, C2_IN * P1, LANES2), lambda b: (0, 0, 0)),      # T2
            pl.BlockSpec((1, LANES2), lambda b: (0, 0)),                     # conv2 bias row
            pl.BlockSpec((LANES1, LANES1P), lambda b: (0, 0)),               # S1 (pool1 width)
            pl.BlockSpec((LANES2, LANES2P), lambda b: (0, 0)),               # S2 (pool2 width)
            pl.BlockSpec((P2, LANES2P, FC_PAD), lambda b: (0, 0, 0)),        # fc1 W (split by y)
            pl.BlockSpec((1, FC_PAD), lambda b: (0, 0)),                     # fc1 b
            pl.BlockSpec((FC_PAD, FC_PAD), lambda b: (0, 0)),                # fc2 W
            pl.BlockSpec((1, FC_PAD), lambda b: (0, 0)),                     # fc2 b
            pl.BlockSpec((FC_PAD, FC_PAD), lambda b: (0, 0)),                # fc3 W
            pl.BlockSpec((1, FC_PAD), lambda b: (0, 0)),                     # fc3 b
        ],
        out_specs=pl.BlockSpec((tb, FC_PAD), lambda b: (b, 0)),
        compiler_params=pltpu.CompilerParams(
            dimension_semantics=("parallel",),
            vmem_limit_bytes=48 * 1024 * 1024,
        ),
        cost_estimate=cost,
    )(*operands)
    return out[:B, :10]


def _ref_forward(x, p):
    """Pure-JAX reference of the PyTorch forward."""
    def conv(h, w, b):
        y = jax.lax.conv_general_dilated(h, w, (1, 1), "VALID",
                                         dimension_numbers=("NCHW", "OIHW", "NCHW"))
        return y + b[None, :, None, None]

    def pool(h):
        B, C, H, W = h.shape
        return h.reshape(B, C, H // 2, 2, W // 2, 2).mean(axis=(3, 5))

    h = pool(jnp.tanh(conv(x, p["w_conv1"], p["b_conv1"])))
    h = pool(jnp.tanh(conv(h, p["w_conv2"], p["b_conv2"])))
    h = h.reshape(x.shape[0], -1)
    h = h @ p["w_fc1"] + p["b_fc1"]
    h = h @ p["w_fc2"] + p["b_fc2"]
    return h @ p["w_fc3"] + p["b_fc3"]


def init_params(key):
    ks = jax.random.split(key, 10)

    def n(k, shape, scale):
        return scale * jax.random.normal(k, shape, jnp.float32)

    return {
        "w_conv1": n(ks[0], (C1_OUT, C1_IN, K, K), 0.2),
        "b_conv1": n(ks[1], (C1_OUT,), 0.1),
        "w_conv2": n(ks[2], (C2_OUT, C2_IN, K, K), 0.1),
        "b_conv2": n(ks[3], (C2_OUT,), 0.1),
        "w_fc1":   n(ks[4], (FC_IN, 120), 0.05),
        "b_fc1":   n(ks[5], (120,), 0.05),
        "w_fc2":   n(ks[6], (120, 84), 0.05),
        "b_fc2":   n(ks[7], (84,), 0.05),
        "w_fc3":   n(ks[8], (84, 10), 0.05),
        "b_fc3":   n(ks[9], (10,), 0.05),
    }


if __name__ == "__main__":
    key = jax.random.PRNGKey(0)
    pkey, xkey = jax.random.split(key)
    params = init_params(pkey)

    batch = 2
    x = jax.random.normal(xkey, (batch, C1_IN, H_IN, W_IN), jnp.float32)

    out = jax.block_until_ready(lenet5_forward(x, params))
    assert out.shape == (batch, 10), out.shape

    ref = jax.block_until_ready(_ref_forward(x, params))
    # Tolerance tightened vs the previous 5e-2; kept at 1e-2 because both paths use the
    # TPU's default (bf16-pass) f32 matmul precision with different decompositions.
    if not np.allclose(np.asarray(out), np.asarray(ref), rtol=1e-2, atol=1e-2):
        raise AssertionError("Pallas LeNet5 output mismatch vs JAX reference")

    print("KERNEL_OK")
</pallas_src>

<mosaic_0001>
module attributes {stable_mosaic.version = 11 : i64} {
  func.func @_lenet5_kernel(%arg0: i32, %arg1: memref<4x8x8x32xf32, #tpu.memory_space<vmem>>, %arg2: memref<5x32x168xf32, #tpu.memory_space<vmem>>, %arg3: memref<1x168xf32, #tpu.memory_space<vmem>>, %arg4: memref<5x84x160xf32, #tpu.memory_space<vmem>>, %arg5: memref<1x160xf32, #tpu.memory_space<vmem>>, %arg6: memref<168x84xf32, #tpu.memory_space<vmem>>, %arg7: memref<160x80xf32, #tpu.memory_space<vmem>>, %arg8: memref<5x80x128xf32, #tpu.memory_space<vmem>>, %arg9: memref<1x128xf32, #tpu.memory_space<vmem>>, %arg10: memref<128x128xf32, #tpu.memory_space<vmem>>, %arg11: memref<1x128xf32, #tpu.memory_space<vmem>>, %arg12: memref<128x128xf32, #tpu.memory_space<vmem>>, %arg13: memref<1x128xf32, #tpu.memory_space<vmem>>, %arg14: memref<8x128xf32, #tpu.memory_space<vmem>>) attributes {dimension_semantics = [#tpu.dimension_semantics<parallel>], iteration_bounds = array<i64: 1>, scalar_prefetch = 0 : i64, scratch_operands = 0 : i64, tpu.core_type = #tpu.core_type<tc>, window_params = [{transform_indices = @transform_0, window_bounds = array<i64: 4, 8, 8, 32>}, {pipeline_mode = #tpu.pipeline_mode<synchronous>, transform_indices = @transform_1, window_bounds = array<i64: 5, 32, 168>}, {pipeline_mode = #tpu.pipeline_mode<synchronous>, transform_indices = @transform_2, window_bounds = array<i64: 1, 168>}, {pipeline_mode = #tpu.pipeline_mode<synchronous>, transform_indices = @transform_3, window_bounds = array<i64: 5, 84, 160>}, {pipeline_mode = #tpu.pipeline_mode<synchronous>, transform_indices = @transform_4, window_bounds = array<i64: 1, 160>}, {pipeline_mode = #tpu.pipeline_mode<synchronous>, transform_indices = @transform_5, window_bounds = array<i64: 168, 84>}, {pipeline_mode = #tpu.pipeline_mode<synchronous>, transform_indices = @transform_6, window_bounds = array<i64: 160, 80>}, {pipeline_mode = #tpu.pipeline_mode<synchronous>, transform_indices = @transform_7, window_bounds = array<i64: 5, 80, 128>}, {pipeline_mode = #tpu.pipeline_mode<synchronous>, transform_indices = @transform_8, window_bounds = array<i64: 1, 128>}, {pipeline_mode = #tpu.pipeline_mode<synchronous>, transform_indices = @transform_9, window_bounds = array<i64: 128, 128>}, {pipeline_mode = #tpu.pipeline_mode<synchronous>, transform_indices = @transform_10, window_bounds = array<i64: 1, 128>}, {pipeline_mode = #tpu.pipeline_mode<synchronous>, transform_indices = @transform_11, window_bounds = array<i64: 128, 128>}, {pipeline_mode = #tpu.pipeline_mode<synchronous>, transform_indices = @transform_12, window_bounds = array<i64: 1, 128>}, {transform_indices = @transform_13, window_bounds = array<i64: 8, 128>}]} {
    %c0 = arith.constant 0 : index
    %c0_0 = arith.constant 0 : index
    %c0_1 = arith.constant 0 : index
    %c0_2 = arith.constant 0 : index
    %0 = vector.load %arg1[%c0, %c0_0, %c0_1, %c0_2] : memref<4x8x8x32xf32, #tpu.memory_space<vmem>>, vector<4x8x8x32xf32>
    %c0_3 = arith.constant 0 : index
    %c0_4 = arith.constant 0 : index
    %1 = vector.load %arg3[%c0_3, %c0_4] : memref<1x168xf32, #tpu.memory_space<vmem>>, vector<1x168xf32>
    %c0_5 = arith.constant 0 : index
    %c0_6 = arith.constant 0 : index
    %2 = vector.load %arg5[%c0_5, %c0_6] : memref<1x160xf32, #tpu.memory_space<vmem>>, vector<1x160xf32>
    %c0_7 = arith.constant 0 : index
    %c0_8 = arith.constant 0 : index
    %3 = vector.load %arg6[%c0_7, %c0_8] : memref<168x84xf32, #tpu.memory_space<vmem>>, vector<168x84xf32>
    %c0_9 = arith.constant 0 : index
    %c0_10 = arith.constant 0 : index
    %4 = vector.load %arg7[%c0_9, %c0_10] : memref<160x80xf32, #tpu.memory_space<vmem>>, vector<160x80xf32>
    %5 = vector.extract_strided_slice %0 {offsets = [0, 0, 0, 0], sizes = [1, 7, 8, 32], strides = [1, 1, 1, 1]} : vector<4x8x8x32xf32> to vector<1x7x8x32xf32>
    %6 = vector.shape_cast %5 : vector<1x7x8x32xf32> to vector<7x8x32xf32>
    %7 = vector.shape_cast %6 : vector<7x8x32xf32> to vector<56x32xf32>
    %c0_11 = arith.constant 0 : index
    %c0_12 = arith.constant 0 : index
    %c0_13 = arith.constant 0 : index
    %8 = vector.load %arg2[%c0_11, %c0_12, %c0_13] : memref<5x32x168xf32, #tpu.memory_space<vmem>>, vector<1x32x168xf32>
    %9 = vector.shape_cast %8 : vector<1x32x168xf32> to vector<32x168xf32>
    %cst = arith.constant dense<0.000000e+00> : vector<56x168xf32>
    %10 = tpu.matmul %7, %9, %cst {dimension_numbers = #tpu.dot_dimension_numbers<[1], [0], [0], [1], [0, 0, 1, 1], [], []>} : vector<56x32xf32>, vector<32x168xf32>, vector<56x168xf32> -> vector<56x168xf32>
    %11 = vector.extract_strided_slice %0 {offsets = [1, 0, 0, 0], sizes = [1, 7, 8, 32], strides = [1, 1, 1, 1]} : vector<4x8x8x32xf32> to vector<1x7x8x32xf32>
    %12 = vector.shape_cast %11 : vector<1x7x8x32xf32> to vector<7x8x32xf32>
    %13 = vector.shape_cast %12 : vector<7x8x32xf32> to vector<56x32xf32>
    %c1 = arith.constant 1 : index
    %c0_14 = arith.constant 0 : index
    %c0_15 = arith.constant 0 : index
    %14 = vector.load %arg2[%c1, %c0_14, %c0_15] : memref<5x32x168xf32, #tpu.memory_space<vmem>>, vector<1x32x168xf32>
    %15 = vector.shape_cast %14 : vector<1x32x168xf32> to vector<32x168xf32>
    %cst_16 = arith.constant dense<0.000000e+00> : vector<56x168xf32>
    %16 = tpu.matmul %13, %15, %cst_16 {dimension_numbers = #tpu.dot_dimension_numbers<[1], [0], [0], [1], [0, 0, 1, 1], [], []>} : vector<56x32xf32>, vector<32x168xf32>, vector<56x168xf32> -> vector<56x168xf32>
    %17 = arith.addf %10, %16 : vector<56x168xf32>
    %18 = vector.extract_strided_slice %0 {offsets = [2, 0, 0, 0], sizes = [1, 7, 8, 32], strides = [1, 1, 1, 1]} : vector<4x8x8x32xf32> to vector<1x7x8x32xf32>
    %19 = vector.shape_cast %18 : vector<1x7x8x32xf32> to vector<7x8x32xf32>
    %20 = vector.shape_cast %19 : vector<7x8x32xf32> to vector<56x32xf32>
    %c2 = arith.constant 2 : index
    %c0_17 = arith.constant 0 : index
    %c0_18 = arith.constant 0 : index
    %21 = vector.load %arg2[%c2, %c0_17, %c0_18] : memref<5x32x168xf32, #tpu.memory_space<vmem>>, vector<1x32x168xf32>
    %22 = vector.shape_cast %21 : vector<1x32x168xf32> to vector<32x168xf32>
    %cst_19 = arith.constant dense<0.000000e+00> : vector<56x168xf32>
    %23 = tpu.matmul %20, %22, %cst_19 {dimension_numbers = #tpu.dot_dimension_numbers<[1], [0], [0], [1], [0, 0, 1, 1], [], []>} : vector<56x32xf32>, vector<32x168xf32>, vector<56x168xf32> -> vector<56x168xf32>
    %24 = arith.addf %17, %23 : vector<56x168xf32>
    %25 = vector.extract_strided_slice %0 {offsets = [3, 0, 0, 0], sizes = [1, 7, 8, 32], strides = [1, 1, 1, 1]} : vector<4x8x8x32xf32> to vector<1x7x8x32xf32>
    %26 = vector.shape_cast %25 : vector<1x7x8x32xf32> to vector<7x8x32xf32>
    %27 = vector.shape_cast %26 : vector<7x8x32xf32> to vector<56x32xf32>
    %c3 = arith.constant 3 : index
    %c0_20 = arith.constant 0 : index
    %c0_21 = arith.constant 0 : index
    %28 = vector.load %arg2[%c3, %c0_20, %c0_21] : memref<5x32x168xf32, #tpu.memory_space<vmem>>, vector<1x32x168xf32>
    %29 = vector.shape_cast %28 : vector<1x32x168xf32> to vector<32x168xf32>
    %cst_22 = arith.constant dense<0.000000e+00> : vector<56x168xf32>
    %30 = tpu.matmul %27, %29, %cst_22 {dimension_numbers = #tpu.dot_dimension_numbers<[1], [0], [0], [1], [0, 0, 1, 1], [], []>} : vector<56x32xf32>, vector<32x168xf32>, vector<56x168xf32> -> vector<56x168xf32>
    %31 = arith.addf %24, %30 : vector<56x168xf32>
    %32 = vector.extract_strided_slice %0 {offsets = [0, 1, 0, 0], sizes = [1, 7, 8, 32], strides = [1, 1, 1, 1]} : vector<4x8x8x32xf32> to vector<1x7x8x32xf32>
    %33 = vector.shape_cast %32 : vector<1x7x8x32xf32> to vector<7x8x32xf32>
    %34 = vector.shape_cast %33 : vector<7x8x32xf32> to vector<56x32xf32>
    %c4 = arith.constant 4 : index
    %c0_23 = arith.constant 0 : index
    %c0_24 = arith.constant 0 : index
    %35 = vector.load %arg2[%c4, %c0_23, %c0_24] : memref<5x32x168xf32, #tpu.memory_space<vmem>>, vector<1x32x168xf32>
    %36 = vector.shape_cast %35 : vector<1x32x168xf32> to vector<32x168xf32>
    %cst_25 = arith.constant dense<0.000000e+00> : vector<56x168xf32>
    %37 = tpu.matmul %34, %36, %cst_25 {dimension_numbers = #tpu.dot_dimension_numbers<[1], [0], [0], [1], [0, 0, 1, 1], [], []>} : vector<56x32xf32>, vector<32x168xf32>, vector<56x168xf32> -> vector<56x168xf32>
    %38 = arith.addf %31, %37 : vector<56x168xf32>
    %39 = vector.broadcast %1 : vector<1x168xf32> to vector<56x168xf32>
    %40 = arith.addf %38, %39 : vector<56x168xf32>
    %41 = math.tanh %40 : vector<56x168xf32>
    %42 = vector.extract_strided_slice %0 {offsets = [1, 0, 0, 0], sizes = [1, 7, 8, 32], strides = [1, 1, 1, 1]} : vector<4x8x8x32xf32> to vector<1x7x8x32xf32>
    %43 = vector.shape_cast %42 : vector<1x7x8x32xf32> to vector<7x8x32xf32>
    %44 = vector.shape_cast %43 : vector<7x8x32xf32> to vector<56x32xf32>
    %c0_26 = arith.constant 0 : index
    %c0_27 = arith.constant 0 : index
    %c0_28 = arith.constant 0 : index
    %45 = vector.load %arg2[%c0_26, %c0_27, %c0_28] : memref<5x32x168xf32, #tpu.memory_space<vmem>>, vector<1x32x168xf32>
    %46 = vector.shape_cast %45 : vector<1x32x168xf32> to vector<32x168xf32>
    %cst_29 = arith.constant dense<0.000000e+00> : vector<56x168xf32>
    %47 = tpu.matmul %44, %46, %cst_29 {dimension_numbers = #tpu.dot_dimension_numbers<[1], [0], [0], [1], [0, 0, 1, 1], [], []>} : vector<56x32xf32>, vector<32x168xf32>, vector<56x168xf32> -> vector<56x168xf32>
    %48 = vector.extract_strided_slice %0 {offsets = [2, 0, 0, 0], sizes = [1, 7, 8, 32], strides = [1, 1, 1, 1]} : vector<4x8x8x32xf32> to vector<1x7x8x32xf32>
    %49 = vector.shape_cast %48 : vector<1x7x8x32xf32> to vector<7x8x32xf32>
    %50 = vector.shape_cast %49 : vector<7x8x32xf32> to vector<56x32xf32>
    %c1_30 = arith.constant 1 : index
    %c0_31 = arith.constant 0 : index
    %c0_32 = arith.constant 0 : index
    %51 = vector.load %arg2[%c1_30, %c0_31, %c0_32] : memref<5x32x168xf32, #tpu.memory_space<vmem>>, vector<1x32x168xf32>
    %52 = vector.shape_cast %51 : vector<1x32x168xf32> to vector<32x168xf32>
    %cst_33 = arith.constant dense<0.000000e+00> : vector<56x168xf32>
    %53 = tpu.matmul %50, %52, %cst_33 {dimension_numbers = #tpu.dot_dimension_numbers<[1], [0], [0], [1], [0, 0, 1, 1], [], []>} : vector<56x32xf32>, vector<32x168xf32>, vector<56x168xf32> -> vector<56x168xf32>
    %54 = arith.addf %47, %53 : vector<56x168xf32>
    %55 = vector.extract_strided_slice %0 {offsets = [3, 0, 0, 0], sizes = [1, 7, 8, 32], strides = [1, 1, 1, 1]} : vector<4x8x8x32xf32> to vector<1x7x8x32xf32>
    %56 = vector.shape_cast %55 : vector<1x7x8x32xf32> to vector<7x8x32xf32>
    %57 = vector.shape_cast %56 : vector<7x8x32xf32> to vector<56x32xf32>
    %c2_34 = arith.constant 2 : index
    %c0_35 = arith.constant 0 : index
    %c0_36 = arith.constant 0 : index
    %58 = vector.load %arg2[%c2_34, %c0_35, %c0_36] : memref<5x32x168xf32, #tpu.memory_space<vmem>>, vector<1x32x168xf32>
    %59 = vector.shape_cast %58 : vector<1x32x168xf32> to vector<32x168xf32>
    %cst_37 = arith.constant dense<0.000000e+00> : vector<56x168xf32>
    %60 = tpu.matmul %57, %59, %cst_37 {dimension_numbers = #tpu.dot_dimension_numbers<[1], [0], [0], [1], [0, 0, 1, 1], [], []>} : vector<56x32xf32>, vector<32x168xf32>, vector<56x168xf32> -> vector<56x168xf32>
    %61 = arith.addf %54, %60 : vector<56x168xf32>
    %62 = vector.extract_strided_slice %0 {offsets = [0, 1, 0, 0], sizes = [1, 7, 8, 32], strides = [1, 1, 1, 1]} : vector<4x8x8x32xf32> to vector<1x7x8x32xf32>
    %63 = vector.shape_cast %62 : vector<1x7x8x32xf32> to vector<7x8x32xf32>
    %64 = vector.shape_cast %63 : vector<7x8x32xf32> to vector<56x32xf32>
    %c3_38 = arith.constant 3 : index
    %c0_39 = arith.constant 0 : index
    %c0_40 = arith.constant 0 : index
    %65 = vector.load %arg2[%c3_38, %c0_39, %c0_40] : memref<5x32x168xf32, #tpu.memory_space<vmem>>, vector<1x32x168xf32>
    %66 = vector.shape_cast %65 : vector<1x32x168xf32> to vector<32x168xf32>
    %cst_41 = arith.constant dense<0.000000e+00> : vector<56x168xf32>
    %67 = tpu.matmul %64, %66, %cst_41 {dimension_numbers = #tpu.dot_dimension_numbers<[1], [0], [0], [1], [0, 0, 1, 1], [], []>} : vector<56x32xf32>, vector<32x168xf32>, vector<56x168xf32> -> vector<56x168xf32>
    %68 = arith.addf %61, %67 : vector<56x168xf32>
    %69 = vector.extract_strided_slice %0 {offsets = [1, 1, 0, 0], sizes = [1, 7, 8, 32], strides = [1, 1, 1, 1]} : vector<4x8x8x32xf32> to vector<1x7x8x32xf32>
    %70 = vector.shape_cast %69 : vector<1x7x8x32xf32> to vector<7x8x32xf32>
    %71 = vector.shape_cast %70 : vector<7x8x32xf32> to vector<56x32xf32>
    %c4_42 = arith.constant 4 : index
    %c0_43 = arith.constant 0 : index
    %c0_44 = arith.constant 0 : index
    %72 = vector.load %arg2[%c4_42, %c0_43, %c0_44] : memref<5x32x168xf32, #tpu.memory_space<vmem>>, vector<1x32x168xf32>
    %73 = vector.shape_cast %72 : vector<1x32x168xf32> to vector<32x168xf32>
    %cst_45 = arith.constant dense<0.000000e+00> : vector<56x168xf32>
    %74 = tpu.matmul %71, %73, %cst_45 {dimension_numbers = #tpu.dot_dimension_numbers<[1], [0], [0], [1], [0, 0, 1, 1], [], []>} : vector<56x32xf32>, vector<32x168xf32>, vector<56x168xf32> -> vector<56x168xf32>
    %75 = arith.addf %68, %74 : vector<56x168xf32>
    %76 = vector.broadcast %1 : vector<1x168xf32> to vector<56x168xf32>
    %77 = arith.addf %75, %76 : vector<56x168xf32>
    %78 = math.tanh %77 : vector<56x168xf32>
    %79 = vector.extract_strided_slice %0 {offsets = [2, 0, 0, 0], sizes = [1, 7, 8, 32], strides = [1, 1, 1, 1]} : vector<4x8x8x32xf32> to vector<1x7x8x32xf32>
    %80 = vector.shape_cast %79 : vector<1x7x8x32xf32> to vector<7x8x32xf32>
    %81 = vector.shape_cast %80 : vector<7x8x32xf32> to vector<56x32xf32>
    %c0_46 = arith.constant 0 : index
    %c0_47 = arith.constant 0 : index
    %c0_48 = arith.constant 0 : index
    %82 = vector.load %arg2[%c0_46, %c0_47, %c0_48] : memref<5x32x168xf32, #tpu.memory_space<vmem>>, vector<1x32x168xf32>
    %83 = vector.shape_cast %82 : vector<1x32x168xf32> to vector<32x168xf32>
    %cst_49 = arith.constant dense<0.000000e+00> : vector<56x168xf32>
    %84 = tpu.matmul %81, %83, %cst_49 {dimension_numbers = #tpu.dot_dimension_numbers<[1], [0], [0], [1], [0, 0, 1, 1], [], []>} : vector<56x32xf32>, vector<32x168xf32>, vector<56x168xf32> -> vector<56x168xf32>
    %85 = vector.extract_strided_slice %0 {offsets = [3, 0, 0, 0], sizes = [1, 7, 8, 32], strides = [1, 1, 1, 1]} : vector<4x8x8x32xf32> to vector<1x7x8x32xf32>
    %86 = vector.shape_cast %85 : vector<1x7x8x32xf32> to vector<7x8x32xf32>
    %87 = vector.shape_cast %86 : vector<7x8x32xf32> to vector<56x32xf32>
    %c1_50 = arith.constant 1 : index
    %c0_51 = arith.constant 0 : index
    %c0_52 = arith.constant 0 : index
    %88 = vector.load %arg2[%c1_50, %c0_51, %c0_52] : memref<5x32x168xf32, #tpu.memory_space<vmem>>, vector<1x32x168xf32>
    %89 = vector.shape_cast %88 : vector<1x32x168xf32> to vector<32x168xf32>
    %cst_53 = arith.constant dense<0.000000e+00> : vector<56x168xf32>
    %90 = tpu.matmul %87, %89, %cst_53 {dimension_numbers = #tpu.dot_dimension_numbers<[1], [0], [0], [1], [0, 0, 1, 1], [], []>} : vector<56x32xf32>, vector<32x168xf32>, vector<56x168xf32> -> vector<56x168xf32>
    %91 = arith.addf %84, %90 : vector<56x168xf32>
    %92 = vector.extract_strided_slice %0 {offsets = [0, 1, 0, 0], sizes = [1, 7, 8, 32], strides = [1, 1, 1, 1]} : vector<4x8x8x32xf32> to vector<1x7x8x32xf32>
    %93 = vector.shape_cast %92 : vector<1x7x8x32xf32> to vector<7x8x32xf32>
    %94 = vector.shape_cast %93 : vector<7x8x32xf32> to vector<56x32xf32>
    %c2_54 = arith.constant 2 : index
    %c0_55 = arith.constant 0 : index
    %c0_56 = arith.constant 0 : index
    %95 = vector.load %arg2[%c2_54, %c0_55, %c0_56] : memref<5x32x168xf32, #tpu.memory_space<vmem>>, vector<1x32x168xf32>
    %96 = vector.shape_cast %95 : vector<1x32x168xf32> to vector<32x168xf32>
    %cst_57 = arith.constant dense<0.000000e+00> : vector<56x168xf32>
    %97 = tpu.matmul %94, %96, %cst_57 {dimension_numbers = #tpu.dot_dimension_numbers<[1], [0], [0], [1], [0, 0, 1, 1], [], []>} : vector<56x32xf32>, vector<32x168xf32>, vector<56x168xf32> -> vector<56x168xf32>
    %98 = arith.addf %91, %97 : vector<56x168xf32>
    %99 = vector.extract_strided_slice %0 {offsets = [1, 1, 0, 0], sizes = [1, 7, 8, 32], strides = [1, 1, 1, 1]} : vector<4x8x8x32xf32> to vector<1x7x8x32xf32>
    %100 = vector.shape_cast %99 : vector<1x7x8x32xf32> to vector<7x8x32xf32>
    %101 = vector.shape_cast %100 : vector<7x8x32xf32> to vector<56x32xf32>
    %c3_58 = arith.constant 3 : index
    %c0_59 = arith.constant 0 : index
    %c0_60 = arith.constant 0 : index
    %102 = vector.load %arg2[%c3_58, %c0_59, %c0_60] : memref<5x32x168xf32, #tpu.memory_space<vmem>>, vector<1x32x168xf32>
    %103 = vector.shape_cast %102 : vector<1x32x168xf32> to vector<32x168xf32>
    %cst_61 = arith.constant dense<0.000000e+00> : vector<56x168xf32>
    %104 = tpu.matmul %101, %103, %cst_61 {dimension_numbers = #tpu.dot_dimension_numbers<[1], [0], [0], [1], [0, 0, 1, 1], [], []>} : vector<56x32xf32>, vector<32x168xf32>, vector<56x168xf32> -> vector<56x168xf32>
    %105 = arith.addf %98, %104 : vector<56x168xf32>
    %106 = vector.extract_strided_slice %0 {offsets = [2, 1, 0, 0], sizes = [1, 7, 8, 32], strides = [1, 1, 1, 1]} : vector<4x8x8x32xf32> to vector<1x7x8x32xf32>
    %107 = vector.shape_cast %106 : vector<1x7x8x32xf32> to vector<7x8x32xf32>
    %108 = vector.shape_cast %107 : vector<7x8x32xf32> to vector<56x32xf32>
    %c4_62 = arith.constant 4 : index
    %c0_63 = arith.constant 0 : index
    %c0_64 = arith.constant 0 : index
    %109 = vector.load %arg2[%c4_62, %c0_63, %c0_64] : memref<5x32x168xf32, #tpu.memory_space<vmem>>, vector<1x32x168xf32>
    %110 = vector.shape_cast %109 : vector<1x32x168xf32> to vector<32x168xf32>
    %cst_65 = arith.constant dense<0.000000e+00> : vector<56x168xf32>
    %111 = tpu.matmul %108, %110, %cst_65 {dimension_numbers = #tpu.dot_dimension_numbers<[1], [0], [0], [1], [0, 0, 1, 1], [], []>} : vector<56x32xf32>, vector<32x168xf32>, vector<56x168xf32> -> vector<56x168xf32>
    %112 = arith.addf %105, %111 : vector<56x168xf32>
    %113 = vector.broadcast %1 : vector<1x168xf32> to vector<56x168xf32>
    %114 = arith.addf %112, %113 : vector<56x168xf32>
    %115 = math.tanh %114 : vector<56x168xf32>
    %116 = vector.extract_strided_slice %0 {offsets = [3, 0, 0, 0], sizes = [1, 7, 8, 32], strides = [1, 1, 1, 1]} : vector<4x8x8x32xf32> to vector<1x7x8x32xf32>
    %117 = vector.shape_cast %116 : vector<1x7x8x32xf32> to vector<7x8x32xf32>
    %118 = vector.shape_cast %117 : vector<7x8x32xf32> to vector<56x32xf32>
    %c0_66 = arith.constant 0 : index
    %c0_67 = arith.constant 0 : index
    %c0_68 = arith.constant 0 : index
    %119 = vector.load %arg2[%c0_66, %c0_67, %c0_68] : memref<5x32x168xf32, #tpu.memory_space<vmem>>, vector<1x32x168xf32>
    %120 = vector.shape_cast %119 : vector<1x32x168xf32> to vector<32x168xf32>
    %cst_69 = arith.constant dense<0.000000e+00> : vector<56x168xf32>
    %121 = tpu.matmul %118, %120, %cst_69 {dimension_numbers = #tpu.dot_dimension_numbers<[1], [0], [0], [1], [0, 0, 1, 1], [], []>} : vector<56x32xf32>, vector<32x168xf32>, vector<56x168xf32> -> vector<56x168xf32>
    %122 = vector.extract_strided_slice %0 {offsets = [0, 1, 0, 0], sizes = [1, 7, 8, 32], strides = [1, 1, 1, 1]} : vector<4x8x8x32xf32> to vector<1x7x8x32xf32>
    %123 = vector.shape_cast %122 : vector<1x7x8x32xf32> to vector<7x8x32xf32>
    %124 = vector.shape_cast %123 : vector<7x8x32xf32> to vector<56x32xf32>
    %c1_70 = arith.constant 1 : index
    %c0_71 = arith.constant 0 : index
    %c0_72 = arith.constant 0 : index
    %125 = vector.load %arg2[%c1_70, %c0_71, %c0_72] : memref<5x32x168xf32, #tpu.memory_space<vmem>>, vector<1x32x168xf32>
    %126 = vector.shape_cast %125 : vector<1x32x168xf32> to vector<32x168xf32>
    %cst_73 = arith.constant dense<0.000000e+00> : vector<56x168xf32>
    %127 = tpu.matmul %124, %126, %cst_73 {dimension_numbers = #tpu.dot_dimension_numbers<[1], [0], [0], [1], [0, 0, 1, 1], [], []>} : vector<56x32xf32>, vector<32x168xf32>, vector<56x168xf32> -> vector<56x168xf32>
    %128 = arith.addf %121, %127 : vector<56x168xf32>
    %129 = vector.extract_strided_slice %0 {offsets = [1, 1, 0, 0], sizes = [1, 7, 8, 32], strides = [1, 1, 1, 1]} : vector<4x8x8x32xf32> to vector<1x7x8x32xf32>
    %130 = vector.shape_cast %129 : vector<1x7x8x32xf32> to vector<7x8x32xf32>
    %131 = vector.shape_cast %130 : vector<7x8x32xf32> to vector<56x32xf32>
    %c2_74 = arith.constant 2 : index
    %c0_75 = arith.constant 0 : index
    %c0_76 = arith.constant 0 : index
    %132 = vector.load %arg2[%c2_74, %c0_75, %c0_76] : memref<5x32x168xf32, #tpu.memory_space<vmem>>, vector<1x32x168xf32>
    %133 = vector.shape_cast %132 : vector<1x32x168xf32> to vector<32x168xf32>
    %cst_77 = arith.constant dense<0.000000e+00> : vector<56x168xf32>
    %134 = tpu.matmul %131, %133, %cst_77 {dimension_numbers = #tpu.dot_dimension_numbers<[1], [0], [0], [1], [0, 0, 1, 1], [], []>} : vector<56x32xf32>, vector<32x168xf32>, vector<56x168xf32> -> vector<56x168xf32>
    %135 = arith.addf %128, %134 : vector<56x168xf32>
    %136 = vector.extract_strided_slice %0 {offsets = [2, 1, 0, 0], sizes = [1, 7, 8, 32], strides = [1, 1, 1, 1]} : vector<4x8x8x32xf32> to vector<1x7x8x32xf32>
    %137 = vector.shape_cast %136 : vector<1x7x8x32xf32> to vector<7x8x32xf32>
    %138 = vector.shape_cast %137 : vector<7x8x32xf32> to vector<56x32xf32>
    %c3_78 = arith.constant 3 : index
    %c0_79 = arith.constant 0 : index
    %c0_80 = arith.constant 0 : index
    %139 = vector.load %arg2[%c3_78, %c0_79, %c0_80] : memref<5x32x168xf32, #tpu.memory_space<vmem>>, vector<1x32x168xf32>
    %140 = vector.shape_cast %139 : vector<1x32x168xf32> to vector<32x168xf32>
    %cst_81 = arith.constant dense<0.000000e+00> : vector<56x168xf32>
    %141 = tpu.matmul %138, %140, %cst_81 {dimension_numbers = #tpu.dot_dimension_numbers<[1], [0], [0], [1], [0, 0, 1, 1], [], []>} : vector<56x32xf32>, vector<32x168xf32>, vector<56x168xf32> -> vector<56x168xf32>
    %142 = arith.addf %135, %141 : vector<56x168xf32>
    %143 = vector.extract_strided_slice %0 {offsets = [3, 1, 0, 0], sizes = [1, 7, 8, 32], strides = [1, 1, 1, 1]} : vector<4x8x8x32xf32> to vector<1x7x8x32xf32>
    %144 = vector.shape_cast %143 : vector<1x7x8x32xf32> to vector<7x8x32xf32>
    %145 = vector.shape_cast %144 : vector<7x8x32xf32> to vector<56x32xf32>
    %c4_82 = arith.constant 4 : index
    %c0_83 = arith.constant 0 : index
    %c0_84 = arith.constant 0 : index
    %146 = vector.load %arg2[%c4_82, %c0_83, %c0_84] : memref<5x32x168xf32, #tpu.memory_space<vmem>>, vector<1x32x168xf32>
    %147 = vector.shape_cast %146 : vector<1x32x168xf32> to vector<32x168xf32>
    %cst_85 = arith.constant dense<0.000000e+00> : vector<56x168xf32>
    %148 = tpu.matmul %145, %147, %cst_85 {dimension_numbers = #tpu.dot_dimension_numbers<[1], [0], [0], [1], [0, 0, 1, 1], [], []>} : vector<56x32xf32>, vector<32x168xf32>, vector<56x168xf32> -> vector<56x168xf32>
    %149 = arith.addf %142, %148 : vector<56x168xf32>
    %150 = vector.broadcast %1 : vector<1x168xf32> to vector<56x168xf32>
    %151 = arith.addf %149, %150 : vector<56x168xf32>
    %152 = math.tanh %151 : vector<56x168xf32>
    %153 = arith.addf %41, %78 : vector<56x168xf32>
    %cst_86 = arith.constant dense<0.000000e+00> : vector<56x84xf32>
    %154 = tpu.matmul %153, %3, %cst_86 {dimension_numbers = #tpu.dot_dimension_numbers<[1], [0], [0], [1], [0, 0, 1, 1], [], []>} : vector<56x168xf32>, vector<168x84xf32>, vector<56x84xf32> -> vector<56x84xf32>
    %155 = arith.addf %115, %152 : vector<56x168xf32>
    %cst_87 = arith.constant dense<0.000000e+00> : vector<56x84xf32>
    %156 = tpu.matmul %155, %3, %cst_87 {dimension_numbers = #tpu.dot_dimension_numbers<[1], [0], [0], [1], [0, 0, 1, 1], [], []>} : vector<56x168xf32>, vector<168x84xf32>, vector<56x84xf32> -> vector<56x84xf32>
    %157 = vector.shape_cast %154 : vector<56x84xf32> to vector<7x8x84xf32>
    %158 = vector.shape_cast %156 : vector<56x84xf32> to vector<7x8x84xf32>
    %159 = vector.extract_strided_slice %157 {offsets = [0, 0, 0], sizes = [5, 8, 84], strides = [1, 1, 1]} : vector<7x8x84xf32> to vector<5x8x84xf32>
    %160 = vector.shape_cast %159 : vector<5x8x84xf32> to vector<40x84xf32>
    %c0_88 = arith.constant 0 : index
    %c0_89 = arith.constant 0 : index
    %c0_90 = arith.constant 0 : index
    %161 = vector.load %arg4[%c0_88, %c0_89, %c0_90] : memref<5x84x160xf32, #tpu.memory_space<vmem>>, vector<1x84x160xf32>
    %162 = vector.shape_cast %161 : vector<1x84x160xf32> to vector<84x160xf32>
    %cst_91 = arith.constant dense<0.000000e+00> : vector<40x160xf32>
    %163 = tpu.matmul %160, %162, %cst_91 {dimension_numbers = #tpu.dot_dimension_numbers<[1], [0], [0], [1], [0, 0, 1, 1], [], []>} : vector<40x84xf32>, vector<84x160xf32>, vector<40x160xf32> -> vector<40x160xf32>
    %164 = vector.extract_strided_slice %158 {offsets = [0, 0, 0], sizes = [5, 8, 84], strides = [1, 1, 1]} : vector<7x8x84xf32> to vector<5x8x84xf32>
    %165 = vector.shape_cast %164 : vector<5x8x84xf32> to vector<40x84xf32>
    %c1_92 = arith.constant 1 : index
    %c0_93 = arith.constant 0 : index
    %c0_94 = arith.constant 0 : index
    %166 = vector.load %arg4[%c1_92, %c0_93, %c0_94] : memref<5x84x160xf32, #tpu.memory_space<vmem>>, vector<1x84x160xf32>
    %167 = vector.shape_cast %166 : vector<1x84x160xf32> to vector<84x160xf32>
    %cst_95 = arith.constant dense<0.000000e+00> : vector<40x160xf32>
    %168 = tpu.matmul %165, %167, %cst_95 {dimension_numbers = #tpu.dot_dimension_numbers<[1], [0], [0], [1], [0, 0, 1, 1], [], []>} : vector<40x84xf32>, vector<84x160xf32>, vector<40x160xf32> -> vector<40x160xf32>
    %169 = arith.addf %163, %168 : vector<40x160xf32>
    %170 = vector.extract_strided_slice %157 {offsets = [1, 0, 0], sizes = [5, 8, 84], strides = [1, 1, 1]} : vector<7x8x84xf32> to vector<5x8x84xf32>
    %171 = vector.shape_cast %170 : vector<5x8x84xf32> to vector<40x84xf32>
    %c2_96 = arith.constant 2 : index
    %c0_97 = arith.constant 0 : index
    %c0_98 = arith.constant 0 : index
    %172 = vector.load %arg4[%c2_96, %c0_97, %c0_98] : memref<5x84x160xf32, #tpu.memory_space<vmem>>, vector<1x84x160xf32>
    %173 = vector.shape_cast %172 : vector<1x84x160xf32> to vector<84x160xf32>
    %cst_99 = arith.constant dense<0.000000e+00> : vector<40x160xf32>
    %174 = tpu.matmul %171, %173, %cst_99 {dimension_numbers = #tpu.dot_dimension_numbers<[1], [0], [0], [1], [0, 0, 1, 1], [], []>} : vector<40x84xf32>, vector<84x160xf32>, vector<40x160xf32> -> vector<40x160xf32>
    %175 = arith.addf %169, %174 : vector<40x160xf32>
    %176 = vector.extract_strided_slice %158 {offsets = [1, 0, 0], sizes = [5, 8, 84], strides = [1, 1, 1]} : vector<7x8x84xf32> to vector<5x8x84xf32>
    %177 = vector.shape_cast %176 : vector<5x8x84xf32> to vector<40x84xf32>
    %c3_100 = arith.constant 3 : index
    %c0_101 = arith.constant 0 : index
    %c0_102 = arith.constant 0 : index
    %178 = vector.load %arg4[%c3_100, %c0_101, %c0_102] : memref<5x84x160xf32, #tpu.memory_space<vmem>>, vector<1x84x160xf32>
    %179 = vector.shape_cast %178 : vector<1x84x160xf32> to vector<84x160xf32>
    %cst_103 = arith.constant dense<0.000000e+00> : vector<40x160xf32>
    %180 = tpu.matmul %177, %179, %cst_103 {dimension_numbers = #tpu.dot_dimension_numbers<[1], [0], [0], [1], [0, 0, 1, 1], [], []>} : vector<40x84xf32>, vector<84x160xf32>, vector<40x160xf32> -> vector<40x160xf32>
    %181 = arith.addf %175, %180 : vector<40x160xf32>
    %182 = vector.extract_strided_slice %157 {offsets = [2, 0, 0], sizes = [5, 8, 84], strides = [1, 1, 1]} : vector<7x8x84xf32> to vector<5x8x84xf32>
    %183 = vector.shape_cast %182 : vector<5x8x84xf32> to vector<40x84xf32>
    %c4_104 = arith.constant 4 : index
    %c0_105 = arith.constant 0 : index
    %c0_106 = arith.constant 0 : index
    %184 = vector.load %arg4[%c4_104, %c0_105, %c0_106] : memref<5x84x160xf32, #tpu.memory_space<vmem>>, vector<1x84x160xf32>
    %185 = vector.shape_cast %184 : vector<1x84x160xf32> to vector<84x160xf32>
    %cst_107 = arith.constant dense<0.000000e+00> : vector<40x160xf32>
    %186 = tpu.matmul %183, %185, %cst_107 {dimension_numbers = #tpu.dot_dimension_numbers<[1], [0], [0], [1], [0, 0, 1, 1], [], []>} : vector<40x84xf32>, vector<84x160xf32>, vector<40x160xf32> -> vector<40x160xf32>
    %187 = arith.addf %181, %186 : vector<40x160xf32>
    %188 = vector.broadcast %2 : vector<1x160xf32> to vector<40x160xf32>
    %189 = arith.addf %187, %188 : vector<40x160xf32>
    %190 = math.tanh %189 : vector<40x160xf32>
    %191 = vector.extract_strided_slice %158 {offsets = [0, 0, 0], sizes = [5, 8, 84], strides = [1, 1, 1]} : vector<7x8x84xf32> to vector<5x8x84xf32>
    %192 = vector.shape_cast %191 : vector<5x8x84xf32> to vector<40x84xf32>
    %c0_108 = arith.constant 0 : index
    %c0_109 = arith.constant 0 : index
    %c0_110 = arith.constant 0 : index
    %193 = vector.load %arg4[%c0_108, %c0_109, %c0_110] : memref<5x84x160xf32, #tpu.memory_space<vmem>>, vector<1x84x160xf32>
    %194 = vector.shape_cast %193 : vector<1x84x160xf32> to vector<84x160xf32>
    %cst_111 = arith.constant dense<0.000000e+00> : vector<40x160xf32>
    %195 = tpu.matmul %192, %194, %cst_111 {dimension_numbers = #tpu.dot_dimension_numbers<[1], [0], [0], [1], [0, 0, 1, 1], [], []>} : vector<40x84xf32>, vector<84x160xf32>, vector<40x160xf32> -> vector<40x160xf32>
    %196 = vector.extract_strided_slice %157 {offsets = [1, 0, 0], sizes = [5, 8, 84], strides = [1, 1, 1]} : vector<7x8x84xf32> to vector<5x8x84xf32>
    %197 = vector.shape_cast %196 : vector<5x8x84xf32> to vector<40x84xf32>
    %c1_112 = arith.constant 1 : index
    %c0_113 = arith.constant 0 : index
    %c0_114 = arith.constant 0 : index
    %198 = vector.load %arg4[%c1_112, %c0_113, %c0_114] : memref<5x84x160xf32, #tpu.memory_space<vmem>>, vector<1x84x160xf32>
    %199 = vector.shape_cast %198 : vector<1x84x160xf32> to vector<84x160xf32>
    %cst_115 = arith.constant dense<0.000000e+00> : vector<40x160xf32>
    %200 = tpu.matmul %197, %199, %cst_115 {dimension_numbers = #tpu.dot_dimension_numbers<[1], [0], [0], [1], [0, 0, 1, 1], [], []>} : vector<40x84xf32>, vector<84x160xf32>, vector<40x160xf32> -> vector<40x160xf32>
    %201 = arith.addf %195, %200 : vector<40x160xf32>
    %202 = vector.extract_strided_slice %158 {offsets = [1, 0, 0], sizes = [5, 8, 84], strides = [1, 1, 1]} : vector<7x8x84xf32> to vector<5x8x84xf32>
    %203 = vector.shape_cast %202 : vector<5x8x84xf32> to vector<40x84xf32>
    %c2_116 = arith.constant 2 : index
    %c0_117 = arith.constant 0 : index
    %c0_118 = arith.constant 0 : index
    %204 = vector.load %arg4[%c2_116, %c0_117, %c0_118] : memref<5x84x160xf32, #tpu.memory_space<vmem>>, vector<1x84x160xf32>
    %205 = vector.shape_cast %204 : vector<1x84x160xf32> to vector<84x160xf32>
    %cst_119 = arith.constant dense<0.000000e+00> : vector<40x160xf32>
    %206 = tpu.matmul %203, %205, %cst_119 {dimension_numbers = #tpu.dot_dimension_numbers<[1], [0], [0], [1], [0, 0, 1, 1], [], []>} : vector<40x84xf32>, vector<84x160xf32>, vector<40x160xf32> -> vector<40x160xf32>
    %207 = arith.addf %201, %206 : vector<40x160xf32>
    %208 = vector.extract_strided_slice %157 {offsets = [2, 0, 0], sizes = [5, 8, 84], strides = [1, 1, 1]} : vector<7x8x84xf32> to vector<5x8x84xf32>
    %209 = vector.shape_cast %208 : vector<5x8x84xf32> to vector<40x84xf32>
    %c3_120 = arith.constant 3 : index
    %c0_121 = arith.constant 0 : index
    %c0_122 = arith.constant 0 : index
    %210 = vector.load %arg4[%c3_120, %c0_121, %c0_122] : memref<5x84x160xf32, #tpu.memory_space<vmem>>, vector<1x84x160xf32>
    %211 = vector.shape_cast %210 : vector<1x84x160xf32> to vector<84x160xf32>
    %cst_123 = arith.constant dense<0.000000e+00> : vector<40x160xf32>
    %212 = tpu.matmul %209, %211, %cst_123 {dimension_numbers = #tpu.dot_dimension_numbers<[1], [0], [0], [1], [0, 0, 1, 1], [], []>} : vector<40x84xf32>, vector<84x160xf32>, vector<40x160xf32> -> vector<40x160xf32>
    %213 = arith.addf %207, %212 : vector<40x160xf32>
    %214 = vector.extract_strided_slice %158 {offsets = [2, 0, 0], sizes = [5, 8, 84], strides = [1, 1, 1]} : vector<7x8x84xf32> to vector<5x8x84xf32>
    %215 = vector.shape_cast %214 : vector<5x8x84xf32> to vector<40x84xf32>
    %c4_124 = arith.constant 4 : index
    %c0_125 = arith.constant 0 : index
    %c0_126 = arith.constant 0 : index
    %216 = vector.load %arg4[%c4_124, %c0_125, %c0_126] : memref<5x84x160xf32, #tpu.memory_space<vmem>>, vector<1x84x160xf32>
    %217 = vector.shape_cast %216 : vector<1x84x160xf32> to vector<84x160xf32>
    %cst_127 = arith.constant dense<0.000000e+00> : vector<40x160xf32>
    %218 = tpu.matmul %215, %217, %cst_127 {dimension_numbers = #tpu.dot_dimension_numbers<[1], [0], [0], [1], [0, 0, 1, 1], [], []>} : vector<40x84xf32>, vector<84x160xf32>, vector<40x160xf32> -> vector<40x160xf32>
    %219 = arith.addf %213, %218 : vector<40x160xf32>
    %220 = vector.broadcast %2 : vector<1x160xf32> to vector<40x160xf32>
    %221 = arith.addf %219, %220 : vector<40x160xf32>
    %222 = math.tanh %221 : vector<40x160xf32>
    %223 = arith.addf %190, %222 : vector<40x160xf32>
    %cst_128 = arith.constant dense<0.000000e+00> : vector<40x80xf32>
    %224 = tpu.matmul %223, %4, %cst_128 {dimension_numbers = #tpu.dot_dimension_numbers<[1], [0], [0], [1], [0, 0, 1, 1], [], []>} : vector<40x160xf32>, vector<160x80xf32>, vector<40x80xf32> -> vector<40x80xf32>
    %225 = vector.shape_cast %224 : vector<40x80xf32> to vector<5x8x80xf32>
    %226 = vector.extract_strided_slice %225 {offsets = [0, 0, 0], sizes = [1, 8, 80], strides = [1, 1, 1]} : vector<5x8x80xf32> to vector<1x8x80xf32>
    %227 = vector.shape_cast %226 : vector<1x8x80xf32> to vector<8x80xf32>
    %c0_129 = arith.constant 0 : index
    %c0_130 = arith.constant 0 : index
    %c0_131 = arith.constant 0 : index
    %228 = vector.load %arg8[%c0_129, %c0_130, %c0_131] : memref<5x80x128xf32, #tpu.memory_space<vmem>>, vector<1x80x128xf32>
    %229 = vector.shape_cast %228 : vector<1x80x128xf32> to vector<80x128xf32>
    %cst_132 = arith.constant dense<0.000000e+00> : vector<8x128xf32>
    %230 = tpu.matmul %227, %229, %cst_132 {dimension_numbers = #tpu.dot_dimension_numbers<[1], [0], [0], [1], [0, 0, 1, 1], [], []>} : vector<8x80xf32>, vector<80x128xf32>, vector<8x128xf32> -> vector<8x128xf32>
    %231 = vector.extract_strided_slice %225 {offsets = [1, 0, 0], sizes = [1, 8, 80], strides = [1, 1, 1]} : vector<5x8x80xf32> to vector<1x8x80xf32>
    %232 = vector.shape_cast %231 : vector<1x8x80xf32> to vector<8x80xf32>
    %c1_133 = arith.constant 1 : index
    %c0_134 = arith.constant 0 : index
    %c0_135 = arith.constant 0 : index
    %233 = vector.load %arg8[%c1_133, %c0_134, %c0_135] : memref<5x80x128xf32, #tpu.memory_space<vmem>>, vector<1x80x128xf32>
    %234 = vector.shape_cast %233 : vector<1x80x128xf32> to vector<80x128xf32>
    %cst_136 = arith.constant dense<0.000000e+00> : vector<8x128xf32>
    %235 = tpu.matmul %232, %234, %cst_136 {dimension_numbers = #tpu.dot_dimension_numbers<[1], [0], [0], [1], [0, 0, 1, 1], [], []>} : vector<8x80xf32>, vector<80x128xf32>, vector<8x128xf32> -> vector<8x128xf32>
    %236 = arith.addf %230, %235 : vector<8x128xf32>
    %237 = vector.extract_strided_slice %225 {offsets = [2, 0, 0], sizes = [1, 8, 80], strides = [1, 1, 1]} : vector<5x8x80xf32> to vector<1x8x80xf32>
    %238 = vector.shape_cast %237 : vector<1x8x80xf32> to vector<8x80xf32>
    %c2_137 = arith.constant 2 : index
    %c0_138 = arith.constant 0 : index
    %c0_139 = arith.constant 0 : index
    %239 = vector.load %arg8[%c2_137, %c0_138, %c0_139] : memref<5x80x128xf32, #tpu.memory_space<vmem>>, vector<1x80x128xf32>
    %240 = vector.shape_cast %239 : vector<1x80x128xf32> to vector<80x128xf32>
    %cst_140 = arith.constant dense<0.000000e+00> : vector<8x128xf32>
    %241 = tpu.matmul %238, %240, %cst_140 {dimension_numbers = #tpu.dot_dimension_numbers<[1], [0], [0], [1], [0, 0, 1, 1], [], []>} : vector<8x80xf32>, vector<80x128xf32>, vector<8x128xf32> -> vector<8x128xf32>
    %242 = arith.addf %236, %241 : vector<8x128xf32>
    %243 = vector.extract_strided_slice %225 {offsets = [3, 0, 0], sizes = [1, 8, 80], strides = [1, 1, 1]} : vector<5x8x80xf32> to vector<1x8x80xf32>
    %244 = vector.shape_cast %243 : vector<1x8x80xf32> to vector<8x80xf32>
    %c3_141 = arith.constant 3 : index
    %c0_142 = arith.constant 0 : index
    %c0_143 = arith.constant 0 : index
    %245 = vector.load %arg8[%c3_141, %c0_142, %c0_143] : memref<5x80x128xf32, #tpu.memory_space<vmem>>, vector<1x80x128xf32>
    %246 = vector.shape_cast %245 : vector<1x80x128xf32> to vector<80x128xf32>
    %cst_144 = arith.constant dense<0.000000e+00> : vector<8x128xf32>
    %247 = tpu.matmul %244, %246, %cst_144 {dimension_numbers = #tpu.dot_dimension_numbers<[1], [0], [0], [1], [0, 0, 1, 1], [], []>} : vector<8x80xf32>, vector<80x128xf32>, vector<8x128xf32> -> vector<8x128xf32>
    %248 = arith.addf %242, %247 : vector<8x128xf32>
    %249 = vector.extract_strided_slice %225 {offsets = [4, 0, 0], sizes = [1, 8, 80], strides = [1, 1, 1]} : vector<5x8x80xf32> to vector<1x8x80xf32>
    %250 = vector.shape_cast %249 : vector<1x8x80xf32> to vector<8x80xf32>
    %c4_145 = arith.constant 4 : index
    %c0_146 = arith.constant 0 : index
    %c0_147 = arith.constant 0 : index
    %251 = vector.load %arg8[%c4_145, %c0_146, %c0_147] : memref<5x80x128xf32, #tpu.memory_space<vmem>>, vector<1x80x128xf32>
    %252 = vector.shape_cast %251 : vector<1x80x128xf32> to vector<80x128xf32>
    %cst_148 = arith.constant dense<0.000000e+00> : vector<8x128xf32>
    %253 = tpu.matmul %250, %252, %cst_148 {dimension_numbers = #tpu.dot_dimension_numbers<[1], [0], [0], [1], [0, 0, 1, 1], [], []>} : vector<8x80xf32>, vector<80x128xf32>, vector<8x128xf32> -> vector<8x128xf32>
    %254 = arith.addf %248, %253 : vector<8x128xf32>
    %c0_149 = arith.constant 0 : index
    %c0_150 = arith.constant 0 : index
    %255 = vector.load %arg9[%c0_149, %c0_150] : memref<1x128xf32, #tpu.memory_space<vmem>>, vector<1x128xf32>
    %256 = vector.broadcast %255 : vector<1x128xf32> to vector<8x128xf32>
    %257 = arith.addf %254, %256 : vector<8x128xf32>
    %c0_151 = arith.constant 0 : index
    %c0_152 = arith.constant 0 : index
    %258 = vector.load %arg10[%c0_151, %c0_152] : memref<128x128xf32, #tpu.memory_space<vmem>>, vector<128x128xf32>
    %cst_153 = arith.constant dense<0.000000e+00> : vector<8x128xf32>
    %259 = tpu.matmul %257, %258, %cst_153 {dimension_numbers = #tpu.dot_dimension_numbers<[1], [0], [0], [1], [0, 0, 1, 1], [], []>} : vector<8x128xf32>, vector<128x128xf32>, vector<8x128xf32> -> vector<8x128xf32>
    %c0_154 = arith.constant 0 : index
    %c0_155 = arith.constant 0 : index
    %260 = vector.load %arg11[%c0_154, %c0_155] : memref<1x128xf32, #tpu.memory_space<vmem>>, vector<1x128xf32>
    %261 = vector.broadcast %260 : vector<1x128xf32> to vector<8x128xf32>
    %262 = arith.addf %259, %261 : vector<8x128xf32>
    %c0_156 = arith.constant 0 : index
    %c0_157 = arith.constant 0 : index
    %263 = vector.load %arg12[%c0_156, %c0_157] : memref<128x128xf32, #tpu.memory_space<vmem>>, vector<128x128xf32>
    %cst_158 = arith.constant dense<0.000000e+00> : vector<8x128xf32>
    %264 = tpu.matmul %262, %263, %cst_158 {dimension_numbers = #tpu.dot_dimension_numbers<[1], [0], [0], [1], [0, 0, 1, 1], [], []>} : vector<8x128xf32>, vector<128x128xf32>, vector<8x128xf32> -> vector<8x128xf32>
    %c0_159 = arith.constant 0 : index
    %c0_160 = arith.constant 0 : index
    %265 = vector.load %arg13[%c0_159, %c0_160] : memref<1x128xf32, #tpu.memory_space<vmem>>, vector<1x128xf32>
    %266 = vector.broadcast %265 : vector<1x128xf32> to vector<8x128xf32>
    %267 = arith.addf %264, %266 : vector<8x128xf32>
    %c0_161 = arith.constant 0 : index
    %c0_162 = arith.constant 0 : index
    %268 = vector.load %arg14[%c0_161, %c0_162] : memref<8x128xf32, #tpu.memory_space<vmem>>, vector<8x128xf32>
    tpu.vector_store %arg14[%c0_161, %c0_162], %267 {strides = array<i32>} : memref<8x128xf32, #tpu.memory_space<vmem>>, vector<8x128xf32>,
    return
  }
  func.func @transform_0(%arg0: i32) -> (i32, i32, i32, i32) {
    %c0_i32 = arith.constant 0 : i32
    %c0_i32_0 = arith.constant 0 : i32
    %c0_i32_1 = arith.constant 0 : i32
    %c0_i32_2 = arith.constant 0 : i32
    return %c0_i32, %c0_i32_0, %arg0, %c0_i32_1 : i32, i32, i32, i32
  }
  func.func @transform_1(%arg0: i32) -> (i32, i32, i32) {
    %c0_i32 = arith.constant 0 : i32
    %c0_i32_0 = arith.constant 0 : i32
    %c0_i32_1 = arith.constant 0 : i32
    %c0_i32_2 = arith.constant 0 : i32
    return %c0_i32, %c0_i32_0, %c0_i32_1 : i32, i32, i32
  }
  func.func @transform_2(%arg0: i32) -> (i32, i32) {
    %c0_i32 = arith.constant 0 : i32
    %c0_i32_0 = arith.constant 0 : i32
    %c0_i32_1 = arith.constant 0 : i32
    return %c0_i32, %c0_i32_0 : i32, i32
  }
  func.func @transform_3(%arg0: i32) -> (i32, i32, i32) {
    %c0_i32 = arith.constant 0 : i32
    %c0_i32_0 = arith.constant 0 : i32
    %c0_i32_1 = arith.constant 0 : i32
    %c0_i32_2 = arith.constant 0 : i32
    return %c0_i32, %c0_i32_0, %c0_i32_1 : i32, i32, i32
  }
  func.func @transform_4(%arg0: i32) -> (i32, i32) {
    %c0_i32 = arith.constant 0 : i32
    %c0_i32_0 = arith.constant 0 : i32
    %c0_i32_1 = arith.constant 0 : i32
    return %c0_i32, %c0_i32_0 : i32, i32
  }
  func.func @transform_5(%arg0: i32) -> (i32, i32) {
    %c0_i32 = arith.constant 0 : i32
    %c0_i32_0 = arith.constant 0 : i32
    %c0_i32_1 = arith.constant 0 : i32
    return %c0_i32, %c0_i32_0 : i32, i32
  }
  func.func @transform_6(%arg0: i32) -> (i32, i32) {
    %c0_i32 = arith.constant 0 : i32
    %c0_i32_0 = arith.constant 0 : i32
    %c0_i32_1 = arith.constant 0 : i32
    return %c0_i32, %c0_i32_0 : i32, i32
  }
  func.func @transform_7(%arg0: i32) -> (i32, i32, i32) {
    %c0_i32 = arith.constant 0 : i32
    %c0_i32_0 = arith.constant 0 : i32
    %c0_i32_1 = arith.constant 0 : i32
    %c0_i32_2 = arith.constant 0 : i32
    return %c0_i32, %c0_i32_0, %c0_i32_1 : i32, i32, i32
  }
  func.func @transform_8(%arg0: i32) -> (i32, i32) {
    %c0_i32 = arith.constant 0 : i32
    %c0_i32_0 = arith.constant 0 : i32
    %c0_i32_1 = arith.constant 0 : i32
    return %c0_i32, %c0_i32_0 : i32, i32
  }
  func.func @transform_9(%arg0: i32) -> (i32, i32) {
    %c0_i32 = arith.constant 0 : i32
    %c0_i32_0 = arith.constant 0 : i32
    %c0_i32_1 = arith.constant 0 : i32
    return %c0_i32, %c0_i32_0 : i32, i32
  }
  func.func @transform_10(%arg0: i32) -> (i32, i32) {
    %c0_i32 = arith.constant 0 : i32
    %c0_i32_0 = arith.constant 0 : i32
    %c0_i32_1 = arith.constant 0 : i32
    return %c0_i32, %c0_i32_0 : i32, i32
  }
  func.func @transform_11(%arg0: i32) -> (i32, i32) {
    %c0_i32 = arith.constant 0 : i32
    %c0_i32_0 = arith.constant 0 : i32
    %c0_i32_1 = arith.constant 0 : i32
    return %c0_i32, %c0_i32_0 : i32, i32
  }
  func.func @transform_12(%arg0: i32) -> (i32, i32) {
    %c0_i32 = arith.constant 0 : i32
    %c0_i32_0 = arith.constant 0 : i32
    %c0_i32_1 = arith.constant 0 : i32
    return %c0_i32, %c0_i32_0 : i32, i32
  }
  func.func @transform_13(%arg0: i32) -> (i32, i32) {
    %c0_i32 = arith.constant 0 : i32
    %c0_i32_0 = arith.constant 0 : i32
    return %arg0, %c0_i32 : i32, i32
  }
}

</mosaic_0001>

<bundles_post_ra>
// kernel: tpu_custom_call.1
= control target key start
LH: loop header
LB: loop body
LE: loop exit
PB: predicated region body
PF: predicated region fallthrough
CT: control target
= control target key end

     0   :  { %vm137_vm0 = vcmask 261120   ;;  %s7848_s0 = inlined_call_operand.vmem [shape: f32[4,8,8,32], index: 0, kind: input, shape index: {}]   ;;  %s7849_s1 = inlined_call_operand.vmem [shape: f32[5,32,168], index: 1, kind: input, shape index: {}]   ;;  %s7850_s2 = inlined_call_operand.vmem [shape: f32[1,168], index: 2, kind: input, shape index: {}]   ;;  %s7851_s3 = inlined_call_operand.vmem [shape: f32[5,84,160], index: 3, kind: input, shape index: {}]   ;;  %s7852_s4 = inlined_call_operand.vmem [shape: f32[1,160], index: 4, kind: input, shape index: {}]   ;;  %s7853_s5 = inlined_call_operand.vmem [shape: f32[168,84], index: 5, kind: input, shape index: {}]   ;;  %s7854_s6 = inlined_call_operand.vmem [shape: f32[160,80], index: 6, kind: input, shape index: {}]   ;;  %s7855_s7 = inlined_call_operand.vmem [shape: f32[5,80,128], index: 7, kind: input, shape index: {}]   ;;  %s7856_s8 = inlined_call_operand.vmem [shape: f32[1,128], index: 8, kind: input, shape index: {}]   ;;  %s7857_s9 = inlined_call_operand.vmem [shape: f32[128,128], index: 9, kind: input, shape index: {}]   ;;  %s7858_s10 = inlined_call_operand.vmem [shape: f32[1,128], index: 10, kind: input, shape index: {}]   ;;  %s7859_s11 = inlined_call_operand.vmem [shape: f32[128,128], index: 11, kind: input, shape index: {}]   ;;  %s7860_s12 = inlined_call_operand.vmem [shape: f32[1,128], index: 12, kind: input, shape index: {}]   ;;  %s7861_s13 = inlined_call_operand.hbm [shape: f32[8,128], index: 13, kind: output, shape index: {}]  }
   0x1   :  { %v4476_v0 = vld [vmem:[%s7849_s1 + $0x70] sm:$0xff]  ;;  %v4481_v1 = vld [vmem:[%s7849_s1 + $0x78] sm:$0xff]  ;;  %v4498_v4 = vld [vmem:[%s7849_s1 + $0x60] sm:$0xff] }
   0x2   :  { %v4486_v2 = vld [vmem:[%s7849_s1 + $0x30] sm:$0xff]  ;;  %171 = vmatpush.msra.mxu0 %v4476_v0  ;;  %209 = vmatpush.msra.mxu1 %v4481_v1  ;;  %v4493_v3 = vld [vmem:[%s7849_s1 + $0x38] sm:$0xff]  ;;  %v4503_v5 = vld [vmem:[%s7849_s1 + $0x68] sm:$0xff] }
   0x3   :  { %268 = vmatpush.msra.mxu2 %v4486_v2  ;;  %306 = vmatpush.msra.mxu3 %v4493_v3  ;;  %v4510_v6 = vld [vmem:[%s7849_s1 + $0x20] sm:$0xff]  ;;  %v4515_v7 = vld [vmem:[%s7849_s1 + $0x28] sm:$0xff]  ;;  %v4520_v8 = vld [vmem:[%s7849_s1 + $0x50] sm:$0xff] }
   0x4   :  { %172 = vmatpush.msra.mxu0 %v4498_v4  ;;  %210 = vmatpush.msra.mxu1 %v4503_v5  ;;  %v4527_v9 = vld [vmem:[%s7849_s1 + $0x58] sm:$0xff]  ;;  %v4532_v10 = vld [vmem:[%s7849_s1 + $0x10] sm:$0xff]  ;;  %v4544_v12 = vld [vmem:[%s7849_s1 + $0x40] sm:$0xff] }
   0x5   :  { %v4537_v11 = vld [vmem:[%s7849_s1 + $0x18] sm:$0xff]  ;;  %269 = vmatpush.msra.mxu2 %v4510_v6  ;;  %307 = vmatpush.msra.mxu3 %v4515_v7  ;;  %v4549_v13 = vld [vmem:[%s7849_s1 + $0x48] sm:$0xff]  ;;  %v4556_v14 = vld [vmem:[%s7849_s1] sm:$0xff] }
   0x6   :  { %173 = vmatpush.msra.mxu0 %v4520_v8  ;;  %211 = vmatpush.msra.mxu1 %v4527_v9  ;;  %v4561_v15 = vld [vmem:[%s7849_s1 + $0x8] sm:$0xff]  ;;  %v4568_v16 = vld [vmem:[%s7848_s0 + $0x40] sm:$0xff]  ;;  %v4580_v18 = vld [vmem:[%s7849_s1 + $0xf0] sm:$0xff] }
   0x7   :  { %270 = vmatpush.msra.mxu2 %v4532_v10  ;;  %308 = vmatpush.msra.mxu3 %v4537_v11  ;;  %v45_v17 = vld [vmem:[%s7848_s0] sm:$0xff]  ;;  %v4585_v19 = vld [vmem:[%s7849_s1 + $0xf8] sm:$0xff]  ;;  %v4594_v20 = vld [vmem:[%s7849_s1 + $0xb0] sm:$0xff] }
   0x8   :  { %174 = vmatpush.msra.mxu0 %v4544_v12  ;;  %212 = vmatpush.msra.mxu1 %v4549_v13  ;;  %v4599_v21 = vld [vmem:[%s7849_s1 + $0xb8] sm:$0xff]  ;;  %v4606_v22 = vld [vmem:[%s7849_s1 + $0xe0] sm:$0xff]  ;;  %v4611_v23 = vld [vmem:[%s7849_s1 + $0xe8] sm:$0xff] }
   0x9   :  { %271 = vmatpush.msra.mxu2 %v4556_v14  ;;  %309 = vmatpush.msra.mxu3 %v4561_v15  ;;  %v4618_v24 = vld [vmem:[%s7849_s1 + $0xa0] sm:$0xff]  ;;  %v4623_v25 = vld [vmem:[%s7849_s1 + $0xa8] sm:$0xff]  ;;  %v4628_v26 = vld [vmem:[%s7849_s1 + $0xd0] sm:$0xff] }
   0xa   :  { %3594 = vmatmul.msk.f32.vlgmr.msra.gmra.mxu0 %vm137_vm0, %v4568_v16  ;;  %3601 = vmatmul.msk.f32.vlgmr.msra.gmra.mxu1 %vm137_vm0, %v4568_v16  ;;  %v4635_v27 = vld [vmem:[%s7849_s1 + $0xd8] sm:$0xff]  ;;  %v4640_v28 = vld [vmem:[%s7849_s1 + $0x90] sm:$0xff]  ;;  %v4652_v30 = vld [vmem:[%s7848_s0 + $0x48] sm:$0xff] }
   0xb   :  { %3608 = vmatmul.msk.f32.vlgmr.msra.gmra.mxu2 %vm137_vm0, %v45_v17  ;;  %3615 = vmatmul.msk.f32.vlgmr.msra.gmra.mxu3 %vm137_vm0, %v45_v17  ;;  %v4645_v29 = vld [vmem:[%s7849_s1 + $0x98] sm:$0xff] }
   0xc   :  { %494 = vmatpush.msrb.mxu2 %v4580_v18  ;;  %532 = vmatpush.msrb.mxu3 %v4585_v19  ;;  %7915 = vst [vmem:[#allocation5_spill] sm:$0xff] %v4645_v29 }
   0xd   :  { %374 = vmatpush.msrb.mxu0 %v4594_v20  ;;  %412 = vmatpush.msrb.mxu1 %v4599_v21 }
   0xe   :  { %495 = vmatpush.msrb.mxu2 %v4606_v22  ;;  %533 = vmatpush.msrb.mxu3 %v4611_v23 }
   0xf   :  { %375 = vmatpush.msrb.mxu0 %v4618_v24  ;;  %413 = vmatpush.msrb.mxu1 %v4623_v25 }
  0x10   :  { %18 = vsyncpa [#allocation3], 0  ;;  %v4659_v31 = vld [vmem:[%s7848_s0 + $0x8] sm:$0xff]  ;;  %496 = vmatpush.msrb.mxu2 %v4628_v26  ;;  %534 = vmatpush.msrb.mxu3 %v4635_v27  ;;  %v4676_v32 = vld [vmem:[%s7849_s1 + $0xc0] sm:$0xff]  ;;  %vm2080_vm1 = vcmask 326656   ;;  %vm2350_vm2 = vcmask 1043456  }
  0x11   :  { %376 = vmatpush.msrb.mxu0 %v4640_v28  ;;  %414 = vmatpush.msrb.mxu1 %v4645_v29  ;;  %v4681_v33 = vld [vmem:[%s7849_s1 + $0xc8] sm:$0xff]  ;;  %v4686_v34 = vld [vmem:[%s7849_s1 + $0x80] sm:$0xff]  ;;  %v4702_v36 = vld [vmem:[%s7848_s0 + $0x50] sm:$0xff]  ;;  %vm2334_vm3 = vcmask 687104   ;;  %vm3332_vm4 = vcmask 654336   ;;  %s4402_s30 = smov [#allocation2]  }
  0x12   :  { %3595 = vmatmul.msk.f32.gmra.mxu0 %vm137_vm0, %v4652_v30  ;;  %3602 = vmatmul.msk.f32.gmra.mxu1 %vm137_vm0, %v4652_v30  ;;  %7916 = vst [vmem:[#allocation6_spill] sm:$0xff] %v4686_v34  ;;  %v4693_v35 = vld [vmem:[%s7849_s1 + $0x88] sm:$0xff]  ;;  %v4707_v37 = vld [vmem:[%s7848_s0 + $0x10] sm:$0xff]  ;;  %v4726_v38 = vld [vmem:[%s7848_s0 + $0x58] sm:$0xff]  ;;  %s3575_s14 = sshll.u32 %s4402_s30, 4  ;;  %s3576_s14 = int_to_ptr.vmem [resolvable:$true] %s3575_s14 }
  0x13   :  { %3609 = vmatmul.msk.f32.gmra.mxu2 %vm137_vm0, %v4659_v31  ;;  %3616 = vmatmul.msk.f32.gmra.mxu3 %vm137_vm0, %v4659_v31  ;;  %7917 = vst [vmem:[#allocation7_spill] sm:$0xff] %v4693_v35  ;;  %v4731_v39 = vld [vmem:[%s7848_s0 + $0x18] sm:$0xff]  ;;  %v4744_v40 = vld [vmem:[%s7849_s1 + $0x130] sm:$0xff]  ;;  %v4756_v42 = vld [vmem:[%s7848_s0 + $0x60] sm:$0xff] }
  0x14   :  { %497 = vmatpush.msrb.mxu2 %v4676_v32  ;;  %535 = vmatpush.msrb.mxu3 %v4681_v33  ;;  %7918 = vst [vmem:[#allocation8_spill] sm:$0xff] %v4744_v40  ;;  %v4749_v41 = vld [vmem:[%s7849_s1 + $0x138] sm:$0xff]  ;;  %v4761_v43 = vld [vmem:[%s7848_s0 + $0x20] sm:$0xff]  ;;  %v4774_v44 = vld [vmem:[%s7848_s0 + $0x68] sm:$0xff] }
  0x15   :  { %377 = vmatpush.msrb.mxu0 %v4686_v34  ;;  %415 = vmatpush.msrb.mxu1 %v4693_v35  ;;  %7919 = vst [vmem:[#allocation9_spill] sm:$0xff] %v4749_v41  ;;  %v4779_v45 = vld [vmem:[%s7848_s0 + $0x28] sm:$0xff]  ;;  %v4792_v46 = vld [vmem:[%s7849_s1 + $0x120] sm:$0xff]  ;;  %v4804_v48 = vld [vmem:[%s7848_s0 + $0x70] sm:$0xff] }
  0x16   :  { %719 = vmatpush.msra.mxu2 %v4476_v0  ;;  %757 = vmatpush.msra.mxu3 %v4481_v1  ;;  %7920 = vst [vmem:[#allocation10_spill] sm:$0xff] %v4761_v43  ;;  %v4797_v47 = vld [vmem:[%s7849_s1 + $0x128] sm:$0xff]  ;;  %v4809_v49 = vld [vmem:[%s7848_s0 + $0x30] sm:$0xff]  ;;  %v4822_v50 = vld [vmem:[%s7848_s0 + $0x80] sm:$0xff] }
  0x17   :  { %596 = vmatpush.msra.mxu0 %v4744_v40  ;;  %634 = vmatpush.msra.mxu1 %v4749_v41  ;;  %7921 = vst [vmem:[#allocation11_spill] sm:$0xff] %v4779_v45  ;;  %v4827_v51 = vld [vmem:[%s7848_s0 + $0xc0] sm:$0xff]  ;;  %v4840_v52 = vld [vmem:[%s7849_s1 + $0x110] sm:$0xff]  ;;  %v4845_v53 = vld [vmem:[%s7849_s1 + $0x118] sm:$0xff] }
  0x18   :  { %720 = vmatpush.msra.mxu2 %v4498_v4  ;;  %758 = vmatpush.msra.mxu3 %v4503_v5  ;;  %7922 = vst [vmem:[#allocation12_spill] sm:$0xff] %v4792_v46  ;;  %v4854_v54 = vld [vmem:[%s7848_s0 + $0x88] sm:$0xff]  ;;  %v4876_v56 = vld [vmem:[%s7849_s1 + $0x100] sm:$0xff]  ;;  %v4892_v58 = vld [vmem:[%s7848_s0 + $0x90] sm:$0xff] }
  0x19   :  { %7923 = vst [vmem:[#allocation13_spill] sm:$0xff] %v4797_v47  ;;  %597 = vmatpush.msra.mxu0 %v4792_v46  ;;  %635 = vmatpush.msra.mxu1 %v4797_v47  ;;  %v4861_v55 = vld [vmem:[%s7848_s0 + $0xc8] sm:$0xff]  ;;  %v4899_v59 = vld [vmem:[%s7848_s0 + $0xd0] sm:$0xff]  ;;  %v4916_v60 = vld [vmem:[%s7848_s0 + $0x98] sm:$0xff] }
  0x1a   :  { %3596 = vmatmul.msk.f32.gmra.mxu0 %vm137_vm0, %v4702_v36  ;;  %3603 = vmatmul.msk.f32.gmra.mxu1 %vm137_vm0, %v4702_v36  ;;  %7924 = vst [vmem:[#allocation14_spill] sm:$0xff] %v4809_v49  ;;  %v4881_v57 = vld [vmem:[%s7849_s1 + $0x108] sm:$0xff]  ;;  %v4921_v61 = vld [vmem:[%s7848_s0 + $0xd8] sm:$0xff]  ;;  %v4934_v62 = vld [vmem:[%s7848_s0 + $0xa0] sm:$0xff] }
  0x1b   :  { %3610 = vmatmul.msk.f32.gmra.mxu2 %vm137_vm0, %v4707_v37  ;;  %3617 = vmatmul.msk.f32.gmra.mxu3 %vm137_vm0, %v4707_v37  ;;  %7925 = vst [vmem:[#allocation15_spill] sm:$0xff] %v4822_v50  ;;  %v4939_v63 = vld [vmem:[%s7848_s0 + $0xe0] sm:$0xff]  ;;  %v4952_v17 = vld [vmem:[%s7848_s0 + $0xa8] sm:$0xff] }
  0x1c   :  { %721 = vmatpush.msra.mxu2 %v4520_v8  ;;  %759 = vmatpush.msra.mxu3 %v4527_v9  ;;  %7926 = vst [vmem:[#allocation16_spill] sm:$0xff] %v4840_v52 }
  0x1d   :  { %7927 = vst [vmem:[#allocation17_spill] sm:$0xff] %v4845_v53  ;;  %598 = vmatpush.msra.mxu0 %v4840_v52  ;;  %636 = vmatpush.msra.mxu1 %v4845_v53 }
  0x1e   :  { %722 = vmatpush.msra.mxu2 %v4544_v12  ;;  %760 = vmatpush.msra.mxu3 %v4549_v13  ;;  %7928 = vst [vmem:[#allocation18_spill] sm:$0xff] %v4854_v54 }
  0x1f   :  { %7929 = vst [vmem:[#allocation19_spill] sm:$0xff] %v4876_v56  ;;  %599 = vmatpush.msra.mxu0 %v4876_v56  ;;  %637 = vmatpush.msra.mxu1 %v4881_v57 }
  0x20   :  { %7930 = vst [vmem:[#allocation20_spill] sm:$0xff] %v4881_v57 }
  0x21   :  { %7931 = vst [vmem:[#allocation21_spill] sm:$0xff] %v4892_v58 }
  0x22   :  { %3597 = vmatmul.msk.f32.gmra.mxu0 %vm137_vm0, %v4726_v38  ;;  %3604 = vmatmul.msk.f32.gmra.mxu1 %vm137_vm0, %v4726_v38  ;;  %7932 = vst [vmem:[#allocation22_spill] sm:$0xff] %v4916_v60 }
  0x23   :  { %3611 = vmatmul.msk.f32.gmra.mxu2 %vm137_vm0, %v4731_v39  ;;  %3618 = vmatmul.msk.f32.gmra.mxu3 %vm137_vm0, %v4731_v39  ;;  %7933 = vst [vmem:[#allocation23_spill] sm:$0xff] %v4934_v62 }
  0x24   :  { %7934 = vst [vmem:[#allocation24_spill] sm:$0xff] %v4952_v17 }
  0x2a   :  { %3598 = vmatmul.msk.f32.gmra.mxu0 %vm137_vm0, %v4756_v42  ;;  %3605 = vmatmul.msk.f32.gmra.mxu1 %vm137_vm0, %v4756_v42 }
  0x2b   :  { %3612 = vmatmul.msk.f32.gmra.mxu2 %vm137_vm0, %v4761_v43  ;;  %3619 = vmatmul.msk.f32.gmra.mxu3 %vm137_vm0, %v4761_v43 }
  0x32   :  { %3599 = vmatmul.msk.f32.gmra.mxu0 %vm137_vm0, %v4774_v44  ;;  %3606 = vmatmul.msk.f32.gmra.mxu1 %vm137_vm0, %v4774_v44 }
  0x33   :  { %3613 = vmatmul.msk.f32.gmra.mxu2 %vm137_vm0, %v4779_v45  ;;  %3620 = vmatmul.msk.f32.gmra.mxu3 %vm137_vm0, %v4779_v45 }
  0x3a   :  { %3600 = vmatmul.msk.f32.gmra.mxu0 %vm137_vm0, %v4804_v48  ;;  %3607 = vmatmul.msk.f32.gmra.mxu1 %vm137_vm0, %v4804_v48 }
  0x3b   :  { %3614 = vmatmul.msk.f32.gmra.mxu2 %vm137_vm0, %v4809_v49  ;;  %3621 = vmatmul.msk.f32.gmra.mxu3 %vm137_vm0, %v4809_v49 }
  0x42   :  { %3630 = vmatmul.msk.f32.vlgmr.msrb.gmra.mxu0 %vm137_vm0, %v4822_v50  ;;  %3637 = vmatmul.msk.f32.vlgmr.msrb.gmra.mxu1 %vm137_vm0, %v4822_v50 }
  0x43   :  { %3652 = vmatmul.msk.f32.vlgmr.msrb.gmra.mxu2 %vm137_vm0, %v4827_v51  ;;  %3659 = vmatmul.msk.f32.vlgmr.msrb.gmra.mxu3 %vm137_vm0, %v4827_v51 }
  0x44   :  { %871 = vmatpush.msrb.mxu2 %v4594_v20  ;;  %909 = vmatpush.msrb.mxu3 %v4599_v21 }
  0x45   :  { %795 = vmatpush.msrb.mxu0 %v4486_v2  ;;  %833 = vmatpush.msrb.mxu1 %v4493_v3 }
  0x46   :  { %872 = vmatpush.msrb.mxu2 %v4618_v24  ;;  %910 = vmatpush.msrb.mxu3 %v4623_v25 }
  0x47   :  { %796 = vmatpush.msrb.mxu0 %v4510_v6  ;;  %834 = vmatpush.msrb.mxu1 %v4515_v7 }
  0x48   :  { %873 = vmatpush.msrb.mxu2 %v4640_v28  ;;  %911 = vmatpush.msrb.mxu3 %v4645_v29  ;;  %v4975_v29 = vld [vmem:[%s7848_s0 + $0xf0] sm:$0xff] }
  0x49   :  { %797 = vmatpush.msrb.mxu0 %v4532_v10  ;;  %835 = vmatpush.msrb.mxu1 %v4537_v11 }
  0x4a   :  { %3631 = vmatmul.msk.f32.gmra.mxu0 %vm137_vm0, %v4854_v54  ;;  %3638 = vmatmul.msk.f32.gmra.mxu1 %vm137_vm0, %v4854_v54 }
  0x4b   :  { %3653 = vmatmul.msk.f32.gmra.mxu2 %vm137_vm0, %v4861_v55  ;;  %3660 = vmatmul.msk.f32.gmra.mxu3 %vm137_vm0, %v4861_v55 }
  0x4c   :  { %874 = vmatpush.msrb.mxu2 %v4686_v34  ;;  %912 = vmatpush.msrb.mxu3 %v4693_v35  ;;  %v4957_v35 = vld [vmem:[%s7848_s0 + $0xe8] sm:$0xff]  ;;  %v4970_v34 = vld [vmem:[%s7848_s0 + $0xb0] sm:$0xff] }
  0x4d   :  { %798 = vmatpush.msrb.mxu0 %v4556_v14  ;;  %836 = vmatpush.msrb.mxu1 %v4561_v15  ;;  %7935 = vst [vmem:[#allocation25_spill] sm:$0xff] %v4970_v34 }
  0x52   :  { %3632 = vmatmul.msk.f32.gmra.mxu0 %vm137_vm0, %v4892_v58  ;;  %3639 = vmatmul.msk.f32.gmra.mxu1 %vm137_vm0, %v4892_v58 }
  0x53   :  { %3654 = vmatmul.msk.f32.gmra.mxu2 %vm137_vm0, %v4899_v59  ;;  %3661 = vmatmul.msk.f32.gmra.mxu3 %vm137_vm0, %v4899_v59 }
  0x5a   :  { %3633 = vmatmul.msk.f32.gmra.mxu0 %vm137_vm0, %v4916_v60  ;;  %3640 = vmatmul.msk.f32.gmra.mxu1 %vm137_vm0, %v4916_v60 }
  0x5b   :  { %3655 = vmatmul.msk.f32.gmra.mxu2 %vm137_vm0, %v4921_v61  ;;  %3662 = vmatmul.msk.f32.gmra.mxu3 %vm137_vm0, %v4921_v61 }
  0x62   :  { %3634 = vmatmul.msk.f32.gmra.mxu0 %vm137_vm0, %v4934_v62  ;;  %3641 = vmatmul.msk.f32.gmra.mxu1 %vm137_vm0, %v4934_v62 }
  0x63   :  { %3656 = vmatmul.msk.f32.gmra.mxu2 %vm137_vm0, %v4939_v63  ;;  %3663 = vmatmul.msk.f32.gmra.mxu3 %vm137_vm0, %v4939_v63 }
  0x6a   :  { %3635 = vmatmul.msk.f32.gmra.mxu0 %vm137_vm0, %v4952_v17  ;;  %3642 = vmatmul.msk.f32.gmra.mxu1 %vm137_vm0, %v4952_v17 }
  0x6b   :  { %3657 = vmatmul.msk.f32.gmra.mxu2 %vm137_vm0, %v4957_v35  ;;  %3664 = vmatmul.msk.f32.gmra.mxu3 %vm137_vm0, %v4957_v35 }
  0x72   :  { %3636 = vmatmul.msk.f32.gmra.mxu0 %vm137_vm0, %v4970_v34  ;;  %3643 = vmatmul.msk.f32.gmra.mxu1 %vm137_vm0, %v4970_v34 }
  0x73   :  { %3658 = vmatmul.msk.f32.gmra.mxu2 %vm137_vm0, %v4975_v29  ;;  %3665 = vmatmul.msk.f32.gmra.mxu3 %vm137_vm0, %v4975_v29 }
  0x7a   :  { %3674 = vmatmul.msk.f32.vlgmr.msra.gmra.mxu0 %vm137_vm0, %v4659_v31  ;;  %3681 = vmatmul.msk.f32.vlgmr.msra.gmra.mxu1 %vm137_vm0, %v4659_v31 }
  0x7b   :  { %3688 = vmatmul.msk.f32.vlgmr.msra.gmra.mxu2 %vm137_vm0, %v4822_v50  ;;  %3695 = vmatmul.msk.f32.vlgmr.msra.gmra.mxu3 %vm137_vm0, %v4822_v50 }
  0x7c   :  { %1054 = vmatpush.msra.mxu2 %v4744_v40  ;;  %1092 = vmatpush.msra.mxu3 %v4749_v41 }
  0x7d   :  { %961 = vmatpush.msra.mxu0 %v4580_v18  ;;  %999 = vmatpush.msra.mxu1 %v4585_v19 }
  0x7e   :  { %1055 = vmatpush.msra.mxu2 %v4792_v46  ;;  %1093 = vmatpush.msra.mxu3 %v4797_v47 }
  0x7f   :  { %962 = vmatpush.msra.mxu0 %v4606_v22  ;;  %1000 = vmatpush.msra.mxu1 %v4611_v23 }
  0x80   :  { %1056 = vmatpush.msra.mxu2 %v4840_v52  ;;  %1094 = vmatpush.msra.mxu3 %v4845_v53 }
  0x81   :  { %963 = vmatpush.msra.mxu0 %v4628_v26  ;;  %1001 = vmatpush.msra.mxu1 %v4635_v27 }
  0x82   :  { %3675 = vmatmul.msk.f32.gmra.mxu0 %vm137_vm0, %v4707_v37  ;;  %3682 = vmatmul.msk.f32.gmra.mxu1 %vm137_vm0, %v4707_v37 }
  0x83   :  { %3689 = vmatmul.msk.f32.gmra.mxu2 %vm137_vm0, %v4854_v54  ;;  %3696 = vmatmul.msk.f32.gmra.mxu3 %vm137_vm0, %v4854_v54 }
  0x84   :  { %1057 = vmatpush.msra.mxu2 %v4876_v56  ;;  %1095 = vmatpush.msra.mxu3 %v4881_v57 }
  0x85   :  { %964 = vmatpush.msra.mxu0 %v4676_v32  ;;  %1002 = vmatpush.msra.mxu1 %v4681_v33 }
  0x87   :  { %v176_v53 = vpop.f32.mrf.mxu0  ;;  %v214_v52 = vpop.f32.mrf.mxu1 }
  0x8a   :  { %3676 = vmatmul.msk.f32.gmra.mxu0 %vm137_vm0, %v4731_v39  ;;  %3683 = vmatmul.msk.f32.gmra.mxu1 %vm137_vm0, %v4731_v39 }
  0x8b   :  { %3690 = vmatmul.msk.f32.gmra.mxu2 %vm137_vm0, %v4892_v58  ;;  %3697 = vmatmul.msk.f32.gmra.mxu3 %vm137_vm0, %v4892_v58 }
  0x8e   :  { %v273_v56 = vpop.f32.mrf.mxu2  ;;  %v311_v57 = vpop.f32.mrf.mxu3 }
  0x8f   :  { %v5025_v54 = vadd.f32 %v273_v56, %v176_v53  ;;  %v5027_v47 = vadd.f32 %v311_v57, %v214_v52  ;;  %v179_v46 = vpop.f32.mrf.mxu0  ;;  %v217_v41 = vpop.f32.mrf.mxu1 }
  0x92   :  { %3677 = vmatmul.msk.f32.gmra.mxu0 %vm137_vm0, %v4761_v43  ;;  %3684 = vmatmul.msk.f32.gmra.mxu1 %vm137_vm0, %v4761_v43  ;;  %v5068_v43 = vld [vmem:[%s7848_s0 + $0x38] sm:$0xff] }
  0x93   :  { %3691 = vmatmul.msk.f32.gmra.mxu2 %vm137_vm0, %v4916_v60  ;;  %3698 = vmatmul.msk.f32.gmra.mxu3 %vm137_vm0, %v4916_v60  ;;  %7936 = vst [vmem:[#allocation26_spill] sm:$0xff] %v5068_v43 }
  0x96   :  { %v276_v58 = vpop.f32.mrf.mxu2  ;;  %v314_v40 = vpop.f32.mrf.mxu3 }
  0x97   :  { %v5037_v53 = vadd.f32 %v276_v58, %v179_v46  ;;  %v5039_v52 = vadd.f32 %v314_v40, %v217_v41  ;;  %v182_v56 = vpop.f32.mrf.mxu0  ;;  %v220_v57 = vpop.f32.mrf.mxu1 }
  0x9a   :  { %3678 = vmatmul.msk.f32.gmra.mxu0 %vm137_vm0, %v4779_v45  ;;  %3685 = vmatmul.msk.f32.gmra.mxu1 %vm137_vm0, %v4779_v45 }
  0x9b   :  { %3692 = vmatmul.msk.f32.gmra.mxu2 %vm137_vm0, %v4934_v62  ;;  %3699 = vmatmul.msk.f32.gmra.mxu3 %vm137_vm0, %v4934_v62 }
  0x9e   :  { %v279_v60 = vpop.f32.mrf.mxu2  ;;  %v317_v50 = vpop.f32.mrf.mxu3 }
  0x9f   :  { %v5049_v46 = vadd.f32 %v279_v60, %v182_v56  ;;  %v5051_v40 = vadd.f32 %v317_v50, %v220_v57  ;;  %v185_v41 = vpop.f32.mrf.mxu0  ;;  %v223_v58 = vpop.f32.mrf.mxu1 }
  0xa2   :  { %3679 = vmatmul.msk.f32.gmra.mxu0 %vm137_vm0, %v4809_v49  ;;  %3686 = vmatmul.msk.f32.gmra.mxu1 %vm137_vm0, %v4809_v49 }
  0xa3   :  { %3693 = vmatmul.msk.f32.gmra.mxu2 %vm137_vm0, %v4952_v17  ;;  %3700 = vmatmul.msk.f32.gmra.mxu3 %vm137_vm0, %v4952_v17 }
  0xa6   :  { %v282_v62 = vpop.f32.mrf.mxu2  ;;  %v320_v45 = vpop.f32.mrf.mxu3 }
  0xa7   :  { %v5061_v60 = vadd.f32 %v282_v62, %v185_v41  ;;  %v5063_v50 = vadd.f32 %v320_v45, %v223_v58  ;;  %v188_v56 = vpop.f32.mrf.mxu0  ;;  %v226_v57 = vpop.f32.mrf.mxu1 }
  0xaa   :  { %3680 = vmatmul.msk.f32.gmra.mxu0 %vm137_vm0, %v5068_v43  ;;  %3687 = vmatmul.msk.f32.gmra.mxu1 %vm137_vm0, %v5068_v43 }
  0xab   :  { %3694 = vmatmul.msk.f32.gmra.mxu2 %vm137_vm0, %v4970_v34  ;;  %3701 = vmatmul.msk.f32.gmra.mxu3 %vm137_vm0, %v4970_v34 }
  0xae   :  { %v285_v45 = vpop.f32.mrf.mxu2  ;;  %v323_v62 = vpop.f32.mrf.mxu3 }
  0xaf   :  { %v5078_v41 = vadd.f32 %v285_v45, %v188_v56  ;;  %v5080_v58 = vadd.f32 %v323_v62, %v226_v57  ;;  %v191_v17 = vpop.f32.mrf.mxu0  ;;  %v229_v49 = vpop.f32.mrf.mxu1 }
  0xb2   :  { %3702 = vmatmul.msk.f32.vlgmr.msrb.gmra.mxu0 %vm137_vm0, %v4568_v16  ;;  %3709 = vmatmul.msk.f32.vlgmr.msrb.gmra.mxu1 %vm137_vm0, %v4568_v16 }
  0xb3   :  { %3716 = vmatmul.msk.f32.vlgmr.msrb.gmra.mxu2 %vm137_vm0, %v4827_v51  ;;  %3723 = vmatmul.msk.f32.vlgmr.msrb.gmra.mxu3 %vm137_vm0, %v4827_v51 }
  0xb4   :  { %1248 = vmatpush.msrb.mxu2 %v4486_v2  ;;  %1286 = vmatpush.msrb.mxu3 %v4493_v3 }
  0xb5   :  { %1172 = vmatpush.msrb.mxu0 %v4476_v0  ;;  %1210 = vmatpush.msrb.mxu1 %v4481_v1 }
  0xb6   :  { %v288_v56 = vpop.f32.mrf.mxu2  ;;  %v326_v57 = vpop.f32.mrf.mxu3  ;;  %1249 = vmatpush.msrb.mxu2 %v4510_v6  ;;  %1287 = vmatpush.msrb.mxu3 %v4515_v7 }
  0xb7   :  { %v5096_v16 = vadd.f32 %v288_v56, %v191_v17  ;;  %v5098_v45 = vadd.f32 %v326_v57, %v229_v49  ;;  %v194_v62 = vpop.f32.mrf.mxu0  ;;  %v232_v34 = vpop.f32.mrf.mxu1  ;;  %1173 = vmatpush.msrb.mxu0 %v4498_v4  ;;  %1211 = vmatpush.msrb.mxu1 %v4503_v5 }
  0xb8   :  { %1250 = vmatpush.msrb.mxu2 %v4532_v10  ;;  %1288 = vmatpush.msrb.mxu3 %v4537_v11 }
  0xb9   :  { %1174 = vmatpush.msrb.mxu0 %v4520_v8  ;;  %1212 = vmatpush.msrb.mxu1 %v4527_v9 }
  0xba   :  { %3703 = vmatmul.msk.f32.gmra.mxu0 %vm137_vm0, %v4652_v30  ;;  %3710 = vmatmul.msk.f32.gmra.mxu1 %vm137_vm0, %v4652_v30 }
  0xbb   :  { %3717 = vmatmul.msk.f32.gmra.mxu2 %vm137_vm0, %v4861_v55  ;;  %3724 = vmatmul.msk.f32.gmra.mxu3 %vm137_vm0, %v4861_v55 }
  0xbc   :  { %1251 = vmatpush.msrb.mxu2 %v4556_v14  ;;  %1289 = vmatpush.msrb.mxu3 %v4561_v15 }
  0xbd   :  { %1175 = vmatpush.msrb.mxu0 %v4544_v12  ;;  %1213 = vmatpush.msrb.mxu1 %v4549_v13 }
  0xbe   :  { %v291_v2 = vpop.f32.mrf.mxu2  ;;  %v329_v3 = vpop.f32.mrf.mxu3 }
  0xbf   :  { %v5118_v6 = vadd.f32 %v291_v2, %v194_v62  ;;  %v5120_v7 = vadd.f32 %v329_v3, %v232_v34  ;;  %v379_v10 = vpop.f32.mrf.mxu0  ;;  %v417_v11 = vpop.f32.mrf.mxu1 }
  0xc0   :  { %v438_v14 = vadd.f32 %v379_v10, %v5025_v54  ;;  %v439_v15 = vadd.f32 %v417_v11, %v5027_v47 }
  0xc2   :  { %3704 = vmatmul.msk.f32.gmra.mxu0 %vm137_vm0, %v4702_v36  ;;  %3711 = vmatmul.msk.f32.gmra.mxu1 %vm137_vm0, %v4702_v36 }
  0xc3   :  { %3718 = vmatmul.msk.f32.gmra.mxu2 %vm137_vm0, %v4899_v59  ;;  %3725 = vmatmul.msk.f32.gmra.mxu3 %vm137_vm0, %v4899_v59 }
  0xc6   :  { %v499_v34 = vpop.f32.mrf.mxu2  ;;  %v537_v49 = vpop.f32.mrf.mxu3 }
  0xc7   :  { %v5132_v17 = vadd.f32 %v499_v34, %v438_v14  ;;  %v5134_v56 = vadd.f32 %v537_v49, %v439_v15  ;;  %v382_v57 = vpop.f32.mrf.mxu0  ;;  %v420_v62 = vpop.f32.mrf.mxu1 }
  0xc8   :  { %v440_v47 = vadd.f32 %v382_v57, %v5037_v53  ;;  %v441_v54 = vadd.f32 %v420_v62, %v5039_v52 }
  0xca   :  { %3705 = vmatmul.msk.f32.gmra.mxu0 %vm137_vm0, %v4726_v38  ;;  %3712 = vmatmul.msk.f32.gmra.mxu1 %vm137_vm0, %v4726_v38 }
  0xcb   :  { %3719 = vmatmul.msk.f32.gmra.mxu2 %vm137_vm0, %v4921_v61  ;;  %3726 = vmatmul.msk.f32.gmra.mxu3 %vm137_vm0, %v4921_v61 }
  0xce   :  { %v502_v2 = vpop.f32.mrf.mxu2  ;;  %v540_v3 = vpop.f32.mrf.mxu3 }
  0xcf   :  { %v5146_v10 = vadd.f32 %v502_v2, %v440_v47  ;;  %v5148_v11 = vadd.f32 %v540_v3, %v441_v54  ;;  %v385_v14 = vpop.f32.mrf.mxu0  ;;  %v423_v15 = vpop.f32.mrf.mxu1 }
  0xd0   :  { %v442_v53 = vadd.f32 %v385_v14, %v5049_v46  ;;  %v443_v52 = vadd.f32 %v423_v15, %v5051_v40 }
  0xd2   :  { %3706 = vmatmul.msk.f32.gmra.mxu0 %vm137_vm0, %v4756_v42  ;;  %3713 = vmatmul.msk.f32.gmra.mxu1 %vm137_vm0, %v4756_v42 }
  0xd3   :  { %3720 = vmatmul.msk.f32.gmra.mxu2 %vm137_vm0, %v4939_v63  ;;  %3727 = vmatmul.msk.f32.gmra.mxu3 %vm137_vm0, %v4939_v63 }
  0xd6   :  { %v505_v34 = vpop.f32.mrf.mxu2  ;;  %v543_v49 = vpop.f32.mrf.mxu3 }
  0xd7   :  { %v5160_v57 = vadd.f32 %v505_v34, %v442_v53  ;;  %v5162_v62 = vadd.f32 %v543_v49, %v443_v52  ;;  %v388_v47 = vpop.f32.mrf.mxu0  ;;  %v426_v54 = vpop.f32.mrf.mxu1 }
  0xd8   :  { %v444_v46 = vadd.f32 %v388_v47, %v5061_v60  ;;  %v445_v40 = vadd.f32 %v426_v54, %v5063_v50 }
  0xda   :  { %3707 = vmatmul.msk.f32.gmra.mxu0 %vm137_vm0, %v4774_v44  ;;  %3714 = vmatmul.msk.f32.gmra.mxu1 %vm137_vm0, %v4774_v44 }
  0xdb   :  { %3721 = vmatmul.msk.f32.gmra.mxu2 %vm137_vm0, %v4957_v35  ;;  %3728 = vmatmul.msk.f32.gmra.mxu3 %vm137_vm0, %v4957_v35 }
  0xde   :  { %v508_v2 = vpop.f32.mrf.mxu2  ;;  %v546_v3 = vpop.f32.mrf.mxu3 }
  0xdf   :  { %v5174_v14 = vadd.f32 %v508_v2, %v444_v46  ;;  %v5176_v15 = vadd.f32 %v546_v3, %v445_v40  ;;  %v391_v53 = vpop.f32.mrf.mxu0  ;;  %v429_v52 = vpop.f32.mrf.mxu1 }
  0xe0   :  { %v446_v60 = vadd.f32 %v391_v53, %v5078_v41  ;;  %v447_v50 = vadd.f32 %v429_v52, %v5080_v58 }
  0xe2   :  { %3708 = vmatmul.msk.f32.gmra.mxu0 %vm137_vm0, %v4804_v48  ;;  %3715 = vmatmul.msk.f32.gmra.mxu1 %vm137_vm0, %v4804_v48 }
  0xe3   :  { %3722 = vmatmul.msk.f32.gmra.mxu2 %vm137_vm0, %v4975_v29  ;;  %3729 = vmatmul.msk.f32.gmra.mxu3 %vm137_vm0, %v4975_v29 }
  0xe6   :  { %v511_v34 = vpop.f32.mrf.mxu2  ;;  %v549_v49 = vpop.f32.mrf.mxu3 }
  0xe7   :  { %v5188_v47 = vadd.f32 %v511_v34, %v446_v60  ;;  %v5190_v54 = vadd.f32 %v549_v49, %v447_v50  ;;  %v394_v46 = vpop.f32.mrf.mxu0  ;;  %v432_v40 = vpop.f32.mrf.mxu1 }
  0xe8   :  { %v448_v41 = vadd.f32 %v394_v46, %v5096_v16  ;;  %v449_v58 = vadd.f32 %v432_v40, %v5098_v45  ;;  %v7940_v16 = vld [vmem:[#allocation5_spill] sm:$0xff]  ;;  %v7945_v40 = vld [vmem:[#allocation10_spill] sm:$0xff] }
  0xe9   :  { %7937 = vst [vmem:[#allocation27_spill] sm:$0xff] %v5190_v54 }
  0xea   :  { %3730 = vmatmul.msk.f32.vlgmr.msra.gmra.mxu0 %vm137_vm0, %v4659_v31  ;;  %3737 = vmatmul.msk.f32.vlgmr.msra.gmra.mxu1 %vm137_vm0, %v4659_v31 }
  0xeb   :  { %3744 = vmatmul.msk.f32.vlgmr.msra.gmra.mxu2 %vm137_vm0, %v4652_v30  ;;  %3751 = vmatmul.msk.f32.vlgmr.msra.gmra.mxu3 %vm137_vm0, %v4652_v30 }
  0xec   :  { %1414 = vmatpush.msra.mxu2 %v4580_v18  ;;  %1452 = vmatpush.msra.mxu3 %v4585_v19 }
  0xed   :  { %1324 = vmatpush.msra.mxu0 %v4594_v20  ;;  %1362 = vmatpush.msra.mxu1 %v4599_v21 }
  0xee   :  { %v514_v2 = vpop.f32.mrf.mxu2  ;;  %v552_v3 = vpop.f32.mrf.mxu3  ;;  %1415 = vmatpush.msra.mxu2 %v4606_v22  ;;  %1453 = vmatpush.msra.mxu3 %v4611_v23 }
  0xef   :  { %v5208_v53 = vadd.f32 %v514_v2, %v448_v41  ;;  %v5210_v52 = vadd.f32 %v552_v3, %v449_v58  ;;  %v397_v18 = vpop.f32.mrf.mxu0  ;;  %v435_v19 = vpop.f32.mrf.mxu1  ;;  %1325 = vmatpush.msra.mxu0 %v4618_v24  ;;  %1363 = vmatpush.msra.mxu1 %v4623_v25 }
  0xf0   :  { %1416 = vmatpush.msra.mxu2 %v4628_v26  ;;  %1454 = vmatpush.msra.mxu3 %v4635_v27  ;;  %v450_v22 = vadd.f32 %v397_v18, %v5118_v6  ;;  %v451_v23 = vadd.f32 %v435_v19, %v5120_v7  ;;  %v7941_v26 = vld [vmem:[#allocation6_spill] sm:$0xff]  ;;  %v7942_v27 = vld [vmem:[#allocation7_spill] sm:$0xff] }
  0xf1   :  { %7938 = vst [vmem:[#allocation28_spill] sm:$0xff] %v5208_v53  ;;  %1326 = vmatpush.msra.mxu0 %v4640_v28  ;;  %1364 = vmatpush.msra.mxu1 %v7940_v16  ;;  %v7946_v18 = vld [vmem:[#allocation11_spill] sm:$0xff] }
  0xf2   :  { %7939 = vst [vmem:[#allocation29_spill] sm:$0xff] %v5210_v52  ;;  %3731 = vmatmul.msk.f32.gmra.mxu0 %vm137_vm0, %v4707_v37  ;;  %3738 = vmatmul.msk.f32.gmra.mxu1 %vm137_vm0, %v4707_v37  ;;  %v5307_v52 = vld [vmem:[%s7848_s0 + $0x78] sm:$0xff] }
  0xf3   :  { %3745 = vmatmul.msk.f32.gmra.mxu2 %vm137_vm0, %v4702_v36  ;;  %3752 = vmatmul.msk.f32.gmra.mxu3 %vm137_vm0, %v4702_v36  ;;  %7950 = vst [vmem:[#allocation11_spill] sm:$0xff] %v5307_v52 }
  0xf4   :  { %1417 = vmatpush.msra.mxu2 %v4676_v32  ;;  %1455 = vmatpush.msra.mxu3 %v4681_v33 }
  0xf5   :  { %1327 = vmatpush.msra.mxu0 %v7941_v26  ;;  %1365 = vmatpush.msra.mxu1 %v7942_v27 }
  0xf6   :  { %v517_v45 = vpop.f32.mrf.mxu2  ;;  %v555_v60 = vpop.f32.mrf.mxu3 }
  0xf7   :  { %v5232_v50 = vadd.f32 %v517_v45, %v450_v22  ;;  %v5234_v34 = vadd.f32 %v555_v60, %v451_v23  ;;  %v5236_v49 = vpop.f32.mrf.mxu0  ;;  %v5238_v46 = vpop.f32.mrf.mxu1  ;;  %v7947_v60 = vld [vmem:[#allocation14_spill] sm:$0xff] }
  0xf9   :  { %7943 = vst [vmem:[#allocation5_spill] sm:$0xff] %v5232_v50 }
  0xfa   :  { %7944 = vst [vmem:[#allocation6_spill] sm:$0xff] %v5234_v34  ;;  %3732 = vmatmul.msk.f32.gmra.mxu0 %vm137_vm0, %v4731_v39  ;;  %3739 = vmatmul.msk.f32.gmra.mxu1 %vm137_vm0, %v4731_v39 }
  0xfb   :  { %3746 = vmatmul.msk.f32.gmra.mxu2 %vm137_vm0, %v4726_v38  ;;  %3753 = vmatmul.msk.f32.gmra.mxu3 %vm137_vm0, %v4726_v38 }
  0xfe   :  { %v5248_v32 = vpop.f32.mrf.mxu2  ;;  %v5250_v33 = vpop.f32.mrf.mxu3 }
  0xff   :  { %v5252_v6 = vpop.f32.mrf.mxu0  ;;  %v5254_v7 = vpop.f32.mrf.mxu1 }
 0x102   :  { %3733 = vmatmul.msk.f32.gmra.mxu0 %vm137_vm0, %v7945_v40  ;;  %3740 = vmatmul.msk.f32.gmra.mxu1 %vm137_vm0, %v7945_v40 }
 0x103   :  { %3747 = vmatmul.msk.f32.gmra.mxu2 %vm137_vm0, %v4756_v42  ;;  %3754 = vmatmul.msk.f32.gmra.mxu3 %vm137_vm0, %v4756_v42 }
 0x106   :  { %v5264_v41 = vpop.f32.mrf.mxu2  ;;  %v5266_v58 = vpop.f32.mrf.mxu3 }
 0x107   :  { %v5268_v2 = vpop.f32.mrf.mxu0  ;;  %v5270_v3 = vpop.f32.mrf.mxu1 }
 0x10a   :  { %3734 = vmatmul.msk.f32.gmra.mxu0 %vm137_vm0, %v7946_v18  ;;  %3741 = vmatmul.msk.f32.gmra.mxu1 %vm137_vm0, %v7946_v18 }
 0x10b   :  { %3748 = vmatmul.msk.f32.gmra.mxu2 %vm137_vm0, %v4774_v44  ;;  %3755 = vmatmul.msk.f32.gmra.mxu3 %vm137_vm0, %v4774_v44 }
 0x10e   :  { %v5280_v19 = vpop.f32.mrf.mxu2  ;;  %v5282_v22 = vpop.f32.mrf.mxu3 }
 0x10f   :  { %v5284_v23 = vpop.f32.mrf.mxu0  ;;  %v5286_v45 = vpop.f32.mrf.mxu1 }
 0x112   :  { %3735 = vmatmul.msk.f32.gmra.mxu0 %vm137_vm0, %v7947_v60  ;;  %3742 = vmatmul.msk.f32.gmra.mxu1 %vm137_vm0, %v7947_v60 }
 0x113   :  { %3749 = vmatmul.msk.f32.gmra.mxu2 %vm137_vm0, %v4804_v48  ;;  %3756 = vmatmul.msk.f32.gmra.mxu3 %vm137_vm0, %v4804_v48 }
 0x116   :  { %v5296_v44 = vpop.f32.mrf.mxu2  ;;  %v5298_v18 = vpop.f32.mrf.mxu3 }
 0x117   :  { %v5300_v34 = vpop.f32.mrf.mxu0  ;;  %v5302_v50 = vpop.f32.mrf.mxu1 }
 0x118   :  { %7948 = vst [vmem:[#allocation7_spill] sm:$0xff] %v5300_v34 }
 0x119   :  { %7949 = vst [vmem:[#allocation10_spill] sm:$0xff] %v5302_v50 }
 0x11a   :  { %3736 = vmatmul.msk.f32.gmra.mxu0 %vm137_vm0, %v5068_v43  ;;  %3743 = vmatmul.msk.f32.gmra.mxu1 %vm137_vm0, %v5068_v43  ;;  %v7953_v43 = vld [vmem:[#allocation15_spill] sm:$0xff] }
 0x11b   :  { %3750 = vmatmul.msk.f32.gmra.mxu2 %vm137_vm0, %v5307_v52  ;;  %3757 = vmatmul.msk.f32.gmra.mxu3 %vm137_vm0, %v5307_v52  ;;  %v7954_v52 = vld [vmem:[#allocation8_spill] sm:$0xff] }
 0x11e   :  { %v5317_v48 = vpop.f32.mrf.mxu2  ;;  %v5319_v60 = vpop.f32.mrf.mxu3 }
 0x11f   :  { %v5321_v53 = vpop.f32.mrf.mxu0  ;;  %v5323_v50 = vpop.f32.mrf.mxu1 }
 0x120   :  { %7951 = vst [vmem:[#allocation14_spill] sm:$0xff] %v5321_v53  ;;  %v7955_v53 = vld [vmem:[#allocation9_spill] sm:$0xff] }
 0x121   :  { %7952 = vst [vmem:[#allocation30_spill] sm:$0xff] %v5323_v50 }
 0x122   :  { %3758 = vmatmul.msk.f32.vlgmr.msrb.gmra.mxu0 %vm137_vm0, %v4827_v51  ;;  %3765 = vmatmul.msk.f32.vlgmr.msrb.gmra.mxu1 %vm137_vm0, %v4827_v51 }
 0x123   :  { %3772 = vmatmul.msk.f32.vlgmr.msrb.gmra.mxu2 %vm137_vm0, %v7953_v43  ;;  %3779 = vmatmul.msk.f32.vlgmr.msrb.gmra.mxu3 %vm137_vm0, %v7953_v43  ;;  %v7957_v43 = vld [vmem:[#allocation12_spill] sm:$0xff] }
 0x124   :  { %1625 = vmatpush.msrb.mxu2 %v4476_v0  ;;  %1663 = vmatpush.msrb.mxu3 %v4481_v1  ;;  %v7958_v0 = vld [vmem:[#allocation13_spill] sm:$0xff]  ;;  %v7959_v1 = vld [vmem:[#allocation16_spill] sm:$0xff] }
 0x125   :  { %1507 = vmatpush.msrb.mxu0 %v7954_v52  ;;  %1545 = vmatpush.msrb.mxu1 %v7955_v53  ;;  %v7960_v53 = vld [vmem:[#allocation17_spill] sm:$0xff] }
 0x126   :  { %v5337_v50 = vpop.f32.mrf.mxu2  ;;  %v5339_v54 = vpop.f32.mrf.mxu3  ;;  %1626 = vmatpush.msrb.mxu2 %v4498_v4  ;;  %1664 = vmatpush.msrb.mxu3 %v4503_v5  ;;  %v7961_v4 = vld [vmem:[#allocation18_spill] sm:$0xff]  ;;  %v7962_v5 = vld [vmem:[#allocation19_spill] sm:$0xff] }
 0x127   :  { %v5343_v51 = vpop.f32.mrf.mxu0  ;;  %v5345_v34 = vpop.f32.mrf.mxu1  ;;  %1508 = vmatpush.msrb.mxu0 %v7957_v43  ;;  %1546 = vmatpush.msrb.mxu1 %v7958_v0  ;;  %v7964_v0 = vld [vmem:[#allocation21_spill] sm:$0xff] }
 0x128   :  { %7956 = vst [vmem:[#allocation15_spill] sm:$0xff] %v5345_v34  ;;  %1627 = vmatpush.msrb.mxu2 %v4520_v8  ;;  %1665 = vmatpush.msrb.mxu3 %v4527_v9  ;;  %v7963_v8 = vld [vmem:[#allocation20_spill] sm:$0xff] }
 0x129   :  { %1509 = vmatpush.msrb.mxu0 %v7959_v1  ;;  %1547 = vmatpush.msrb.mxu1 %v7960_v53 }
 0x12a   :  { %3759 = vmatmul.msk.f32.gmra.mxu0 %vm137_vm0, %v4861_v55  ;;  %3766 = vmatmul.msk.f32.gmra.mxu1 %vm137_vm0, %v4861_v55 }
 0x12b   :  { %3773 = vmatmul.msk.f32.gmra.mxu2 %vm137_vm0, %v7961_v4  ;;  %3780 = vmatmul.msk.f32.gmra.mxu3 %vm137_vm0, %v7961_v4 }
 0x12c   :  { %1628 = vmatpush.msrb.mxu2 %v4544_v12  ;;  %1666 = vmatpush.msrb.mxu3 %v4549_v13 }
 0x12d   :  { %1510 = vmatpush.msrb.mxu0 %v7962_v5  ;;  %1548 = vmatpush.msrb.mxu1 %v7963_v8 }
 0x12e   :  { %v5365_v9 = vpop.f32.mrf.mxu2  ;;  %v5367_v52 = vpop.f32.mrf.mxu3 }
 0x12f   :  { %v800_v43 = vpop.f32.mrf.mxu0  ;;  %v838_v55 = vpop.f32.mrf.mxu1 }
 0x130   :  { %v801_v12 = vadd.f32 %v800_v43, %v5248_v32  ;;  %v839_v13 = vadd.f32 %v838_v55, %v5250_v33 }
 0x132   :  { %3760 = vmatmul.msk.f32.gmra.mxu0 %vm137_vm0, %v4899_v59  ;;  %3767 = vmatmul.msk.f32.gmra.mxu1 %vm137_vm0, %v4899_v59  ;;  %v7965_v59 = vld [vmem:[#allocation22_spill] sm:$0xff] }
 0x133   :  { %3774 = vmatmul.msk.f32.gmra.mxu2 %vm137_vm0, %v7964_v0  ;;  %3781 = vmatmul.msk.f32.gmra.mxu3 %vm137_vm0, %v7964_v0 }
 0x136   :  { %v876_v1 = vpop.f32.mrf.mxu2  ;;  %v914_v53 = vpop.f32.mrf.mxu3 }
 0x137   :  { %v5379_v4 = vadd.f32 %v876_v1, %v801_v12  ;;  %v5381_v5 = vadd.f32 %v914_v53, %v839_v13  ;;  %v803_v8 = vpop.f32.mrf.mxu0  ;;  %v841_v34 = vpop.f32.mrf.mxu1 }
 0x138   :  { %v804_v32 = vadd.f32 %v803_v8, %v5264_v41  ;;  %v842_v33 = vadd.f32 %v841_v34, %v5266_v58 }
 0x13a   :  { %3761 = vmatmul.msk.f32.gmra.mxu0 %vm137_vm0, %v4921_v61  ;;  %3768 = vmatmul.msk.f32.gmra.mxu1 %vm137_vm0, %v4921_v61  ;;  %v7966_v61 = vld [vmem:[#allocation23_spill] sm:$0xff] }
 0x13b   :  { %3775 = vmatmul.msk.f32.gmra.mxu2 %vm137_vm0, %v7965_v59  ;;  %3782 = vmatmul.msk.f32.gmra.mxu3 %vm137_vm0, %v7965_v59 }
 0x13e   :  { %v879_v43 = vpop.f32.mrf.mxu2  ;;  %v917_v55 = vpop.f32.mrf.mxu3 }
 0x13f   :  { %v5393_v0 = vadd.f32 %v879_v43, %v804_v32  ;;  %v5395_v12 = vadd.f32 %v917_v55, %v842_v33  ;;  %v806_v13 = vpop.f32.mrf.mxu0  ;;  %v844_v1 = vpop.f32.mrf.mxu1 }
 0x140   :  { %v807_v34 = vadd.f32 %v806_v13, %v5280_v19  ;;  %v845_v41 = vadd.f32 %v844_v1, %v5282_v22 }
 0x142   :  { %3762 = vmatmul.msk.f32.gmra.mxu0 %vm137_vm0, %v4939_v63  ;;  %3769 = vmatmul.msk.f32.gmra.mxu1 %vm137_vm0, %v4939_v63  ;;  %v7967_v63 = vld [vmem:[#allocation24_spill] sm:$0xff] }
 0x143   :  { %3776 = vmatmul.msk.f32.gmra.mxu2 %vm137_vm0, %v7966_v61  ;;  %3783 = vmatmul.msk.f32.gmra.mxu3 %vm137_vm0, %v7966_v61 }
 0x146   :  { %v882_v58 = vpop.f32.mrf.mxu2  ;;  %v920_v53 = vpop.f32.mrf.mxu3 }
 0x147   :  { %v5407_v8 = vadd.f32 %v882_v58, %v807_v34  ;;  %v5409_v59 = vadd.f32 %v920_v53, %v845_v41  ;;  %v809_v32 = vpop.f32.mrf.mxu0  ;;  %v847_v33 = vpop.f32.mrf.mxu1 }
 0x148   :  { %v810_v19 = vadd.f32 %v809_v32, %v5296_v44  ;;  %v848_v22 = vadd.f32 %v847_v33, %v5298_v18 }
 0x14a   :  { %3763 = vmatmul.msk.f32.gmra.mxu0 %vm137_vm0, %v4957_v35  ;;  %3770 = vmatmul.msk.f32.gmra.mxu1 %vm137_vm0, %v4957_v35  ;;  %v7968_v35 = vld [vmem:[#allocation25_spill] sm:$0xff] }
 0x14b   :  { %3777 = vmatmul.msk.f32.gmra.mxu2 %vm137_vm0, %v7967_v63  ;;  %3784 = vmatmul.msk.f32.gmra.mxu3 %vm137_vm0, %v7967_v63 }
 0x14e   :  { %v885_v43 = vpop.f32.mrf.mxu2  ;;  %v923_v55 = vpop.f32.mrf.mxu3 }
 0x14f   :  { %v5421_v13 = vadd.f32 %v885_v43, %v810_v19  ;;  %v5423_v1 = vadd.f32 %v923_v55, %v848_v22  ;;  %v812_v61 = vpop.f32.mrf.mxu0  ;;  %v850_v34 = vpop.f32.mrf.mxu1  ;;  %v4328_v22 = vld [vmem:[%s7849_s1 + $0x20] sm:$0xff]  ;;  %v4329_v43 = vld [vmem:[%s7849_s1 + $0x28] sm:$0xff] }
 0x150   :  { %v813_v44 = vadd.f32 %v812_v61, %v5317_v48  ;;  %v851_v18 = vadd.f32 %v850_v34, %v5319_v60  ;;  %v4326_v60 = vld [vmem:[%s7849_s1 + $0x30] sm:$0xff]  ;;  %v4332_v55 = vld [vmem:[%s7849_s1] sm:$0xff] }
 0x152   :  { %3764 = vmatmul.msk.f32.gmra.mxu0 %vm137_vm0, %v4975_v29  ;;  %3771 = vmatmul.msk.f32.gmra.mxu1 %vm137_vm0, %v4975_v29 }
 0x153   :  { %3778 = vmatmul.msk.f32.gmra.mxu2 %vm137_vm0, %v7968_v35  ;;  %3785 = vmatmul.msk.f32.gmra.mxu3 %vm137_vm0, %v7968_v35  ;;  %v660_v35 = vadd.f32 %v5236_v49, %v5132_v17 }
 0x156   :  { %v888_v41 = vpop.f32.mrf.mxu2  ;;  %v926_v58 = vpop.f32.mrf.mxu3 }
 0x157   :  { %v5435_v53 = vadd.f32 %v888_v41, %v813_v44  ;;  %v5437_v32 = vadd.f32 %v926_v58, %v851_v18  ;;  %v815_v33 = vpop.f32.mrf.mxu0  ;;  %v853_v63 = vpop.f32.mrf.mxu1  ;;  %v661_v18 = vadd.f32 %v5238_v46, %v5134_v56 }
 0x158   :  { %v816_v29 = vadd.f32 %v815_v33, %v5337_v50  ;;  %v854_v48 = vadd.f32 %v853_v63, %v5339_v54 }
 0x15a   :  { %3786 = vmatmul.msk.f32.vlgmr.msra.gmra.mxu0 %vm137_vm0, %v4659_v31  ;;  %3793 = vmatmul.msk.f32.vlgmr.msra.gmra.mxu1 %vm137_vm0, %v4659_v31  ;;  %v4327_v31 = vld [vmem:[%s7849_s1 + $0x38] sm:$0xff] }
 0x15b   :  { %3800 = vmatmul.msk.f32.vlgmr.msra.gmra.mxu2 %vm137_vm0, %v4652_v30  ;;  %3807 = vmatmul.msk.f32.vlgmr.msra.gmra.mxu3 %vm137_vm0, %v4652_v30 }
 0x15c   :  { %1777 = vmatpush.msra.mxu2 %v4594_v20  ;;  %1815 = vmatpush.msra.mxu3 %v4599_v21 }
 0x15d   :  { %1701 = vmatpush.msra.mxu0 %v4326_v60  ;;  %1739 = vmatpush.msra.mxu1 %v4327_v31  ;;  %v662_v60 = vadd.f32 %v5252_v6, %v5146_v10 }
 0x15e   :  { %v891_v19 = vpop.f32.mrf.mxu2  ;;  %v929_v30 = vpop.f32.mrf.mxu3  ;;  %1778 = vmatpush.msra.mxu2 %v4618_v24  ;;  %1816 = vmatpush.msra.mxu3 %v4623_v25  ;;  %v4330_v24 = vld [vmem:[%s7849_s1 + $0x10] sm:$0xff]  ;;  %v4331_v25 = vld [vmem:[%s7849_s1 + $0x18] sm:$0xff] }
 0x15f   :  { %v5459_v20 = vadd.f32 %v891_v19, %v816_v29  ;;  %v5461_v21 = vadd.f32 %v929_v30, %v854_v48  ;;  %v818_v54 = vpop.f32.mrf.mxu0  ;;  %v856_v50 = vpop.f32.mrf.mxu1  ;;  %1702 = vmatpush.msra.mxu0 %v4328_v22  ;;  %1740 = vmatpush.msra.mxu1 %v4329_v43 }
 0x160   :  { %1779 = vmatpush.msra.mxu2 %v4640_v28  ;;  %1817 = vmatpush.msra.mxu3 %v7940_v16  ;;  %v819_v28 = vadd.f32 %v818_v54, %v5365_v9  ;;  %v857_v16 = vadd.f32 %v856_v50, %v5367_v52 }
 0x161   :  { %1703 = vmatpush.msra.mxu0 %v4330_v24  ;;  %1741 = vmatpush.msra.mxu1 %v4331_v25 }
 0x162   :  { %3787 = vmatmul.msk.f32.gmra.mxu0 %vm137_vm0, %v4707_v37  ;;  %3794 = vmatmul.msk.f32.gmra.mxu1 %vm137_vm0, %v4707_v37  ;;  %v4333_v37 = vld [vmem:[%s7849_s1 + $0x8] sm:$0xff] }
 0x163   :  { %3801 = vmatmul.msk.f32.gmra.mxu2 %vm137_vm0, %v4702_v36  ;;  %3808 = vmatmul.msk.f32.gmra.mxu3 %vm137_vm0, %v4702_v36  ;;  %v77_v36 = vld [vmem:[%s7850_s2] sm:$0x3] }
 0x164   :  { %1780 = vmatpush.msra.mxu2 %v7941_v26  ;;  %1818 = vmatpush.msra.mxu3 %v7942_v27  ;;  %v5504_v44 = vperm.slane %v77_v36, 0  ;;  %v5508_v41 = vperm.slane %v77_v36, 1 }
 0x165   :  { %1704 = vmatpush.msra.mxu0 %v4332_v55  ;;  %1742 = vmatpush.msra.mxu1 %v4333_v37  ;;  %v5551_v55 = vld [vmem:[%s7848_s0 + $0x28] sm:$0xff] }
 0x166   :  { %v894_v26 = vpop.f32.mrf.mxu2  ;;  %v932_v27 = vpop.f32.mrf.mxu3  ;;  %v679_v17 = vadd.f32 %v5504_v44, %v660_v35  ;;  %v680_v46 = vadd.f32 %v5508_v41, %v661_v18  ;;  %v681_v10 = vadd.f32 %v5504_v44, %v662_v60 }
 0x167   :  { %v5498_v61 = vadd.f32 %v894_v26, %v819_v28  ;;  %v5500_v9 = vadd.f32 %v932_v27, %v857_v16  ;;  %v966_v52 = vpop.f32.mrf.mxu0  ;;  %v1004_v34 = vpop.f32.mrf.mxu1  ;;  %v665_v28 = vadd.f32 %v5270_v3, %v5162_v62  ;;  %v5562_v62 = vld [vmem:[%s7848_s0 + $0x68] sm:$0xff] }
 0x168   :  { %v1025_v49 = vadd.f32 %v966_v52, %v5379_v4  ;;  %v1026_v56 = vadd.f32 %v1004_v34, %v5381_v5  ;;  %4174 = vtanh.f32 %v679_v17  ;;  %v663_v4 = vadd.f32 %v5254_v7, %v5148_v11 }
 0x169   :  { %4176 = vtanh.f32 %v680_v46  ;;  %v684_v36 = vadd.f32 %v5508_v41, %v665_v28  ;;  %v666_v46 = vadd.f32 %v5284_v23, %v5174_v14  ;;  %v5592_v23 = vld [vmem:[%s7848_s0 + $0x70] sm:$0xff] }
 0x16a   :  { %3788 = vmatmul.msk.f32.gmra.mxu0 %vm137_vm0, %v4731_v39  ;;  %3795 = vmatmul.msk.f32.gmra.mxu1 %vm137_vm0, %v4731_v39  ;;  %v682_v7 = vadd.f32 %v5508_v41, %v663_v4 }
 0x16b   :  { %3802 = vmatmul.msk.f32.gmra.mxu2 %vm137_vm0, %v4726_v38  ;;  %3809 = vmatmul.msk.f32.gmra.mxu3 %vm137_vm0, %v4726_v38 }
 0x16e   :  { %v1059_v58 = vpop.f32.mrf.mxu2  ;;  %v1097_v33 = vpop.f32.mrf.mxu3 }
 0x16f   :  { %v1118_v63 = vadd.f32 %v1059_v58, %v1025_v49  ;;  %v1119_v29 = vadd.f32 %v1097_v33, %v1026_v56  ;;  %v969_v48 = vpop.f32.mrf.mxu0  ;;  %v1007_v39 = vpop.f32.mrf.mxu1  ;;  %v667_v33 = vadd.f32 %v5286_v45, %v5176_v15  ;;  %v685_v45 = vadd.f32 %v5504_v44, %v666_v46  ;;  %v7976_v46 = vld [vmem:[#allocation29_spill] sm:$0xff] }
 0x170   :  { %v1027_v6 = vadd.f32 %v969_v48, %v5393_v0  ;;  %v1028_v11 = vadd.f32 %v1007_v39, %v5395_v12  ;;  %v4175_v30 = vpop.eup %4174 }
 0x171   :  { %v1132_v38 = vadd.f32 %v1118_v63, %v5504_v44  ;;  %v1133_v31 = vadd.f32 %v1119_v29, %v5508_v41  ;;  %v4177_v43 = vpop.eup %4176  ;;  %v5581_v63 = vld [vmem:[%s7848_s0 + $0x30] sm:$0xff]  ;;  %v686_v39 = vadd.f32 %v5508_v41, %v667_v33 }
 0x172   :  { %3789 = vmatmul.msk.f32.gmra.mxu0 %vm137_vm0, %v7945_v40  ;;  %3796 = vmatmul.msk.f32.gmra.mxu1 %vm137_vm0, %v7945_v40 }
 0x173   :  { %4178 = vtanh.f32 %v1132_v38  ;;  %3803 = vmatmul.msk.f32.gmra.mxu2 %vm137_vm0, %v4756_v42  ;;  %3810 = vmatmul.msk.f32.gmra.mxu3 %vm137_vm0, %v4756_v42  ;;  %v664_v42 = vadd.f32 %v5268_v2, %v5160_v57 }
 0x174   :  { %4180 = vtanh.f32 %v1133_v31 }
 0x175   :  { %4182 = vtanh.f32 %v681_v10  ;;  %v683_v2 = vadd.f32 %v5504_v44, %v664_v42  ;;  %v7973_v42 = vld [vmem:[#allocation11_spill] sm:$0xff] }
 0x176   :  { %v1062_v5 = vpop.f32.mrf.mxu2  ;;  %v1100_v19 = vpop.f32.mrf.mxu3  ;;  %4184 = vtanh.f32 %v682_v7 }
 0x177   :  { %v1120_v40 = vadd.f32 %v1062_v5, %v1027_v6  ;;  %v1121_v54 = vadd.f32 %v1100_v19, %v1028_v11  ;;  %v972_v50 = vpop.f32.mrf.mxu0  ;;  %v1010_v22 = vpop.f32.mrf.mxu1  ;;  %v7969_v19 = vld [vmem:[#allocation7_spill] sm:$0xff] }
 0x178   :  { %v1029_v3 = vadd.f32 %v972_v50, %v5407_v8  ;;  %v1030_v37 = vadd.f32 %v1010_v22, %v5409_v59  ;;  %v7971_v50 = vld [vmem:[#allocation10_spill] sm:$0xff] }
 0x179   :  { %v4179_v24 = vpop.eup %4178  ;;  %v1134_v25 = vadd.f32 %v1120_v40, %v5504_v44  ;;  %v1135_v0 = vadd.f32 %v1121_v54, %v5508_v41  ;;  %v7970_v54 = vld [vmem:[#allocation27_spill] sm:$0xff] }
 0x17a   :  { %v4181_v12 = vpop.eup %4180  ;;  %v5546_v16 = vadd.f32 %v4179_v24, %v4175_v30  ;;  %3790 = vmatmul.msk.f32.gmra.mxu0 %vm137_vm0, %v5551_v55  ;;  %3797 = vmatmul.msk.f32.gmra.mxu1 %vm137_vm0, %v5551_v55  ;;  %v668_v30 = vadd.f32 %v7969_v19, %v5188_v47  ;;  %v669_v22 = vadd.f32 %v7971_v50, %v7970_v54  ;;  %v4347_v54 = vld [vmem:[%s7849_s1 + $0xe8] sm:$0xff] }
 0x17b   :  { %v5557_v57 = vadd.f32 %v4181_v12, %v4177_v43  ;;  %4186 = vtanh.f32 %v1134_v25  ;;  %3804 = vmatmul.msk.f32.gmra.mxu2 %vm137_vm0, %v5562_v62  ;;  %3811 = vmatmul.msk.f32.gmra.mxu3 %vm137_vm0, %v5562_v62  ;;  %v4183_v52 = vpop.eup %4182  ;;  %v7972_v43 = vld [vmem:[#allocation26_spill] sm:$0xff] }
 0x17c   :  { %4188 = vtanh.f32 %v1135_v0  ;;  %v4185_v49 = vpop.eup %4184  ;;  %v687_v25 = vadd.f32 %v5504_v44, %v668_v30  ;;  %v688_v28 = vadd.f32 %v5508_v41, %v669_v22  ;;  %v4348_v22 = vld [vmem:[%s7849_s1 + $0x110] sm:$0xff] }
 0x17d   :  { %4190 = vtanh.f32 %v683_v2 }
 0x17e   :  { %v1065_v26 = vpop.f32.mrf.mxu2  ;;  %v1103_v27 = vpop.f32.mrf.mxu3  ;;  %4192 = vtanh.f32 %v684_v36 }
 0x17f   :  { %v1122_v34 = vadd.f32 %v1065_v26, %v1029_v3  ;;  %v1123_v35 = vadd.f32 %v1103_v27, %v1030_v37  ;;  %v975_v18 = vpop.f32.mrf.mxu0  ;;  %v1013_v17 = vpop.f32.mrf.mxu1 }
 0x180   :  { %v1031_v29 = vadd.f32 %v975_v18, %v5421_v13  ;;  %v1032_v48 = vadd.f32 %v1013_v17, %v5423_v1  ;;  %v7974_v18 = vld [vmem:[#allocation28_spill] sm:$0xff]  ;;  %v7975_v17 = vld [vmem:[#allocation14_spill] sm:$0xff] }
 0x181   :  { %v4187_v56 = vpop.eup %4186  ;;  %v1136_v58 = vadd.f32 %v1122_v34, %v5504_v44  ;;  %v1137_v8 = vadd.f32 %v1123_v35, %v5508_v41 }
 0x182   :  { %v4189_v59 = vpop.eup %4188  ;;  %3791 = vmatmul.msk.f32.gmra.mxu0 %vm137_vm0, %v5581_v63  ;;  %3798 = vmatmul.msk.f32.gmra.mxu1 %vm137_vm0, %v5581_v63  ;;  %v5587_v14 = vadd.f32 %v4187_v56, %v4183_v52 }
 0x183   :  { %4194 = vtanh.f32 %v1136_v58  ;;  %3805 = vmatmul.msk.f32.gmra.mxu2 %vm137_vm0, %v5592_v23  ;;  %3812 = vmatmul.msk.f32.gmra.mxu3 %vm137_vm0, %v5592_v23  ;;  %v5598_v15 = vadd.f32 %v4189_v59, %v4185_v49  ;;  %v4191_v31 = vpop.eup %4190  ;;  %v670_v49 = vadd.f32 %v7975_v17, %v7974_v18  ;;  %v7977_v58 = vld [vmem:[#allocation30_spill] sm:$0xff]  ;;  %v5635_v59 = vld [vmem:[%s7848_s0 + $0x88] sm:$0xff]  ;;  %v4354_v17 = vld [vmem:[%s7849_s1 + $0x100] sm:$0xff] }
 0x184   :  { %4196 = vtanh.f32 %v1137_v8  ;;  %v4193_v7 = vpop.eup %4192  ;;  %v671_v8 = vadd.f32 %v7977_v58, %v7976_v46  ;;  %v4356_v46 = vld [vmem:[%s7849_s1 + $0xc0] sm:$0xff]  ;;  %v4357_v58 = vld [vmem:[%s7849_s1 + $0xc8] sm:$0xff] }
 0x185   :  { %4198 = vtanh.f32 %v685_v45  ;;  %v4339_v45 = vld [vmem:[%s7848_s0 + $0x8] sm:$0xff] }
 0x186   :  { %v1068_v60 = vpop.f32.mrf.mxu2  ;;  %v1106_v38 = vpop.f32.mrf.mxu3  ;;  %4200 = vtanh.f32 %v686_v39  ;;  %v4341_v39 = vld [vmem:[%s7849_s1 + $0x138] sm:$0xff] }
 0x187   :  { %v1124_v4 = vadd.f32 %v1068_v60, %v1031_v29  ;;  %v1125_v10 = vadd.f32 %v1106_v38, %v1032_v48  ;;  %v978_v6 = vpop.f32.mrf.mxu0  ;;  %v1016_v11 = vpop.f32.mrf.mxu1  ;;  %v4340_v48 = vld [vmem:[%s7849_s1 + $0x130] sm:$0xff]  ;;  %v689_v60 = vadd.f32 %v5504_v44, %v670_v49  ;;  %v4355_v49 = vld [vmem:[%s7849_s1 + $0x108] sm:$0xff] }
 0x188   :  { %v1033_v0 = vadd.f32 %v978_v6, %v5435_v53  ;;  %v1034_v12 = vadd.f32 %v1016_v11, %v5437_v32  ;;  %v690_v6 = vadd.f32 %v5508_v41, %v671_v8 }
 0x189   :  { %v4195_v5 = vpop.eup %4194  ;;  %v1138_v40 = vadd.f32 %v1124_v4, %v5504_v44  ;;  %v1139_v13 = vadd.f32 %v1125_v10, %v5508_v41  ;;  %v4342_v4 = vld [vmem:[%s7849_s1 + $0xf0] sm:$0xff]  ;;  %v4343_v10 = vld [vmem:[%s7849_s1 + $0xf8] sm:$0xff] }
 0x18a   :  { %v4197_v1 = vpop.eup %4196  ;;  %3792 = vmatmul.msk.f32.gmra.mxu0 %vm137_vm0, %v7972_v43  ;;  %3799 = vmatmul.msk.f32.gmra.mxu1 %vm137_vm0, %v7972_v43  ;;  %v5614_v24 = vadd.f32 %v4195_v5, %v4191_v31  ;;  %v4349_v43 = vld [vmem:[%s7849_s1 + $0x118] sm:$0xff] }
 0x18b   :  { %4202 = vtanh.f32 %v1138_v40  ;;  %3806 = vmatmul.msk.f32.gmra.mxu2 %vm137_vm0, %v7973_v42  ;;  %3813 = vmatmul.msk.f32.gmra.mxu3 %vm137_vm0, %v7973_v42  ;;  %v5620_v47 = vadd.f32 %v4197_v1, %v4193_v7  ;;  %v4199_v37 = vpop.eup %4198  ;;  %v4346_v1 = vld [vmem:[%s7849_s1 + $0xe0] sm:$0xff] }
 0x18c   :  { %4204 = vtanh.f32 %v1139_v13  ;;  %v4201_v34 = vpop.eup %4200 }
 0x18d   :  { %4206 = vtanh.f32 %v687_v25 }
 0x18e   :  { %v1071_v2 = vpop.f32.mrf.mxu2  ;;  %v1109_v3 = vpop.f32.mrf.mxu3  ;;  %4208 = vtanh.f32 %v688_v28 }
 0x18f   :  { %v1126_v36 = vadd.f32 %v1071_v2, %v1033_v0  ;;  %v1127_v26 = vadd.f32 %v1109_v3, %v1034_v12  ;;  %v981_v27 = vpop.f32.mrf.mxu0  ;;  %v1019_v52 = vpop.f32.mrf.mxu1  ;;  %v7978_v0 = vld [vmem:[#allocation5_spill] sm:$0xff]  ;;  %v4350_v3 = vld [vmem:[%s7849_s1 + $0xd0] sm:$0xff] }
 0x190   :  { %v1035_v38 = vadd.f32 %v981_v27, %v5459_v20  ;;  %v1036_v31 = vadd.f32 %v1019_v52, %v5461_v21  ;;  %v4344_v20 = vld [vmem:[%s7849_s1 + $0x120] sm:$0xff]  ;;  %v4345_v21 = vld [vmem:[%s7849_s1 + $0x128] sm:$0xff]  ;;  %v672_v12 = vadd.f32 %v5343_v51, %v7978_v0  ;;  %v7980_v27 = vld [vmem:[#allocation15_spill] sm:$0xff] }
 0x191   :  { %v4203_v35 = vpop.eup %4202  ;;  %v1140_v56 = vadd.f32 %v1126_v36, %v5504_v44  ;;  %v1141_v53 = vadd.f32 %v1127_v26, %v5508_v41  ;;  %v7979_v26 = vld [vmem:[#allocation6_spill] sm:$0xff]  ;;  %v5757_v0 = vld [vmem:[%s7848_s0 + $0xa0] sm:$0xff] }
 0x192   :  { %v4205_v32 = vpop.eup %4204  ;;  %3814 = vmatmul.msk.f32.vlgmr.msrb.gmra.mxu0 %vm137_vm0, %v5635_v59  ;;  %3821 = vmatmul.msk.f32.vlgmr.msrb.gmra.mxu1 %vm137_vm0, %v5635_v59  ;;  %v5641_v33 = vadd.f32 %v4203_v35, %v4199_v37  ;;  %v4351_v37 = vld [vmem:[%s7849_s1 + $0xd8] sm:$0xff]  ;;  %v673_v52 = vadd.f32 %v7980_v27, %v7979_v26  ;;  %v5699_v51 = vld [vmem:[%s7848_s0 + $0x90] sm:$0xff] }
 0x193   :  { %4210 = vtanh.f32 %v1140_v56  ;;  %3828 = vmatmul.msk.f32.vlgmr.msrb.gmra.mxu2 %vm137_vm0, %v4339_v45  ;;  %3835 = vmatmul.msk.f32.vlgmr.msrb.gmra.mxu3 %vm137_vm0, %v4339_v45  ;;  %v5648_v29 = vadd.f32 %v4205_v32, %v4201_v34  ;;  %v4207_v5 = vpop.eup %4206  ;;  %v4353_v35 = vld [vmem:[%s7848_s0 + $0x10] sm:$0xff]  ;;  %v691_v56 = vadd.f32 %v5504_v44, %v672_v12 }
 0x194   :  { %4212 = vtanh.f32 %v1141_v53  ;;  %1960 = vmatpush.msrb.mxu2 %v4340_v48  ;;  %1998 = vmatpush.msrb.mxu3 %v4341_v39  ;;  %v4209_v50 = vpop.eup %4208  ;;  %v692_v8 = vadd.f32 %v5508_v41, %v673_v52 }
 0x195   :  { %1867 = vmatpush.msrb.mxu0 %v4342_v4  ;;  %1905 = vmatpush.msrb.mxu1 %v4343_v10  ;;  %4214 = vtanh.f32 %v689_v60 }
 0x196   :  { %v1074_v11 = vpop.f32.mrf.mxu2  ;;  %v1112_v7 = vpop.f32.mrf.mxu3  ;;  %1961 = vmatpush.msrb.mxu2 %v4344_v20  ;;  %1999 = vmatpush.msrb.mxu3 %v4345_v21  ;;  %4216 = vtanh.f32 %v690_v6  ;;  %v4359_v21 = vld [vmem:[%s7848_s0 + $0x18] sm:$0xff] }
 0x197   :  { %v1128_v19 = vadd.f32 %v1074_v11, %v1035_v38  ;;  %v1129_v30 = vadd.f32 %v1112_v7, %v1036_v31  ;;  %v984_v40 = vpop.f32.mrf.mxu0  ;;  %v1022_v13 = vpop.f32.mrf.mxu1  ;;  %1868 = vmatpush.msrb.mxu0 %v4346_v1  ;;  %1906 = vmatpush.msrb.mxu1 %v4347_v54  ;;  %v5735_v7 = vld [vmem:[%s7848_s0 + $0x98] sm:$0xff] }
 0x198   :  { %1962 = vmatpush.msrb.mxu2 %v4348_v22  ;;  %2000 = vmatpush.msrb.mxu3 %v4349_v43  ;;  %v1037_v53 = vadd.f32 %v984_v40, %v5498_v61  ;;  %v1038_v32 = vadd.f32 %v1022_v13, %v5500_v9 }
 0x199   :  { %v4211_v25 = vpop.eup %4210  ;;  %v1142_v28 = vadd.f32 %v1128_v19, %v5504_v44  ;;  %v1143_v2 = vadd.f32 %v1129_v30, %v5508_v41  ;;  %1869 = vmatpush.msrb.mxu0 %v4350_v3  ;;  %1907 = vmatpush.msrb.mxu1 %v4351_v37 }
 0x19a   :  { %v4213_v36 = vpop.eup %4212  ;;  %3815 = vmatmul.msk.f32.gmra.mxu0 %vm137_vm0, %v5699_v51  ;;  %3822 = vmatmul.msk.f32.gmra.mxu1 %vm137_vm0, %v5699_v51  ;;  %v5705_v34 = vadd.f32 %v4211_v25, %v4207_v5 }
 0x19b   :  { %4218 = vtanh.f32 %v1142_v28  ;;  %3829 = vmatmul.msk.f32.gmra.mxu2 %vm137_vm0, %v4353_v35  ;;  %3836 = vmatmul.msk.f32.gmra.mxu3 %vm137_vm0, %v4353_v35  ;;  %v5712_v18 = vadd.f32 %v4213_v36, %v4209_v50  ;;  %v4215_v39 = vpop.eup %4214  ;;  %v4361_v28 = vld [vmem:[%s7848_s0 + $0x20] sm:$0xff]  ;;  %v5779_v35 = vld [vmem:[%s7848_s0 + $0xa8] sm:$0xff] }
 0x19c   :  { %4220 = vtanh.f32 %v1143_v2  ;;  %1963 = vmatpush.msrb.mxu2 %v4354_v17  ;;  %2001 = vmatpush.msrb.mxu3 %v4355_v49  ;;  %v4217_v9 = vpop.eup %4216 }
 0x19d   :  { %1870 = vmatpush.msrb.mxu0 %v4356_v46  ;;  %1908 = vmatpush.msrb.mxu1 %v4357_v58  ;;  %4222 = vtanh.f32 %v691_v56  ;;  %v5796_v58 = vld [vmem:[%s7848_s0 + $0xb0] sm:$0xff] }
 0x19e   :  { %v1077_v45 = vpop.f32.mrf.mxu2  ;;  %v1115_v48 = vpop.f32.mrf.mxu3  ;;  %4224 = vtanh.f32 %v692_v8 }
 0x19f   :  { %v1130_v60 = vadd.f32 %v1077_v45, %v1037_v53  ;;  %v1131_v38 = vadd.f32 %v1115_v48, %v1038_v32  ;;  %v1177_v61 = vpop.f32.mrf.mxu0  ;;  %v1215_v31 = vpop.f32.mrf.mxu1 }
 0x1a1   :  { %v4219_v4 = vpop.eup %4218  ;;  %v1144_v10 = vadd.f32 %v1130_v60, %v5504_v44  ;;  %v1145_v6 = vadd.f32 %v1131_v38, %v5508_v41  ;;  %v5813_v38 = vld [vmem:[%s7848_s0 + $0xb8] sm:$0xff] }
 0x1a2   :  { %v4221_v11 = vpop.eup %4220  ;;  %3816 = vmatmul.msk.f32.gmra.mxu0 %vm137_vm0, %v5735_v7  ;;  %3823 = vmatmul.msk.f32.gmra.mxu1 %vm137_vm0, %v5735_v7  ;;  %v5741_v20 = vadd.f32 %v4219_v4, %v4215_v39 }
 0x1a3   :  { %4226 = vtanh.f32 %v1144_v10  ;;  %3830 = vmatmul.msk.f32.gmra.mxu2 %vm137_vm0, %v4359_v21  ;;  %3837 = vmatmul.msk.f32.gmra.mxu3 %vm137_vm0, %v4359_v21  ;;  %v5748_v5 = vadd.f32 %v4221_v11, %v4217_v9  ;;  %v4223_v40 = vpop.eup %4222  ;;  %v4365_v11 = vld [vmem:[%s7848_s0 + $0xc0] sm:$0xff]  ;;  %v4366_v21 = vld [vmem:[%s7848_s0 + $0x48] sm:$0xff] }
 0x1a4   :  { %4228 = vtanh.f32 %v1145_v6  ;;  %v4225_v22 = vpop.eup %4224 }
 0x1a6   :  { %v1253_v19 = vpop.f32.mrf.mxu2  ;;  %v1291_v30 = vpop.f32.mrf.mxu3 }
 0x1a7   :  { %v5750_v13 = vadd.f32 %v1253_v19, %v1177_v61  ;;  %v5752_v1 = vadd.f32 %v1291_v30, %v1215_v31  ;;  %v1180_v54 = vpop.f32.mrf.mxu0  ;;  %v1218_v50 = vpop.f32.mrf.mxu1 }
 0x1a9   :  { %v4227_v43 = vpop.eup %4226 }
 0x1aa   :  { %v4229_v25 = vpop.eup %4228  ;;  %3817 = vmatmul.msk.f32.gmra.mxu0 %vm137_vm0, %v5757_v0  ;;  %3824 = vmatmul.msk.f32.gmra.mxu1 %vm137_vm0, %v5757_v0  ;;  %v5763_v12 = vadd.f32 %v4227_v43, %v4223_v40  ;;  %v5845_v43 = vld [vmem:[%s7848_s0 + $0xc8] sm:$0xff] }
 0x1ab   :  { %3831 = vmatmul.msk.f32.gmra.mxu2 %vm137_vm0, %v4361_v28  ;;  %3838 = vmatmul.msk.f32.gmra.mxu3 %vm137_vm0, %v4361_v28  ;;  %v5770_v2 = vadd.f32 %v4229_v25, %v4225_v22  ;;  %v4368_v25 = vld [vmem:[%s7848_s0 + $0x50] sm:$0xff] }
 0x1ae   :  { %v1256_v3 = vpop.f32.mrf.mxu2  ;;  %v1294_v37 = vpop.f32.mrf.mxu3 }
 0x1af   :  { %v5772_v36 = vadd.f32 %v1256_v3, %v1180_v54  ;;  %v5774_v26 = vadd.f32 %v1294_v37, %v1218_v50  ;;  %v1183_v27 = vpop.f32.mrf.mxu0  ;;  %v1221_v52 = vpop.f32.mrf.mxu1 }
 0x1b2   :  { %3818 = vmatmul.msk.f32.gmra.mxu0 %vm137_vm0, %v5779_v35  ;;  %3825 = vmatmul.msk.f32.gmra.mxu1 %vm137_vm0, %v5779_v35 }
 0x1b3   :  { %3832 = vmatmul.msk.f32.gmra.mxu2 %vm137_vm0, %v5551_v55  ;;  %3839 = vmatmul.msk.f32.gmra.mxu3 %vm137_vm0, %v5551_v55 }
 0x1b6   :  { %v1259_v17 = vpop.f32.mrf.mxu2  ;;  %v1297_v49 = vpop.f32.mrf.mxu3 }
 0x1b7   :  { %v5789_v56 = vadd.f32 %v1259_v17, %v1183_v27  ;;  %v5791_v53 = vadd.f32 %v1297_v49, %v1221_v52  ;;  %v1186_v32 = vpop.f32.mrf.mxu0  ;;  %v1224_v46 = vpop.f32.mrf.mxu1  ;;  %v5863_v49 = vld [vmem:[%s7848_s0 + $0xd0] sm:$0xff] }
 0x1ba   :  { %3819 = vmatmul.msk.f32.gmra.mxu0 %vm137_vm0, %v5796_v58  ;;  %3826 = vmatmul.msk.f32.gmra.mxu1 %vm137_vm0, %v5796_v58 }
 0x1bb   :  { %3833 = vmatmul.msk.f32.gmra.mxu2 %vm137_vm0, %v5581_v63  ;;  %3840 = vmatmul.msk.f32.gmra.mxu3 %vm137_vm0, %v5581_v63  ;;  %v4364_v63 = vld [vmem:[%s7848_s0 + $0x38] sm:$0xff] }
 0x1be   :  { %v1262_v55 = vpop.f32.mrf.mxu2  ;;  %v1300_v8 = vpop.f32.mrf.mxu3 }
 0x1bf   :  { %v5806_v45 = vadd.f32 %v1262_v55, %v1186_v32  ;;  %v5808_v48 = vadd.f32 %v1300_v8, %v1224_v46  ;;  %v1189_v39 = vpop.f32.mrf.mxu0  ;;  %v1227_v60 = vpop.f32.mrf.mxu1  ;;  %v4370_v32 = vld [vmem:[%s7848_s0 + $0x58] sm:$0xff] }
 0x1c2   :  { %3820 = vmatmul.msk.f32.gmra.mxu0 %vm137_vm0, %v5813_v38  ;;  %3827 = vmatmul.msk.f32.gmra.mxu1 %vm137_vm0, %v5813_v38 }
 0x1c3   :  { %3834 = vmatmul.msk.f32.gmra.mxu2 %vm137_vm0, %v4364_v63  ;;  %3841 = vmatmul.msk.f32.gmra.mxu3 %vm137_vm0, %v4364_v63 }
 0x1c6   :  { %v1265_v61 = vpop.f32.mrf.mxu2  ;;  %v1303_v31 = vpop.f32.mrf.mxu3 }
 0x1c7   :  { %v5824_v9 = vadd.f32 %v1265_v61, %v1189_v39  ;;  %v5826_v4 = vadd.f32 %v1303_v31, %v1227_v60  ;;  %v1192_v10 = vpop.f32.mrf.mxu0  ;;  %v1230_v6 = vpop.f32.mrf.mxu1 }
 0x1ca   :  { %3842 = vmatmul.msk.f32.vlgmr.msra.gmra.mxu0 %vm137_vm0, %v4365_v11  ;;  %3849 = vmatmul.msk.f32.vlgmr.msra.gmra.mxu1 %vm137_vm0, %v4365_v11 }
 0x1cb   :  { %3856 = vmatmul.msk.f32.vlgmr.msra.gmra.mxu2 %vm137_vm0, %v4366_v21  ;;  %3863 = vmatmul.msk.f32.vlgmr.msra.gmra.mxu3 %vm137_vm0, %v4366_v21 }
 0x1ce   :  { %v1268_v19 = vpop.f32.mrf.mxu2  ;;  %v1306_v30 = vpop.f32.mrf.mxu3 }
 0x1cf   :  { %v5838_v40 = vadd.f32 %v1268_v19, %v1192_v10  ;;  %v5840_v54 = vadd.f32 %v1306_v30, %v1230_v6  ;;  %v1195_v50 = vpop.f32.mrf.mxu0  ;;  %v1233_v22 = vpop.f32.mrf.mxu1  ;;  %v5883_v10 = vld [vmem:[%s7848_s0 + $0xd8] sm:$0xff] }
 0x1d1   :  { %7981 = vst [vmem:[#allocation8_spill] sm:$0xff] %v5838_v40 }
 0x1d2   :  { %7982 = vst [vmem:[#allocation9_spill] sm:$0xff] %v5840_v54  ;;  %3843 = vmatmul.msk.f32.gmra.mxu0 %vm137_vm0, %v5845_v43  ;;  %3850 = vmatmul.msk.f32.gmra.mxu1 %vm137_vm0, %v5845_v43 }
 0x1d3   :  { %3857 = vmatmul.msk.f32.gmra.mxu2 %vm137_vm0, %v4368_v25  ;;  %3864 = vmatmul.msk.f32.gmra.mxu3 %vm137_vm0, %v4368_v25  ;;  %v5903_v25 = vld [vmem:[%s7848_s0 + $0xe0] sm:$0xff] }
 0x1d6   :  { %v1271_v28 = vpop.f32.mrf.mxu2  ;;  %v1309_v3 = vpop.f32.mrf.mxu3 }
 0x1d7   :  { %v5856_v37 = vadd.f32 %v1271_v28, %v1195_v50  ;;  %v5858_v27 = vadd.f32 %v1309_v3, %v1233_v22  ;;  %v1329_v52 = vpop.f32.mrf.mxu0  ;;  %v1367_v17 = vpop.f32.mrf.mxu1 }
 0x1d8   :  { %v1388_v46 = vadd.f32 %v1329_v52, %v5750_v13  ;;  %v1389_v55 = vadd.f32 %v1367_v17, %v5752_v1  ;;  %v4372_v13 = vld [vmem:[%s7848_s0 + $0x60] sm:$0xff] }
 0x1d9   :  { %7983 = vst [vmem:[#allocation12_spill] sm:$0xff] %v5856_v37 }
 0x1da   :  { %7984 = vst [vmem:[#allocation13_spill] sm:$0xff] %v5858_v27  ;;  %3844 = vmatmul.msk.f32.gmra.mxu0 %vm137_vm0, %v5863_v49  ;;  %3851 = vmatmul.msk.f32.gmra.mxu1 %vm137_vm0, %v5863_v49 }
 0x1db   :  { %3858 = vmatmul.msk.f32.gmra.mxu2 %vm137_vm0, %v4370_v32  ;;  %3865 = vmatmul.msk.f32.gmra.mxu3 %vm137_vm0, %v4370_v32 }
 0x1de   :  { %v1419_v8 = vpop.f32.mrf.mxu2  ;;  %v1457_v39 = vpop.f32.mrf.mxu3 }
 0x1df   :  { %v5876_v60 = vadd.f32 %v1419_v8, %v1388_v46  ;;  %v5878_v63 = vadd.f32 %v1457_v39, %v1389_v55  ;;  %v1332_v61 = vpop.f32.mrf.mxu0  ;;  %v1370_v31 = vpop.f32.mrf.mxu1  ;;  %v5922_v55 = vld [vmem:[%s7848_s0 + $0xe8] sm:$0xff] }
 0x1e0   :  { %v1390_v1 = vadd.f32 %v1332_v61, %v5772_v36  ;;  %v1391_v6 = vadd.f32 %v1370_v31, %v5774_v26 }
 0x1e2   :  { %3845 = vmatmul.msk.f32.gmra.mxu0 %vm137_vm0, %v5883_v10  ;;  %3852 = vmatmul.msk.f32.gmra.mxu1 %vm137_vm0, %v5883_v10 }
 0x1e3   :  { %3859 = vmatmul.msk.f32.gmra.mxu2 %vm137_vm0, %v4372_v13  ;;  %3866 = vmatmul.msk.f32.gmra.mxu3 %vm137_vm0, %v4372_v13 }
 0x1e6   :  { %v1422_v11 = vpop.f32.mrf.mxu2  ;;  %v1460_v21 = vpop.f32.mrf.mxu3 }
 0x1e7   :  { %v5896_v19 = vadd.f32 %v1422_v11, %v1390_v1  ;;  %v5898_v30 = vadd.f32 %v1460_v21, %v1391_v6  ;;  %v1335_v50 = vpop.f32.mrf.mxu0  ;;  %v1373_v22 = vpop.f32.mrf.mxu1  ;;  %v5945_v1 = vld [vmem:[%s7848_s0 + $0xf0] sm:$0xff] }
 0x1e8   :  { %v1392_v36 = vadd.f32 %v1335_v50, %v5789_v56  ;;  %v1393_v26 = vadd.f32 %v1373_v22, %v5791_v53  ;;  %v93_v6 = vld [vmem:[%s7853_s5 + $0x70] sm:$0xff]  ;;  %v91_v50 = vld [vmem:[%s7853_s5 + $0x60] sm:$0xff]  ;;  %v90_v22 = vld [vmem:[%s7853_s5 + $0x58] sm:$0xff] }
 0x1ea   :  { %3846 = vmatmul.msk.f32.gmra.mxu0 %vm137_vm0, %v5903_v25  ;;  %3853 = vmatmul.msk.f32.gmra.mxu1 %vm137_vm0, %v5903_v25 }
 0x1eb   :  { %3860 = vmatmul.msk.f32.gmra.mxu2 %vm137_vm0, %v5562_v62  ;;  %3867 = vmatmul.msk.f32.gmra.mxu3 %vm137_vm0, %v5562_v62 }
 0x1ee   :  { %v1425_v28 = vpop.f32.mrf.mxu2  ;;  %v1463_v3 = vpop.f32.mrf.mxu3 }
 0x1ef   :  { %v5915_v52 = vadd.f32 %v1425_v28, %v1392_v36  ;;  %v5917_v17 = vadd.f32 %v1463_v3, %v1393_v26  ;;  %v1338_v32 = vpop.f32.mrf.mxu0  ;;  %v1376_v46 = vpop.f32.mrf.mxu1 }
 0x1f0   :  { %v1394_v62 = vadd.f32 %v1338_v32, %v5806_v45  ;;  %v1395_v56 = vadd.f32 %v1376_v46, %v5808_v48  ;;  %v87_v32 = vld [vmem:[%s7853_s5 + $0x40] sm:$0xff]  ;;  %v86_v46 = vld [vmem:[%s7853_s5 + $0x38] sm:$0xff] }
 0x1f2   :  { %3847 = vmatmul.msk.f32.gmra.mxu0 %vm137_vm0, %v5922_v55  ;;  %3854 = vmatmul.msk.f32.gmra.mxu1 %vm137_vm0, %v5922_v55 }
 0x1f3   :  { %3861 = vmatmul.msk.f32.gmra.mxu2 %vm137_vm0, %v5592_v23  ;;  %3868 = vmatmul.msk.f32.gmra.mxu3 %vm137_vm0, %v5592_v23  ;;  %v94_v23 = vld [vmem:[%s7853_s5 + $0x78] sm:$0xff] }
 0x1f4   :  { %2102 = vmatpush.msra.mxu0 %v94_v23  ;;  %2213 = vmatpush.msra.mxu2 %v94_v23  ;;  %v84_v23 = vld [vmem:[%s7853_s5 + $0x28] sm:$0xff] }
 0x1f6   :  { %v1428_v53 = vpop.f32.mrf.mxu2  ;;  %v1466_v8 = vpop.f32.mrf.mxu3  ;;  %2103 = vmatpush.msra.mxu0 %v93_v6  ;;  %2214 = vmatpush.msra.mxu2 %v93_v6  ;;  %v83_v6 = vld [vmem:[%s7853_s5 + $0x20] sm:$0xff] }
 0x1f7   :  { %v5934_v39 = vadd.f32 %v1428_v53, %v1394_v62  ;;  %v5936_v61 = vadd.f32 %v1466_v8, %v1395_v56  ;;  %v5938_v31 = vpop.f32.mrf.mxu0  ;;  %v5940_v13 = vpop.f32.mrf.mxu1  ;;  %v99_v8 = vld [vmem:[%s7853_s5 + $0xa0] sm:$0xff] }
 0x1f8   :  { %2151 = vmatpush.msra.mxu1 %v99_v8  ;;  %2262 = vmatpush.msra.mxu3 %v99_v8 }
 0x1fa   :  { %3848 = vmatmul.msk.f32.gmra.mxu0 %vm137_vm0, %v5945_v1  ;;  %3855 = vmatmul.msk.f32.gmra.mxu1 %vm137_vm0, %v5945_v1 }
 0x1fb   :  { %3862 = vmatmul.msk.f32.gmra.mxu2 %vm137_vm0, %v7973_v42  ;;  %3869 = vmatmul.msk.f32.gmra.mxu3 %vm137_vm0, %v7973_v42  ;;  %v92_v42 = vld [vmem:[%s7853_s5 + $0x68] sm:$0xff] }
 0x1fc   :  { %2104 = vmatpush.msra.mxu0 %v92_v42  ;;  %2215 = vmatpush.msra.mxu2 %v92_v42 }
 0x1fe   :  { %v5958_v45 = vpop.f32.mrf.mxu2  ;;  %v5960_v48 = vpop.f32.mrf.mxu3  ;;  %2105 = vmatpush.msra.mxu0 %v91_v50  ;;  %2216 = vmatpush.msra.mxu2 %v91_v50 }
 0x1ff   :  { %v5965_v11 = vpop.f32.mrf.mxu0  ;;  %v5967_v21 = vpop.f32.mrf.mxu1 }
 0x200   :  { %7985 = vst [vmem:[#allocation16_spill] sm:$0xff] %v5965_v11  ;;  %2106 = vmatpush.msra.mxu0 %v90_v22  ;;  %2217 = vmatpush.msra.mxu2 %v90_v22 }
 0x201   :  { %7986 = vst [vmem:[#allocation17_spill] sm:$0xff] %v5967_v21 }
 0x202   :  { %3870 = vmatmul.msk.f32.vlgmr.msrb.gmra.mxu0 %vm137_vm0, %v5635_v59  ;;  %3877 = vmatmul.msk.f32.vlgmr.msrb.gmra.mxu1 %vm137_vm0, %v5635_v59  ;;  %v89_v59 = vld [vmem:[%s7853_s5 + $0x50] sm:$0xff] }
 0x203   :  { %3884 = vmatmul.msk.f32.vlgmr.msrb.gmra.mxu2 %vm137_vm0, %v5845_v43  ;;  %3891 = vmatmul.msk.f32.vlgmr.msrb.gmra.mxu3 %vm137_vm0, %v5845_v43  ;;  %v88_v43 = vld [vmem:[%s7853_s5 + $0x48] sm:$0xff] }
 0x204   :  { %2107 = vmatpush.msra.mxu0 %v89_v59  ;;  %2218 = vmatpush.msra.mxu2 %v89_v59 }
 0x206   :  { %v5986_v36 = vpop.f32.mrf.mxu2  ;;  %v5988_v26 = vpop.f32.mrf.mxu3  ;;  %2108 = vmatpush.msra.mxu0 %v88_v43  ;;  %2219 = vmatpush.msra.mxu2 %v88_v43  ;;  %v82_v43 = vld [vmem:[%s7853_s5 + $0x18] sm:$0xff] }
 0x207   :  { %7987 = vst [vmem:[#allocation18_spill] sm:$0xff] %v5986_v36  ;;  %v5993_v28 = vpop.f32.mrf.mxu0  ;;  %v5995_v3 = vpop.f32.mrf.mxu1 }
 0x208   :  { %7988 = vst [vmem:[#allocation19_spill] sm:$0xff] %v5988_v26  ;;  %2109 = vmatpush.msra.mxu0 %v87_v32  ;;  %2220 = vmatpush.msra.mxu2 %v87_v32  ;;  %v96_v32 = vld [vmem:[%s7853_s5 + $0x88] sm:$0xff] }
 0x209   :  { %7989 = vst [vmem:[#allocation20_spill] sm:$0xff] %v5993_v28 }
 0x20a   :  { %7990 = vst [vmem:[#allocation21_spill] sm:$0xff] %v5995_v3  ;;  %3871 = vmatmul.msk.f32.gmra.mxu0 %vm137_vm0, %v5699_v51  ;;  %3878 = vmatmul.msk.f32.gmra.mxu1 %vm137_vm0, %v5699_v51 }
 0x20b   :  { %3885 = vmatmul.msk.f32.gmra.mxu2 %vm137_vm0, %v5863_v49  ;;  %3892 = vmatmul.msk.f32.gmra.mxu3 %vm137_vm0, %v5863_v49  ;;  %v85_v49 = vld [vmem:[%s7853_s5 + $0x30] sm:$0xff] }
 0x20c   :  { %2110 = vmatpush.msra.mxu0 %v86_v46  ;;  %2221 = vmatpush.msra.mxu2 %v86_v46  ;;  %v81_v46 = vld [vmem:[%s7853_s5 + $0x10] sm:$0xff] }
 0x20e   :  { %v6014_v62 = vpop.f32.mrf.mxu2  ;;  %v6016_v56 = vpop.f32.mrf.mxu3  ;;  %2111 = vmatpush.msra.mxu0 %v85_v49  ;;  %2222 = vmatpush.msra.mxu2 %v85_v49  ;;  %v95_v49 = vld [vmem:[%s7853_s5 + $0x80] sm:$0xff] }
 0x20f   :  { %7991 = vst [vmem:[#allocation22_spill] sm:$0xff] %v6014_v62  ;;  %v6018_v51 = vpop.f32.mrf.mxu0  ;;  %v6020_v53 = vpop.f32.mrf.mxu1 }
 0x210   :  { %7992 = vst [vmem:[#allocation23_spill] sm:$0xff] %v6016_v56  ;;  %2112 = vmatpush.msra.mxu0 %v84_v23  ;;  %2223 = vmatpush.msra.mxu2 %v84_v23 }
 0x212   :  { %3872 = vmatmul.msk.f32.gmra.mxu0 %vm137_vm0, %v5735_v7  ;;  %3879 = vmatmul.msk.f32.gmra.mxu1 %vm137_vm0, %v5735_v7  ;;  %v98_v7 = vld [vmem:[%s7853_s5 + $0x98] sm:$0xff] }
 0x213   :  { %3886 = vmatmul.msk.f32.gmra.mxu2 %vm137_vm0, %v5883_v10  ;;  %3893 = vmatmul.msk.f32.gmra.mxu3 %vm137_vm0, %v5883_v10  ;;  %v97_v10 = vld [vmem:[%s7853_s5 + $0x90] sm:$0xff] }
 0x214   :  { %2152 = vmatpush.msra.mxu1 %v98_v7  ;;  %2263 = vmatpush.msra.mxu3 %v98_v7 }
 0x215   :  { %2113 = vmatpush.msra.mxu0 %v83_v6  ;;  %2224 = vmatpush.msra.mxu2 %v83_v6  ;;  %v79_v6 = vld [vmem:[%s7853_s5] sm:$0xff] }
 0x216   :  { %v6045_v42 = vpop.f32.mrf.mxu2  ;;  %v6047_v50 = vpop.f32.mrf.mxu3  ;;  %2153 = vmatpush.msra.mxu1 %v97_v10  ;;  %2264 = vmatpush.msra.mxu3 %v97_v10 }
 0x217   :  { %v6052_v22 = vpop.f32.mrf.mxu0  ;;  %v6054_v59 = vpop.f32.mrf.mxu1  ;;  %2114 = vmatpush.msra.mxu0 %v82_v43  ;;  %2225 = vmatpush.msra.mxu2 %v82_v43 }
 0x218   :  { %2154 = vmatpush.msra.mxu1 %v96_v32  ;;  %2265 = vmatpush.msra.mxu3 %v96_v32 }
 0x219   :  { %2115 = vmatpush.msra.mxu0 %v81_v46  ;;  %2226 = vmatpush.msra.mxu2 %v81_v46 }
 0x21a   :  { %3873 = vmatmul.msk.f32.gmra.mxu0 %vm137_vm0, %v5757_v0  ;;  %3880 = vmatmul.msk.f32.gmra.mxu1 %vm137_vm0, %v5757_v0  ;;  %v80_v0 = vld [vmem:[%s7853_s5 + $0x8] sm:$0xff] }
 0x21b   :  { %3887 = vmatmul.msk.f32.gmra.mxu2 %vm137_vm0, %v5903_v25  ;;  %3894 = vmatmul.msk.f32.gmra.mxu3 %vm137_vm0, %v5903_v25 }
 0x21c   :  { %2155 = vmatpush.msra.mxu1 %v95_v49  ;;  %2266 = vmatpush.msra.mxu3 %v95_v49 }
 0x21d   :  { %2116 = vmatpush.msra.mxu0 %v80_v0  ;;  %2227 = vmatpush.msra.mxu2 %v80_v0 }
 0x21e   :  { %v6079_v8 = vpop.f32.mrf.mxu2  ;;  %v6081_v23 = vpop.f32.mrf.mxu3 }
 0x21f   :  { %v6083_v25 = vpop.f32.mrf.mxu0  ;;  %v6085_v7 = vpop.f32.mrf.mxu1  ;;  %2117 = vmatpush.msra.mxu0 %v79_v6  ;;  %2228 = vmatpush.msra.mxu2 %v79_v6  ;;  %v76_v6 = vld [vmem:[%s7848_s0 + $0xf8] sm:$0xff] }
 0x222   :  { %3874 = vmatmul.msk.f32.gmra.mxu0 %vm137_vm0, %v5779_v35  ;;  %3881 = vmatmul.msk.f32.gmra.mxu1 %vm137_vm0, %v5779_v35 }
 0x223   :  { %3888 = vmatmul.msk.f32.gmra.mxu2 %vm137_vm0, %v5922_v55  ;;  %3895 = vmatmul.msk.f32.gmra.mxu3 %vm137_vm0, %v5922_v55 }
 0x226   :  { %v6098_v10 = vpop.f32.mrf.mxu2  ;;  %v6100_v43 = vpop.f32.mrf.mxu3 }
 0x227   :  { %v6102_v32 = vpop.f32.mrf.mxu0  ;;  %v6104_v46 = vpop.f32.mrf.mxu1 }
 0x22a   :  { %3875 = vmatmul.msk.f32.gmra.mxu0 %vm137_vm0, %v5796_v58  ;;  %3882 = vmatmul.msk.f32.gmra.mxu1 %vm137_vm0, %v5796_v58 }
 0x22b   :  { %3889 = vmatmul.msk.f32.gmra.mxu2 %vm137_vm0, %v5945_v1  ;;  %3896 = vmatmul.msk.f32.gmra.mxu3 %vm137_vm0, %v5945_v1 }
 0x22e   :  { %v6114_v35 = vpop.f32.mrf.mxu2  ;;  %v6116_v55 = vpop.f32.mrf.mxu3 }
 0x22f   :  { %v6118_v49 = vpop.f32.mrf.mxu0  ;;  %v6120_v0 = vpop.f32.mrf.mxu1 }
 0x230   :  { %7993 = vst [vmem:[#allocation24_spill] sm:$0xff] %v6118_v49 }
 0x231   :  { %7994 = vst [vmem:[#allocation25_spill] sm:$0xff] %v6120_v0 }
 0x232   :  { %3876 = vmatmul.msk.f32.gmra.mxu0 %vm137_vm0, %v5813_v38  ;;  %3883 = vmatmul.msk.f32.gmra.mxu1 %vm137_vm0, %v5813_v38 }
 0x233   :  { %3890 = vmatmul.msk.f32.gmra.mxu2 %vm137_vm0, %v76_v6  ;;  %3897 = vmatmul.msk.f32.gmra.mxu3 %vm137_vm0, %v76_v6 }
 0x236   :  { %v6131_v58 = vpop.f32.mrf.mxu2  ;;  %v6133_v1 = vpop.f32.mrf.mxu3 }
 0x237   :  { %7995 = vst [vmem:[#allocation7_spill] sm:$0xff] %v6131_v58  ;;  %v6135_v56 = vpop.f32.mrf.mxu0  ;;  %v6137_v62 = vpop.f32.mrf.mxu1 }
 0x238   :  { %7996 = vst [vmem:[#allocation27_spill] sm:$0xff] %v6133_v1 }
 0x239   :  { %7997 = vst [vmem:[#allocation10_spill] sm:$0xff] %v6135_v56 }
 0x23a   :  { %7998 = vst [vmem:[#allocation26_spill] sm:$0xff] %v6137_v62  ;;  %2118 = vmatmul.f32.vlgmr.msra.gmra.mxu0 %v5546_v16  ;;  %3898 = vmatmul.msk.f32.vlgmr.msra.gmra.mxu1 %vm2080_vm1, %v5557_v57 }
 0x23e   :  { %v6142_v3 = vpop.f32.mrf.mxu2  ;;  %v6144_v38 = vpop.f32.mrf.mxu3 }
 0x23f   :  { %7999 = vst [vmem:[#allocation11_spill] sm:$0xff] %v6142_v3  ;;  %v6146_v27 = vpop.f32.mrf.mxu0  ;;  %v6148_v6 = vpop.f32.mrf.mxu1 }
 0x240   :  { %8000 = vst [vmem:[#allocation28_spill] sm:$0xff] %v6144_v38 }
 0x241   :  { %8001 = vst [vmem:[#allocation14_spill] sm:$0xff] %v6146_v27 }
 0x242   :  { %8002 = vst [vmem:[#allocation29_spill] sm:$0xff] %v6148_v6  ;;  %2121 = vmatmul.f32.gmra.mxu0 %v5587_v14  ;;  %3899 = vmatmul.msk.f32.gmra.mxu1 %vm2080_vm1, %v5598_v15 }
 0x246   :  { %v6153_v28 = vpop.f32.mrf.mxu2  ;;  %v6155_v37 = vpop.f32.mrf.mxu3 }
 0x247   :  { %8003 = vst [vmem:[#allocation30_spill] sm:$0xff] %v6153_v28  ;;  %v1706_v16 = vpop.f32.mrf.mxu0  ;;  %v1744_v62 = vpop.f32.mrf.mxu1 }
 0x248   :  { %8004 = vst [vmem:[#allocation5_spill] sm:$0xff] %v6155_v37 }
 0x24a   :  { %2124 = vmatmul.f32.gmra.mxu0 %v5614_v24  ;;  %3900 = vmatmul.msk.f32.gmra.mxu1 %vm2080_vm1, %v5620_v47 }
 0x24e   :  { %v1782_v57 = vpop.f32.mrf.mxu2  ;;  %v1820_v27 = vpop.f32.mrf.mxu3 }
 0x24f   :  { %v1709_v38 = vpop.f32.mrf.mxu0  ;;  %v1747_v6 = vpop.f32.mrf.mxu1 }
 0x252   :  { %2127 = vmatmul.f32.gmra.mxu0 %v5641_v33  ;;  %3901 = vmatmul.msk.f32.gmra.mxu1 %vm2080_vm1, %v5648_v29 }
 0x256   :  { %v1785_v14 = vpop.f32.mrf.mxu2  ;;  %v1823_v15 = vpop.f32.mrf.mxu3 }
 0x257   :  { %v6163_v28 = vpop.f32.mrf.mxu0  ;;  %v6165_v37 = vpop.f32.mrf.mxu1 }
 0x25a   :  { %2130 = vmatmul.f32.gmra.mxu0 %v5705_v34  ;;  %3902 = vmatmul.msk.f32.gmra.mxu1 %vm2080_vm1, %v5712_v18 }
 0x25e   :  { %v6170_v24 = vpop.f32.mrf.mxu2  ;;  %v6172_v47 = vpop.f32.mrf.mxu3 }
 0x25f   :  { %v6174_v3 = vpop.f32.mrf.mxu0  ;;  %v6176_v33 = vpop.f32.mrf.mxu1 }
 0x262   :  { %2133 = vmatmul.f32.gmra.mxu0 %v5741_v20  ;;  %3903 = vmatmul.msk.f32.gmra.mxu1 %vm2080_vm1, %v5748_v5 }
 0x266   :  { %v6181_v29 = vpop.f32.mrf.mxu2  ;;  %v6183_v56 = vpop.f32.mrf.mxu3 }
 0x267   :  { %v6185_v34 = vpop.f32.mrf.mxu0  ;;  %v6187_v18 = vpop.f32.mrf.mxu1 }
 0x268   :  { %8005 = vst [vmem:[#allocation6_spill] sm:$0xff] %v6185_v34 }
 0x269   :  { %8006 = vst [vmem:[#allocation15_spill] sm:$0xff] %v6187_v18 }
 0x26a   :  { %2136 = vmatmul.f32.gmra.mxu0 %v5763_v12  ;;  %3904 = vmatmul.msk.f32.gmra.mxu1 %vm2080_vm1, %v5770_v2 }
 0x26e   :  { %v6192_v26 = vpop.f32.mrf.mxu2  ;;  %v6194_v36 = vpop.f32.mrf.mxu3 }
 0x26f   :  { %8007 = vst [vmem:[#allocation31_spill] sm:$0xff] %v6192_v26  ;;  %v6196_v20 = vpop.f32.mrf.mxu0  ;;  %v6198_v5 = vpop.f32.mrf.mxu1 }
 0x270   :  { %8008 = vst [vmem:[#allocation32_spill] sm:$0xff] %v6194_v36  ;;  %v1571_v36 = vadd.f32 %v6018_v51, %v5876_v60 }
 0x271   :  { %8009 = vst [vmem:[#allocation33_spill] sm:$0xff] %v6196_v20  ;;  %v1707_v20 = vadd.f32 %v1706_v16, %v6045_v42 }
 0x272   :  { %8010 = vst [vmem:[#allocation34_spill] sm:$0xff] %v6198_v5  ;;  %v1745_v5 = vadd.f32 %v1744_v62, %v6047_v50  ;;  %v1573_v62 = vadd.f32 %v6052_v22, %v5896_v19 }
 0x276   :  { %v6200_v21 = vpop.f32.mrf.mxu2  ;;  %v6202_v54 = vpop.f32.mrf.mxu3 }
 0x277   :  { %8011 = vst [vmem:[#allocation35_spill] sm:$0xff] %v6200_v21  ;;  %v6204_v11 = vpop.f32.mrf.mxu0  ;;  %v6206_v40 = vpop.f32.mrf.mxu1  ;;  %v1841_v21 = vadd.f32 %v1782_v57, %v1707_v20 }
 0x278   :  { %8012 = vst [vmem:[#allocation36_spill] sm:$0xff] %v6202_v54  ;;  %v1572_v54 = vadd.f32 %v6020_v53, %v5878_v63  ;;  %v1710_v63 = vadd.f32 %v1709_v38, %v6079_v8  ;;  %v1713_v38 = vadd.f32 %v6163_v28, %v6098_v10 }
 0x279   :  { %8013 = vst [vmem:[#allocation37_spill] sm:$0xff] %v6204_v11  ;;  %v1842_v11 = vadd.f32 %v1820_v27, %v1745_v5  ;;  %v1748_v27 = vadd.f32 %v1747_v6, %v6081_v23  ;;  %v1751_v6 = vadd.f32 %v6165_v37, %v6100_v43 }
 0x27a   :  { %8014 = vst [vmem:[#allocation38_spill] sm:$0xff] %v6206_v40  ;;  %v1585_v40 = vadd.f32 %v1571_v36, %v5504_v44 }
 0x27c   :  { %4230 = vtanh.f32 %v1585_v40  ;;  %v1587_v40 = vadd.f32 %v1573_v62, %v5504_v44  ;;  %v1577_v62 = vadd.f32 %v6102_v32, %v5934_v39  ;;  %v6270_v39 = vld [vmem:[%s7851_s3 + $0x90] sm:$0xff]  ;;  %v6275_v32 = vld [vmem:[%s7851_s3 + $0x98] sm:$0xff] }
 0x27e   :  { %v6208_v12 = vpop.f32.mrf.mxu2  ;;  %v6210_v0 = vpop.f32.mrf.mxu3 }
 0x27f   :  { %8015 = vst [vmem:[#allocation39_spill] sm:$0xff] %v6208_v12  ;;  %v1872_v2 = vpop.f32.mrf.mxu0  ;;  %v1910_v26 = vpop.f32.mrf.mxu1 }
 0x280   :  { %8016 = vst [vmem:[#allocation40_spill] sm:$0xff] %v6210_v0  ;;  %v1931_v18 = vadd.f32 %v1872_v2, %v1841_v21  ;;  %v1932_v12 = vadd.f32 %v1910_v26, %v1842_v11  ;;  %v1586_v0 = vadd.f32 %v1572_v54, %v5508_v41  ;;  %v1574_v54 = vadd.f32 %v6054_v59, %v5898_v30 }
 0x281   :  { %v1843_v21 = vadd.f32 %v1785_v14, %v1710_v63  ;;  %v1844_v26 = vadd.f32 %v1823_v15, %v1748_v27  ;;  %v1575_v30 = vadd.f32 %v6083_v25, %v5915_v52  ;;  %v1576_v15 = vadd.f32 %v6085_v7, %v5917_v17 }
 0x282   :  { %4232 = vtanh.f32 %v1586_v0  ;;  %v4231_v42 = vpop.eup %4230  ;;  %v1588_v50 = vadd.f32 %v1574_v54, %v5508_v41  ;;  %v1846_v52 = vadd.f32 %v6172_v47, %v1751_v6  ;;  %v6248_v47 = vld [vmem:[%s7851_s3 + $0xa0] sm:$0xf]  ;;  %v1716_v27 = vadd.f32 %v6174_v3, %v6114_v35  ;;  %v6331_v6 = vld [vmem:[%s7851_s3 + $0x50] sm:$0xff] }
 0x283   :  { %v1589_v28 = vadd.f32 %v1575_v30, %v5504_v44  ;;  %v1590_v20 = vadd.f32 %v1576_v15, %v5508_v41  ;;  %3946 = vmatpush.msk.msrb.mxu2 %vm2350_vm2, %v6248_v47  ;;  %v1578_v3 = vadd.f32 %v6104_v46, %v5936_v61  ;;  %v6291_v61 = vld [vmem:[%s7851_s3 + $0x88] sm:$0xff]  ;;  %v1396_v46 = vadd.f32 %v5938_v31, %v5824_v9  ;;  %v6307_v9 = vld [vmem:[%s7851_s3 + $0x78] sm:$0xff]  ;;  %v8019_v15 = vld [vmem:[#allocation6_spill] sm:$0xff] }
 0x285   :  { %2448 = vmatpush.msrb.mxu2 %v6270_v39 }
 0x286   :  { %v1965_v1 = vpop.f32.mrf.mxu2  ;;  %v2003_v34 = vpop.f32.mrf.mxu3 }
 0x287   :  { %v2024_v58 = vadd.f32 %v1965_v1, %v1931_v18  ;;  %v2025_v49 = vadd.f32 %v2003_v34, %v1932_v12  ;;  %v1875_v60 = vpop.f32.mrf.mxu0  ;;  %v1913_v51 = vpop.f32.mrf.mxu1  ;;  %v1845_v18 = vadd.f32 %v6170_v24, %v1713_v38 }
 0x288   :  { %v1933_v53 = vadd.f32 %v1875_v60, %v1843_v21  ;;  %v1934_v19 = vadd.f32 %v1913_v51, %v1844_v26  ;;  %v4233_v1 = vpop.eup %4232  ;;  %v6253_v60 = vld [vmem:[%s7851_s3 + $0xa8] sm:$0xf] }
 0x289   :  { %v2038_v36 = vadd.f32 %v2024_v58, %v5504_v44  ;;  %v2039_v11 = vadd.f32 %v2025_v49, %v5508_v41  ;;  %3952 = vmatpush.msk.msrb.mxu3 %vm2350_vm2, %v6253_v60 }
 0x28b   :  { %4234 = vtanh.f32 %v2038_v36  ;;  %v1754_v36 = vadd.f32 %v6176_v33, %v6116_v55  ;;  %2480 = vmatpush.msrb.mxu3 %v6275_v32  ;;  %v1847_v55 = vadd.f32 %v6181_v29, %v1716_v27 }
 0x28c   :  { %4236 = vtanh.f32 %v2039_v11 }
 0x28d   :  { %4238 = vtanh.f32 %v1587_v40  ;;  %v1848_v33 = vadd.f32 %v6183_v56, %v1754_v36  ;;  %v6286_v40 = vld [vmem:[%s7851_s3 + $0x80] sm:$0xff]  ;;  %2481 = vmatpush.msrb.mxu3 %v6291_v61 }
 0x28e   :  { %v1968_v22 = vpop.f32.mrf.mxu2  ;;  %v2006_v8 = vpop.f32.mrf.mxu3  ;;  %4240 = vtanh.f32 %v1588_v50  ;;  %2449 = vmatpush.msrb.mxu2 %v6286_v40  ;;  %v1486_v50 = vadd.f32 %v5958_v45, %v1396_v46  ;;  %v8029_v46 = vld [vmem:[#allocation18_spill] sm:$0xff] }
 0x28f   :  { %v2026_v23 = vadd.f32 %v1968_v22, %v1933_v53  ;;  %v2027_v58 = vadd.f32 %v2006_v8, %v1934_v19  ;;  %v1878_v49 = vpop.f32.mrf.mxu0  ;;  %v1916_v0 = vpop.f32.mrf.mxu1  ;;  %v1591_v53 = vadd.f32 %v1577_v62, %v5504_v44  ;;  %v6302_v19 = vld [vmem:[%s7851_s3 + $0x70] sm:$0xff]  ;;  %v1592_v22 = vadd.f32 %v1578_v3, %v5508_v41  ;;  %2482 = vmatpush.msrb.mxu3 %v6307_v9  ;;  %v8025_v62 = vld [vmem:[#allocation8_spill] sm:$0xff]  ;;  %v6374_v3 = vld [vmem:[%s7851_s3 + $0x38] sm:$0xff] }
 0x290   :  { %v1935_v37 = vadd.f32 %v1878_v49, %v1845_v18  ;;  %v1936_v10 = vadd.f32 %v1916_v0, %v1846_v52  ;;  %v6322_v49 = vld [vmem:[%s7851_s3 + $0x68] sm:$0xff]  ;;  %2450 = vmatpush.msrb.mxu2 %v6302_v19  ;;  %v8021_v18 = vld [vmem:[#allocation15_spill] sm:$0xff] }
 0x291   :  { %v4235_v59 = vpop.eup %4234  ;;  %v2040_v16 = vadd.f32 %v2026_v23, %v5504_v44  ;;  %v2041_v57 = vadd.f32 %v2027_v58, %v5508_v41  ;;  %v6317_v58 = vld [vmem:[%s7851_s3 + $0x60] sm:$0xff]  ;;  %2483 = vmatpush.msrb.mxu3 %v6322_v49 }
 0x292   :  { %v4237_v14 = vpop.eup %4236  ;;  %v2178_v34 = vadd.f32 %v4235_v59, %v4231_v42  ;;  %v1397_v42 = vadd.f32 %v5940_v13, %v5826_v4  ;;  %v8017_v59 = vld [vmem:[#allocation24_spill] sm:$0xff]  ;;  %2451 = vmatpush.msrb.mxu2 %v6317_v58 }
 0x293   :  { %v2179_v25 = vadd.f32 %v4237_v14, %v4233_v1  ;;  %4242 = vtanh.f32 %v2040_v16  ;;  %v4239_v43 = vpop.eup %4238  ;;  %v1579_v38 = vadd.f32 %v8017_v59, %v1486_v50  ;;  %v6336_v16 = vld [vmem:[%s7851_s3 + $0x58] sm:$0xff]  ;;  %v6389_v50 = vld [vmem:[%s7851_s3 + $0x28] sm:$0xff]  ;;  %v6398_v59 = vld [vmem:[%s7851_s3 + $0x10] sm:$0xff] }
 0x294   :  { %4244 = vtanh.f32 %v2041_v57  ;;  %2229 = vmatmul.f32.vlgmr.msra.gmra.mxu2 %v2178_v34  ;;  %v4241_v51 = vpop.eup %4240  ;;  %v1487_v30 = vadd.f32 %v5960_v48, %v1397_v42  ;;  %v8018_v14 = vld [vmem:[#allocation7_spill] sm:$0xff]  ;;  %2484 = vmatpush.msrb.mxu3 %v6336_v16  ;;  %v6384_v42 = vld [vmem:[%s7851_s3 + $0x20] sm:$0xff] }
 0x295   :  { %3905 = vmatmul.msk.f32.vlgmr.msra.gmra.mxu3 %vm2080_vm1, %v2179_v25  ;;  %4246 = vtanh.f32 %v1589_v28  ;;  %v1719_v34 = vadd.f32 %v8019_v15, %v8018_v14  ;;  %v8020_v48 = vld [vmem:[#allocation27_spill] sm:$0xff]  ;;  %2452 = vmatpush.msrb.mxu2 %v6331_v6  ;;  %v1593_v36 = vadd.f32 %v1579_v38, %v5504_v44  ;;  %v8033_v15 = vld [vmem:[#allocation33_spill] sm:$0xff] }
 0x296   :  { %v1971_v5 = vpop.f32.mrf.mxu2  ;;  %v2009_v17 = vpop.f32.mrf.mxu3  ;;  %4248 = vtanh.f32 %v1590_v20  ;;  %v1757_v52 = vadd.f32 %v8021_v18, %v8020_v48  ;;  %v6403_v38 = vld [vmem:[%s7851_s3 + $0x18] sm:$0xff]  ;;  %v8034_v48 = vld [vmem:[#allocation28_spill] sm:$0xff]  ;;  %v8035_v18 = vld [vmem:[#allocation34_spill] sm:$0xff] }
 0x297   :  { %v2028_v7 = vadd.f32 %v1971_v5, %v1935_v37  ;;  %v2029_v12 = vadd.f32 %v2009_v17, %v1936_v10  ;;  %v1881_v24 = vpop.f32.mrf.mxu0  ;;  %v1919_v2 = vpop.f32.mrf.mxu1  ;;  %v6348_v37 = vld [vmem:[%s7851_s3 + $0x48] sm:$0xff]  ;;  %v6355_v17 = vld [vmem:[%s7851_s3 + $0x40] sm:$0xff]  ;;  %v8032_v14 = vld [vmem:[#allocation11_spill] sm:$0xff] }
 0x298   :  { %v1937_v56 = vadd.f32 %v1881_v24, %v1847_v55  ;;  %v1938_v29 = vadd.f32 %v1919_v2, %v1848_v33  ;;  %v8024_v24 = vld [vmem:[#allocation32_spill] sm:$0xff]  ;;  %2485 = vmatpush.msrb.mxu3 %v6348_v37  ;;  %2453 = vmatpush.msrb.mxu2 %v6355_v17  ;;  %v8027_v55 = vld [vmem:[#allocation9_spill] sm:$0xff] }
 0x299   :  { %v4243_v63 = vpop.eup %4242  ;;  %v2042_v11 = vadd.f32 %v2028_v7, %v5504_v44  ;;  %v2043_v54 = vadd.f32 %v2029_v12, %v5508_v41  ;;  %v8023_v7 = vld [vmem:[#allocation31_spill] sm:$0xff]  ;;  %v1850_v2 = vadd.f32 %v8024_v24, %v1757_v52  ;;  %v8028_v33 = vld [vmem:[#allocation17_spill] sm:$0xff]  ;;  %v1760_v52 = vadd.f32 %v8035_v18, %v8034_v48  ;;  %v8049_v18 = vld [vmem:[#allocation38_spill] sm:$0xff] }
 0x29a   :  { %v4245_v21 = vpop.eup %4244  ;;  %v2180_v35 = vadd.f32 %v4243_v63, %v4239_v43  ;;  %v8022_v43 = vld [vmem:[#allocation25_spill] sm:$0xff]  ;;  %v1849_v12 = vadd.f32 %v8023_v7, %v1719_v34  ;;  %v8026_v63 = vld [vmem:[#allocation16_spill] sm:$0xff]  ;;  %2486 = vmatpush.msrb.mxu3 %v6374_v3  ;;  %v1722_v34 = vadd.f32 %v8033_v15, %v8032_v14  ;;  %v8037_v24 = vld [vmem:[#allocation35_spill] sm:$0xff] }
 0x29b   :  { %4250 = vtanh.f32 %v2042_v11  ;;  %v2181_v26 = vadd.f32 %v4245_v21, %v4241_v51  ;;  %v4247_v31 = vpop.eup %4246  ;;  %v1580_v20 = vadd.f32 %v8022_v43, %v1487_v30  ;;  %v1398_v27 = vadd.f32 %v8026_v63, %v8025_v62  ;;  %v6369_v21 = vld [vmem:[%s7851_s3 + $0x30] sm:$0xff]  ;;  %v8047_v15 = vld [vmem:[#allocation37_spill] sm:$0xff] }
 0x29c   :  { %4252 = vtanh.f32 %v2043_v54  ;;  %2232 = vmatmul.f32.gmra.mxu2 %v2180_v35  ;;  %v4249_v1 = vpop.eup %4248  ;;  %2487 = vmatpush.msrb.mxu3 %v6389_v50  ;;  %v8046_v14 = vld [vmem:[#allocation30_spill] sm:$0xff]  ;;  %v8048_v48 = vld [vmem:[#allocation5_spill] sm:$0xff] }
 0x29d   :  { %3906 = vmatmul.msk.f32.gmra.mxu3 %vm2080_vm1, %v2181_v26  ;;  %4254 = vtanh.f32 %v1591_v53  ;;  %v1399_v26 = vadd.f32 %v8028_v33, %v8027_v55  ;;  %v1488_v53 = vadd.f32 %v8029_v46, %v1398_v27  ;;  %2454 = vmatpush.msrb.mxu2 %v6369_v21  ;;  %v8039_v27 = vld [vmem:[#allocation12_spill] sm:$0xff]  ;;  %v8042_v46 = vld [vmem:[#allocation21_spill] sm:$0xff] }
 0x29e   :  { %v1974_v8 = vpop.f32.mrf.mxu2  ;;  %v2012_v23 = vpop.f32.mrf.mxu3  ;;  %4256 = vtanh.f32 %v1592_v22  ;;  %2488 = vmatpush.msrb.mxu3 %v6403_v38 }
 0x29f   :  { %v2030_v0 = vadd.f32 %v1974_v8, %v1937_v56  ;;  %v2031_v4 = vadd.f32 %v2012_v23, %v1938_v29  ;;  %v1884_v13 = vpop.f32.mrf.mxu0  ;;  %v1922_v45 = vpop.f32.mrf.mxu1  ;;  %v1594_v56 = vadd.f32 %v1580_v20, %v5508_v41  ;;  %2455 = vmatpush.msrb.mxu2 %v6384_v42  ;;  %v8036_v20 = vld [vmem:[#allocation26_spill] sm:$0xff] }
 0x2a0   :  { %v1939_v11 = vadd.f32 %v1884_v13, %v1849_v12  ;;  %v1940_v54 = vadd.f32 %v1922_v45, %v1850_v2  ;;  %v8031_v13 = vld [vmem:[#allocation10_spill] sm:$0xff]  ;;  %v6422_v12 = vld [vmem:[%s7851_s3] sm:$0xff]  ;;  %v1851_v2 = vadd.f32 %v8037_v24, %v1722_v34  ;;  %v1725_v34 = vadd.f32 %v8047_v15, %v8046_v14 }
 0x2a1   :  { %v4251_v57 = vpop.eup %4250  ;;  %v2044_v25 = vadd.f32 %v2030_v0, %v5504_v44  ;;  %v2045_v28 = vadd.f32 %v2031_v4, %v5508_v41  ;;  %v8030_v0 = vld [vmem:[#allocation19_spill] sm:$0xff]  ;;  %v1581_v45 = vadd.f32 %v8031_v13, %v1488_v53  ;;  %2456 = vmatpush.msrb.mxu2 %v6398_v59 }
 0x2a2   :  { %v4253_v10 = vpop.eup %4252  ;;  %v2182_v5 = vadd.f32 %v4251_v57, %v4247_v31  ;;  %v1489_v4 = vadd.f32 %v8030_v0, %v1399_v26  ;;  %v8041_v26 = vld [vmem:[#allocation13_spill] sm:$0xff]  ;;  %v8044_v13 = vld [vmem:[#allocation23_spill] sm:$0xff] }
 0x2a3   :  { %4258 = vtanh.f32 %v2044_v25  ;;  %v2183_v51 = vadd.f32 %v4253_v10, %v4249_v1  ;;  %v4255_v35 = vpop.eup %4254  ;;  %v6415_v10 = vld [vmem:[%s7851_s3 + $0x8] sm:$0xff]  ;;  %2457 = vmatpush.msrb.mxu2 %v6422_v12  ;;  %v1401_v53 = vadd.f32 %v8042_v46, %v8041_v26 }
 0x2a4   :  { %4260 = vtanh.f32 %v2045_v28  ;;  %2235 = vmatmul.f32.gmra.mxu2 %v2182_v5  ;;  %v4257_v23 = vpop.eup %4256  ;;  %v1582_v5 = vadd.f32 %v8036_v20, %v1489_v4  ;;  %2489 = vmatpush.msrb.mxu3 %v6415_v10  ;;  %v8050_v20 = vld [vmem:[#allocation29_spill] sm:$0xff] }
 0x2a5   :  { %3907 = vmatmul.msk.f32.gmra.mxu3 %vm2080_vm1, %v2183_v51  ;;  %4262 = vtanh.f32 %v1593_v36  ;;  %v8038_v51 = vld [vmem:[#allocation36_spill] sm:$0xff] }
 0x2a6   :  { %v1977_v29 = vpop.f32.mrf.mxu2  ;;  %v2015_v31 = vpop.f32.mrf.mxu3  ;;  %4264 = vtanh.f32 %v1594_v56  ;;  %v1852_v62 = vadd.f32 %v8038_v51, %v1760_v52  ;;  %v8040_v36 = vld [vmem:[#allocation20_spill] sm:$0xff]  ;;  %v8043_v56 = vld [vmem:[#allocation22_spill] sm:$0xff]  ;;  %v1763_v52 = vadd.f32 %v8049_v18, %v8048_v48  ;;  %v8051_v51 = vld [vmem:[#allocation39_spill] sm:$0xff] }
 0x2a7   :  { %v2032_v22 = vadd.f32 %v1977_v29, %v1939_v11  ;;  %v2033_v8 = vadd.f32 %v2015_v31, %v1940_v54  ;;  %v1887_v1 = vpop.f32.mrf.mxu0  ;;  %v1925_v30 = vpop.f32.mrf.mxu1  ;;  %v1400_v11 = vadd.f32 %v8040_v36, %v8039_v27  ;;  %v1595_v54 = vadd.f32 %v1581_v45, %v5504_v44  ;;  %v6472_v48 = vld [vmem:[%s7851_s3 + $0x140] sm:$0xff]  ;;  %v6477_v18 = vld [vmem:[%s7851_s3 + $0x148] sm:$0xff] }
 0x2a8   :  { %v1942_v55 = vadd.f32 %v1925_v30, %v1852_v62  ;;  %v1596_v31 = vadd.f32 %v1582_v5, %v5508_v41  ;;  %v1491_v45 = vadd.f32 %v8044_v13, %v1401_v53  ;;  %v1853_v62 = vadd.f32 %v8051_v51, %v1725_v34  ;;  %v6520_v51 = vld [vmem:[%s7851_s3 + $0x100] sm:$0xff] }
 0x2a9   :  { %v4259_v57 = vpop.eup %4258  ;;  %v2046_v25 = vadd.f32 %v2032_v22, %v5504_v44  ;;  %v2047_v28 = vadd.f32 %v2033_v8, %v5508_v41  ;;  %v1490_v29 = vadd.f32 %v8043_v56, %v1400_v11 }
 0x2aa   :  { %v4261_v43 = vpop.eup %4260  ;;  %v2184_v7 = vadd.f32 %v4259_v57, %v4255_v35  ;;  %v1941_v35 = vadd.f32 %v1887_v1, %v1851_v2  ;;  %v8045_v1 = vld [vmem:[#allocation14_spill] sm:$0xff]  ;;  %v1584_v5 = vadd.f32 %v8050_v20, %v1491_v45  ;;  %v6491_v20 = vld [vmem:[%s7851_s3 + $0x138] sm:$0xff] }
 0x2ab   :  { %4266 = vtanh.f32 %v2046_v25  ;;  %v2185_v63 = vadd.f32 %v4261_v43, %v4257_v23  ;;  %v4263_v33 = vpop.eup %4262  ;;  %v1583_v30 = vadd.f32 %v8045_v1, %v1490_v29 }
 0x2ac   :  { %4268 = vtanh.f32 %v2047_v28  ;;  %2238 = vmatmul.f32.gmra.mxu2 %v2184_v7  ;;  %v4265_v4 = vpop.eup %4264  ;;  %v1598_v26 = vadd.f32 %v1584_v5, %v5508_v41  ;;  %v6496_v5 = vld [vmem:[%s7851_s3 + $0x120] sm:$0xff] }
 0x2ad   :  { %3908 = vmatmul.msk.f32.gmra.mxu3 %vm2080_vm1, %v2185_v63  ;;  %4270 = vtanh.f32 %v1595_v54  ;;  %v8052_v63 = vld [vmem:[#allocation40_spill] sm:$0xff]  ;;  %v1597_v11 = vadd.f32 %v1583_v30, %v5504_v44 }
 0x2ae   :  { %v1980_v22 = vpop.f32.mrf.mxu2  ;;  %v2018_v8 = vpop.f32.mrf.mxu3  ;;  %4272 = vtanh.f32 %v1596_v31  ;;  %v1854_v27 = vadd.f32 %v8052_v63, %v1763_v52 }
 0x2af   :  { %v2034_v23 = vadd.f32 %v1980_v22, %v1941_v35  ;;  %v2035_v0 = vadd.f32 %v2018_v8, %v1942_v55  ;;  %v1890_v7 = vpop.f32.mrf.mxu0  ;;  %v1928_v24 = vpop.f32.mrf.mxu1 }
 0x2b0   :  { %v1943_v54 = vadd.f32 %v1890_v7, %v1853_v62  ;;  %v1944_v35 = vadd.f32 %v1928_v24, %v1854_v27  ;;  %v6503_v7 = vld [vmem:[%s7851_s3 + $0x128] sm:$0xff]  ;;  %v6508_v24 = vld [vmem:[%s7851_s3 + $0x110] sm:$0xff] }
 0x2b1   :  { %v4267_v57 = vpop.eup %4266  ;;  %v2048_v25 = vadd.f32 %v2034_v23, %v5504_v44  ;;  %v2049_v28 = vadd.f32 %v2035_v0, %v5508_v41  ;;  %v6525_v62 = vld [vmem:[%s7851_s3 + $0x2b0] sm:$0xf]  ;;  %v6534_v27 = vld [vmem:[%s7851_s3 + $0x108] sm:$0xff] }
 0x2b2   :  { %v4269_v43 = vpop.eup %4268  ;;  %v2186_v2 = vadd.f32 %v4267_v57, %v4263_v33  ;;  %v6457_v57 = vld [vmem:[%s7851_s3 + $0x150] sm:$0xf]  ;;  %4014 = vmatpush.msk.msra.mxu2 %vm2350_vm2, %v6525_v62 }
 0x2b3   :  { %4274 = vtanh.f32 %v2048_v25  ;;  %v2187_v36 = vadd.f32 %v4269_v43, %v4265_v4  ;;  %v4271_v55 = vpop.eup %4270  ;;  %3934 = vmatpush.msk.msrb.mxu0 %vm2350_vm2, %v6457_v57  ;;  %v6486_v43 = vld [vmem:[%s7851_s3 + $0x130] sm:$0xff] }
 0x2b4   :  { %4276 = vtanh.f32 %v2049_v28  ;;  %2241 = vmatmul.f32.gmra.mxu2 %v2186_v2  ;;  %v4273_v29 = vpop.eup %4272  ;;  %v6513_v2 = vld [vmem:[%s7851_s3 + $0x118] sm:$0xff] }
 0x2b5   :  { %3909 = vmatmul.msk.f32.gmra.mxu3 %vm2080_vm1, %v2187_v36  ;;  %4278 = vtanh.f32 %v1597_v11  ;;  %2363 = vmatpush.msrb.mxu0 %v6472_v48  ;;  %v6539_v36 = vld [vmem:[%s7851_s3 + $0x2b8] sm:$0xf] }
 0x2b6   :  { %v1983_v46 = vpop.f32.mrf.mxu2  ;;  %v2021_v53 = vpop.f32.mrf.mxu3  ;;  %4280 = vtanh.f32 %v1598_v26  ;;  %4020 = vmatpush.msk.msra.mxu3 %vm2350_vm2, %v6539_v36  ;;  %v6561_v26 = vld [vmem:[%s7851_s3 + $0xf8] sm:$0xff] }
 0x2b7   :  { %v2036_v33 = vadd.f32 %v1983_v46, %v1943_v54  ;;  %v2037_v56 = vadd.f32 %v2021_v53, %v1944_v35  ;;  %v2119_v45 = vpop.f32.mrf.mxu0  ;;  %v2157_v1 = vpop.f32.mrf.mxu1  ;;  %2364 = vmatpush.msrb.mxu0 %v6486_v43  ;;  %v6544_v35 = vld [vmem:[%s7851_s3 + $0xf0] sm:$0xff]  ;;  %v6566_v46 = vld [vmem:[%s7851_s3 + $0x2a8] sm:$0xff]  ;;  %v6574_v53 = vld [vmem:[%s7851_s3 + $0xe0] sm:$0xff] }
 0x2b8   :  { %v2158_v28 = vadd.f32 %v2157_v1, %v2119_v45  ;;  %2682 = vmatpush.msra.mxu3 %v6566_v46  ;;  %v6638_v45 = vld [vmem:[%s7851_s3 + $0xb0] sm:$0xff] }
 0x2b9   :  { %v4275_v31 = vpop.eup %4274  ;;  %v2050_v22 = vadd.f32 %v2036_v33, %v5504_v44  ;;  %v2051_v8 = vadd.f32 %v2037_v56, %v5508_v41  ;;  %v6462_v44 = vld [vmem:[%s7851_s3 + $0x158] sm:$0xf]  ;;  %2365 = vmatpush.msrb.mxu0 %v6496_v5  ;;  %v6579_v33 = vld [vmem:[%s7851_s3 + $0x290] sm:$0xff]  ;;  %v6585_v56 = vld [vmem:[%s7851_s3 + $0xe8] sm:$0xff] }
 0x2ba   :  { %v4277_v23 = vpop.eup %4276  ;;  %v2188_v0 = vadd.f32 %v4275_v31, %v4271_v55  ;;  %3940 = vmatpush.msk.msrb.mxu1 %vm2350_vm2, %v6462_v44  ;;  %v6553_v55 = vld [vmem:[%s7851_s3 + $0x2a0] sm:$0xff]  ;;  %v6597_v31 = vld [vmem:[%s7851_s3 + $0xd0] sm:$0xff] }
 0x2bb   :  { %4282 = vtanh.f32 %v2050_v22  ;;  %v2189_v4 = vadd.f32 %v4277_v23, %v4273_v29  ;;  %v4279_v13 = vpop.eup %4278  ;;  %2366 = vmatpush.msrb.mxu0 %v6508_v24  ;;  %2650 = vmatpush.msra.mxu2 %v6553_v55  ;;  %v6591_v29 = vld [vmem:[%s7851_s3 + $0x298] sm:$0xff]  ;;  %v6603_v22 = vld [vmem:[%s7851_s3 + $0x280] sm:$0xff]  ;;  %v6615_v23 = vld [vmem:[%s7851_s3 + $0x288] sm:$0xff] }
 0x2bc   :  { %4284 = vtanh.f32 %v2051_v8  ;;  %2244 = vmatmul.f32.gmra.mxu2 %v2188_v0  ;;  %v4281_v30 = vpop.eup %4280  ;;  %2395 = vmatpush.msrb.mxu1 %v6477_v18  ;;  %v6609_v8 = vld [vmem:[%s7851_s3 + $0xd8] sm:$0xff]  ;;  %8053 = vst [vmem:[#allocation24_spill] sm:$0xff] %v6615_v23  ;;  %v6621_v0 = vld [vmem:[%s7851_s3 + $0xc0] sm:$0xff]  ;;  %v6643_v1 = vld [vmem:[%s7851_s3 + $0x270] sm:$0xff] }
 0x2bd   :  { %3910 = vmatmul.msk.f32.gmra.mxu3 %vm2080_vm1, %v2189_v4  ;;  %2367 = vmatpush.msrb.mxu0 %v6520_v51  ;;  %8054 = vst [vmem:[#allocation7_spill] sm:$0xff] %v6643_v1 }
 0x2be   :  { %2396 = vmatpush.msrb.mxu1 %v6491_v20  ;;  %2651 = vmatpush.msra.mxu2 %v6579_v33 }
 0x2bf   :  { %v2122_v52 = vpop.f32.mrf.mxu0  ;;  %v2160_v25 = vpop.f32.mrf.mxu1  ;;  %2368 = vmatpush.msrb.mxu0 %v6544_v35  ;;  %2683 = vmatpush.msra.mxu3 %v6591_v29 }
 0x2c0   :  { %2397 = vmatpush.msrb.mxu1 %v6503_v7  ;;  %v6527_v63 = vadd.f32 %v2160_v25, %v2122_v52  ;;  %2652 = vmatpush.msra.mxu2 %v6603_v22 }
 0x2c1   :  { %v4283_v41 = vpop.eup %4282  ;;  %2369 = vmatpush.msrb.mxu0 %v6574_v53  ;;  %2684 = vmatpush.msra.mxu3 %v6615_v23  ;;  %v6808_v23 = vld [vmem:[%s7851_s3 + $0x1c0] sm:$0xff] }
 0x2c2   :  { %v4285_v14 = vpop.eup %4284  ;;  %v2190_v15 = vadd.f32 %v4283_v41, %v4279_v13  ;;  %2398 = vmatpush.msrb.mxu1 %v6513_v2  ;;  %v6630_v13 = vld [vmem:[%s7851_s3 + $0xc8] sm:$0xff]  ;;  %v6656_v41 = vld [vmem:[%s7851_s3 + $0x278] sm:$0xff]  ;;  %2653 = vmatpush.msra.mxu2 %v6643_v1 }
 0x2c3   :  { %v2191_v34 = vadd.f32 %v4285_v14, %v4281_v30  ;;  %2370 = vmatpush.msrb.mxu0 %v6597_v31  ;;  %v6651_v30 = vld [vmem:[%s7851_s3 + $0xb8] sm:$0xff]  ;;  %8055 = vst [vmem:[#allocation6_spill] sm:$0xff] %v6656_v41  ;;  %2685 = vmatpush.msra.mxu3 %v6656_v41  ;;  %v6740_v41 = vld [vmem:[%s7851_s3 + $0x1f0] sm:$0xff] }
 0x2c4   :  { %2247 = vmatmul.f32.gmra.mxu2 %v2190_v15  ;;  %2399 = vmatpush.msrb.mxu1 %v6534_v27  ;;  %v6745_v1 = vld [vmem:[%s7851_s3 + $0x1f8] sm:$0xff] }
 0x2c5   :  { %3911 = vmatmul.msk.f32.gmra.mxu3 %vm2080_vm1, %v2191_v34  ;;  %2371 = vmatpush.msrb.mxu0 %v6621_v0 }
 0x2c6   :  { %2400 = vmatpush.msrb.mxu1 %v6561_v26 }
 0x2c7   :  { %v2125_v11 = vpop.f32.mrf.mxu0  ;;  %v2163_v54 = vpop.f32.mrf.mxu1  ;;  %2372 = vmatpush.msrb.mxu0 %v6638_v45 }
 0x2c8   :  { %2401 = vmatpush.msrb.mxu1 %v6585_v56  ;;  %v6624_v4 = vadd.f32 %v2163_v54, %v2125_v11  ;;  %v6680_v11 = vld [vmem:[%s7851_s3 + $0x260] sm:$0xff]  ;;  %v6685_v54 = vld [vmem:[%s7851_s3 + $0x268] sm:$0xff] }
 0x2c9   :  { %8056 = vst [vmem:[#allocation27_spill] sm:$0xff] %v6680_v11  ;;  %2654 = vmatpush.msra.mxu2 %v6680_v11  ;;  %2686 = vmatpush.msra.mxu3 %v6685_v54  ;;  %v6733_v11 = vld [vmem:[%s7851_s3 + $0x238] sm:$0xff] }
 0x2ca   :  { %2402 = vmatpush.msrb.mxu1 %v6609_v8  ;;  %8057 = vst [vmem:[#allocation15_spill] sm:$0xff] %v6685_v54  ;;  %v6714_v54 = vld [vmem:[%s7851_s3 + $0x240] sm:$0xff] }
 0x2cb   :  { %8060 = vst [vmem:[#allocation32_spill] sm:$0xff] %v6714_v54 }
 0x2cc   :  { %3947 = vmatmul.msk.f32.vlgmr.msrb.gmra.mxu2 %vm2334_vm3, %v2158_v28  ;;  %2403 = vmatpush.msrb.mxu1 %v6630_v13  ;;  %8063 = vst [vmem:[#allocation9_spill] sm:$0xff] %v6733_v11 }
 0x2cd   :  { %3953 = vmatmul.msk.f32.vlgmr.msrb.gmra.mxu3 %vm2334_vm3, %v2158_v28 }
 0x2ce   :  { %2404 = vmatpush.msrb.mxu1 %v6651_v30 }
 0x2cf   :  { %v2128_v14 = vpop.f32.mrf.mxu0  ;;  %v2166_v15 = vpop.f32.mrf.mxu1 }
 0x2d0   :  { %v6665_v34 = vadd.f32 %v2166_v15, %v2128_v14  ;;  %v6692_v14 = vld [vmem:[%s7851_s3 + $0x250] sm:$0xff]  ;;  %v6697_v15 = vld [vmem:[%s7851_s3 + $0x258] sm:$0xff] }
 0x2d1   :  { %8058 = vst [vmem:[#allocation25_spill] sm:$0xff] %v6692_v14  ;;  %2655 = vmatpush.msra.mxu2 %v6692_v14  ;;  %2687 = vmatpush.msra.mxu3 %v6697_v15  ;;  %v6728_v14 = vld [vmem:[%s7851_s3 + $0x230] sm:$0xff] }
 0x2d2   :  { %8059 = vst [vmem:[#allocation31_spill] sm:$0xff] %v6697_v15  ;;  %v6723_v15 = vld [vmem:[%s7851_s3 + $0x248] sm:$0xff] }
 0x2d3   :  { %8061 = vst [vmem:[#allocation8_spill] sm:$0xff] %v6723_v15  ;;  %2656 = vmatpush.msra.mxu2 %v6714_v54  ;;  %2688 = vmatpush.msra.mxu3 %v6723_v15  ;;  %v6754_v15 = vld [vmem:[%s7851_s3 + $0x220] sm:$0xff]  ;;  %v6759_v54 = vld [vmem:[%s7851_s3 + $0x228] sm:$0xff] }
 0x2d4   :  { %3948 = vmatmul.msk.f32.gmra.mxu2 %vm2334_vm3, %v6527_v63  ;;  %8062 = vst [vmem:[#allocation16_spill] sm:$0xff] %v6728_v14 }
 0x2d5   :  { %3954 = vmatmul.msk.f32.gmra.mxu3 %vm2334_vm3, %v6527_v63  ;;  %2657 = vmatpush.msra.mxu2 %v6728_v14  ;;  %8064 = vst [vmem:[#allocation17_spill] sm:$0xff] %v6754_v15  ;;  %v6766_v14 = vld [vmem:[%s7851_s3 + $0x210] sm:$0xff] }
 0x2d6   :  { %2689 = vmatpush.msra.mxu3 %v6733_v11  ;;  %8065 = vst [vmem:[#allocation18_spill] sm:$0xff] %v6759_v54  ;;  %v6771_v11 = vld [vmem:[%s7851_s3 + $0x218] sm:$0xff] }
 0x2d7   :  { %v2131_v52 = vpop.f32.mrf.mxu0  ;;  %v2169_v25 = vpop.f32.mrf.mxu1  ;;  %2658 = vmatpush.msra.mxu2 %v6754_v15  ;;  %8066 = vst [vmem:[#allocation19_spill] sm:$0xff] %v6766_v14  ;;  %v6778_v15 = vld [vmem:[%s7851_s3 + $0x1e0] sm:$0xff] }
 0x2d8   :  { %v6671_v28 = vadd.f32 %v2169_v25, %v2131_v52  ;;  %v6704_v52 = vld [vmem:[%s7851_s3 + $0x200] sm:$0xf]  ;;  %v6709_v25 = vld [vmem:[%s7851_s3 + $0x208] sm:$0xf]  ;;  %2690 = vmatpush.msra.mxu3 %v6759_v54  ;;  %8067 = vst [vmem:[#allocation10_spill] sm:$0xff] %v6771_v11 }
 0x2d9   :  { %3980 = vmatpush.msk.msra.mxu0 %vm2350_vm2, %v6704_v52  ;;  %3986 = vmatpush.msk.msra.mxu1 %vm2350_vm2, %v6709_v25  ;;  %v6783_v54 = vld [vmem:[%s7851_s3 + $0x1e8] sm:$0xff] }
 0x2da   :  { %2659 = vmatpush.msra.mxu2 %v6766_v14  ;;  %2691 = vmatpush.msra.mxu3 %v6771_v11  ;;  %v6790_v14 = vld [vmem:[%s7851_s3 + $0x1d0] sm:$0xff]  ;;  %v6795_v11 = vld [vmem:[%s7851_s3 + $0x1d8] sm:$0xff] }
 0x2db   :  { %2544 = vmatpush.msra.mxu0 %v6740_v41  ;;  %2576 = vmatpush.msra.mxu1 %v6745_v1 }
 0x2dc   :  { %3949 = vmatmul.msk.f32.gmra.mxu2 %vm2334_vm3, %v6624_v4  ;;  %4066 = vmatpush.msk.msrb.mxu3 %vm2350_vm2, %v6462_v44  ;;  %v6824_v44 = vld [vmem:[%s7851_s3 + $0x1b0] sm:$0xff] }
 0x2dd   :  { %3955 = vmatmul.msk.f32.gmra.mxu3 %vm2334_vm3, %v6624_v4  ;;  %2545 = vmatpush.msra.mxu0 %v6778_v15 }
 0x2de   :  { %2577 = vmatpush.msra.mxu1 %v6783_v54  ;;  %4060 = vmatpush.msk.msrb.mxu2 %vm2350_vm2, %v6457_v57  ;;  %v6813_v57 = vld [vmem:[%s7851_s3 + $0x1c8] sm:$0xff] }
 0x2df   :  { %2546 = vmatpush.msra.mxu0 %v6790_v14  ;;  %2887 = vmatpush.msrb.mxu3 %v6477_v18  ;;  %v6840_v18 = vld [vmem:[%s7851_s3 + $0x1a0] sm:$0xff] }
 0x2e0   :  { %2578 = vmatpush.msra.mxu1 %v6795_v11  ;;  %2855 = vmatpush.msrb.mxu2 %v6472_v48  ;;  %v6829_v48 = vld [vmem:[%s7851_s3 + $0x1b8] sm:$0xff] }
 0x2e1   :  { %2888 = vmatpush.msrb.mxu3 %v6491_v20  ;;  %2547 = vmatpush.msra.mxu0 %v6808_v23  ;;  %v6854_v20 = vld [vmem:[%s7851_s3 + $0x190] sm:$0xff] }
 0x2e2   :  { %2856 = vmatpush.msrb.mxu2 %v6486_v43  ;;  %2579 = vmatpush.msra.mxu1 %v6813_v57  ;;  %v6845_v43 = vld [vmem:[%s7851_s3 + $0x1a8] sm:$0xff] }
 0x2e3   :  { %2889 = vmatpush.msrb.mxu3 %v6503_v7  ;;  %2548 = vmatpush.msra.mxu0 %v6824_v44 }
 0x2e4   :  { %3950 = vmatmul.msk.f32.gmra.mxu2 %vm2334_vm3, %v6665_v34  ;;  %2580 = vmatpush.msra.mxu1 %v6829_v48 }
 0x2e5   :  { %3956 = vmatmul.msk.f32.gmra.mxu3 %vm2334_vm3, %v6665_v34  ;;  %2857 = vmatpush.msrb.mxu2 %v6496_v5  ;;  %v6859_v5 = vld [vmem:[%s7851_s3 + $0x198] sm:$0xff] }
 0x2e6   :  { %2890 = vmatpush.msrb.mxu3 %v6513_v2  ;;  %2549 = vmatpush.msra.mxu0 %v6840_v18 }
 0x2e7   :  { %2858 = vmatpush.msrb.mxu2 %v6508_v24  ;;  %2581 = vmatpush.msra.mxu1 %v6845_v43 }
 0x2e8   :  { %2891 = vmatpush.msrb.mxu3 %v6534_v27  ;;  %2550 = vmatpush.msra.mxu0 %v6854_v20  ;;  %v6877_v27 = vld [vmem:[%s7851_s3 + $0x188] sm:$0xff] }
 0x2e9   :  { %2859 = vmatpush.msrb.mxu2 %v6520_v51  ;;  %2582 = vmatpush.msra.mxu1 %v6859_v5  ;;  %v6872_v51 = vld [vmem:[%s7851_s3 + $0x180] sm:$0xff] }
 0x2ea   :  { %2892 = vmatpush.msrb.mxu3 %v6561_v26  ;;  %2551 = vmatpush.msra.mxu0 %v6872_v51  ;;  %v6893_v26 = vld [vmem:[%s7851_s3 + $0x178] sm:$0xff] }
 0x2eb   :  { %2860 = vmatpush.msrb.mxu2 %v6544_v35  ;;  %2583 = vmatpush.msra.mxu1 %v6877_v27  ;;  %v6888_v35 = vld [vmem:[%s7851_s3 + $0x170] sm:$0xff] }
 0x2ec   :  { %3951 = vmatmul.msk.f32.gmra.mxu2 %vm2334_vm3, %v6671_v28  ;;  %2893 = vmatpush.msrb.mxu3 %v6585_v56 }
 0x2ed   :  { %3957 = vmatmul.msk.f32.gmra.mxu3 %vm2334_vm3, %v6671_v28  ;;  %2861 = vmatpush.msrb.mxu2 %v6574_v53 }
 0x2ee   :  { %2894 = vmatpush.msrb.mxu3 %v6609_v8  ;;  %2552 = vmatpush.msra.mxu0 %v6888_v35  ;;  %v6906_v8 = vld [vmem:[%s7851_s3 + $0x160] sm:$0xff] }
 0x2ef   :  { %2862 = vmatpush.msrb.mxu2 %v6597_v31  ;;  %2584 = vmatpush.msra.mxu1 %v6893_v26 }
 0x2f0   :  { %2895 = vmatpush.msrb.mxu3 %v6630_v13  ;;  %2553 = vmatpush.msra.mxu0 %v6906_v8  ;;  %v6926_v13 = vld [vmem:[%s7851_s3 + $0x360] sm:$0xf] }
 0x2f1   :  { %2863 = vmatpush.msrb.mxu2 %v6621_v0  ;;  %v6911_v0 = vld [vmem:[%s7851_s3 + $0x168] sm:$0xff] }
 0x2f2   :  { %2896 = vmatpush.msrb.mxu3 %v6651_v30  ;;  %2585 = vmatpush.msra.mxu1 %v6911_v0  ;;  %v6936_v30 = vld [vmem:[%s7851_s3 + $0x350] sm:$0xff] }
 0x2f3   :  { %2864 = vmatpush.msrb.mxu2 %v6638_v45  ;;  %v6931_v45 = vld [vmem:[%s7851_s3 + $0x368] sm:$0xf] }
 0x317   :  { %v2230_v7 = vpop.f32.mrf.mxu2 }
 0x318   :  { %v2268_v24 = vpop.f32.mrf.mxu3 }
 0x319   :  { %v6867_v2 = vadd.f32 %v2268_v24, %v2230_v7  ;;  %v6945_v7 = vld [vmem:[%s7851_s3 + $0x358] sm:$0xff] }
 0x31b   :  { %3935 = vmatmul.msk.f32.vlgmr.msrb.gmra.mxu0 %vm2334_vm3, %v6867_v2  ;;  %3941 = vmatmul.msk.f32.vlgmr.msrb.gmra.mxu1 %vm2334_vm3, %v6867_v2 }
 0x31c   :  { %4048 = vmatpush.msk.msrb.mxu0 %vm2350_vm2, %v6926_v13  ;;  %4054 = vmatpush.msk.msrb.mxu1 %vm2350_vm2, %v6931_v45 }
 0x31e   :  { %2756 = vmatpush.msrb.mxu0 %v6936_v30  ;;  %2788 = vmatpush.msrb.mxu1 %v6945_v7 }
 0x31f   :  { %v2233_v53 = vpop.f32.mrf.mxu2 }
 0x320   :  { %v2271_v56 = vpop.f32.mrf.mxu3 }
 0x321   :  { %v6901_v31 = vadd.f32 %v2271_v56, %v2233_v53 }
 0x323   :  { %3936 = vmatmul.msk.f32.gmra.mxu0 %vm2334_vm3, %v6901_v31  ;;  %3942 = vmatmul.msk.f32.gmra.mxu1 %vm2334_vm3, %v6901_v31 }
 0x324   :  { %4015 = vmatmul.msk.f32.vlgmr.msra.gmra.mxu2 %vm2334_vm3, %v6901_v31  ;;  %4021 = vmatmul.msk.f32.vlgmr.msra.gmra.mxu3 %vm2334_vm3, %v6901_v31 }
 0x325   :  { %4084 = vmatpush.msk.msra.mxu2 %vm2350_vm2, %v6704_v52  ;;  %4090 = vmatpush.msk.msra.mxu3 %vm2350_vm2, %v6709_v25  ;;  %v6966_v52 = vld [vmem:[%s7851_s3 + $0x340] sm:$0xff] }
 0x326   :  { %2757 = vmatpush.msrb.mxu0 %v6966_v52 }
 0x327   :  { %v2236_v24 = vpop.f32.mrf.mxu2  ;;  %2983 = vmatpush.msra.mxu2 %v6740_v41  ;;  %3015 = vmatpush.msra.mxu3 %v6745_v1  ;;  %v6971_v1 = vld [vmem:[%s7851_s3 + $0x348] sm:$0xff]  ;;  %v6980_v41 = vld [vmem:[%s7851_s3 + $0x330] sm:$0xff] }
 0x328   :  { %v2274_v53 = vpop.f32.mrf.mxu3  ;;  %2789 = vmatpush.msrb.mxu1 %v6971_v1  ;;  %2758 = vmatpush.msrb.mxu0 %v6980_v41 }
 0x329   :  { %v6955_v56 = vadd.f32 %v2274_v53, %v2236_v24  ;;  %2984 = vmatpush.msra.mxu2 %v6778_v15  ;;  %3016 = vmatpush.msra.mxu3 %v6783_v54  ;;  %v6985_v54 = vld [vmem:[%s7851_s3 + $0x338] sm:$0xff]  ;;  %v6996_v24 = vld [vmem:[%s7851_s3 + $0x320] sm:$0xff]  ;;  %v7001_v53 = vld [vmem:[%s7851_s3 + $0x328] sm:$0xff] }
 0x32a   :  { %2790 = vmatpush.msrb.mxu1 %v6985_v54  ;;  %2759 = vmatpush.msrb.mxu0 %v6996_v24 }
 0x32b   :  { %3937 = vmatmul.msk.f32.gmra.mxu0 %vm2334_vm3, %v6955_v56  ;;  %3943 = vmatmul.msk.f32.gmra.mxu1 %vm2334_vm3, %v6955_v56 }
 0x32c   :  { %4016 = vmatmul.msk.f32.gmra.mxu2 %vm2334_vm3, %v6955_v56  ;;  %4022 = vmatmul.msk.f32.gmra.mxu3 %vm2334_vm3, %v6955_v56 }
 0x32d   :  { %2985 = vmatpush.msra.mxu2 %v6790_v14  ;;  %3017 = vmatpush.msra.mxu3 %v6795_v11  ;;  %v7027_v14 = vld [vmem:[%s7851_s3 + $0x318] sm:$0xff] }
 0x32e   :  { %2791 = vmatpush.msrb.mxu1 %v7001_v53 }
 0x32f   :  { %v2239_v15 = vpop.f32.mrf.mxu2  ;;  %2986 = vmatpush.msra.mxu2 %v6808_v23  ;;  %3018 = vmatpush.msra.mxu3 %v6813_v57  ;;  %v7022_v23 = vld [vmem:[%s7851_s3 + $0x310] sm:$0xff] }
 0x330   :  { %v2277_v25 = vpop.f32.mrf.mxu3  ;;  %2760 = vmatpush.msrb.mxu0 %v7022_v23  ;;  %2792 = vmatpush.msrb.mxu1 %v7027_v14 }
 0x331   :  { %v7005_v11 = vadd.f32 %v2277_v25, %v2239_v15  ;;  %2987 = vmatpush.msra.mxu2 %v6824_v44  ;;  %3019 = vmatpush.msra.mxu3 %v6829_v48  ;;  %v7036_v48 = vld [vmem:[%s7851_s3 + $0x300] sm:$0xff]  ;;  %v7041_v15 = vld [vmem:[%s7851_s3 + $0x308] sm:$0xff] }
 0x332   :  { %2761 = vmatpush.msrb.mxu0 %v7036_v48  ;;  %2793 = vmatpush.msrb.mxu1 %v7041_v15 }
 0x333   :  { %3938 = vmatmul.msk.f32.gmra.mxu0 %vm2334_vm3, %v7005_v11  ;;  %3944 = vmatmul.msk.f32.gmra.mxu1 %vm2334_vm3, %v7005_v11 }
 0x334   :  { %4017 = vmatmul.msk.f32.gmra.mxu2 %vm2334_vm3, %v7005_v11  ;;  %4023 = vmatmul.msk.f32.gmra.mxu3 %vm2334_vm3, %v7005_v11 }
 0x335   :  { %2988 = vmatpush.msra.mxu2 %v6840_v18  ;;  %3020 = vmatpush.msra.mxu3 %v6845_v43  ;;  %v7062_v18 = vld [vmem:[%s7851_s3 + $0x2f0] sm:$0xff]  ;;  %v7067_v43 = vld [vmem:[%s7851_s3 + $0x2f8] sm:$0xff] }
 0x336   :  { %2762 = vmatpush.msrb.mxu0 %v7062_v18  ;;  %2794 = vmatpush.msrb.mxu1 %v7067_v43 }
 0x337   :  { %v2242_v57 = vpop.f32.mrf.mxu2  ;;  %2989 = vmatpush.msra.mxu2 %v6854_v20  ;;  %3021 = vmatpush.msra.mxu3 %v6859_v5 }
 0x338   :  { %v2280_v44 = vpop.f32.mrf.mxu3 }
 0x339   :  { %v7045_v25 = vadd.f32 %v2280_v44, %v2242_v57  ;;  %2990 = vmatpush.msra.mxu2 %v6872_v51  ;;  %3022 = vmatpush.msra.mxu3 %v6877_v27  ;;  %v7076_v51 = vld [vmem:[%s7851_s3 + $0x2e0] sm:$0xff]  ;;  %v7081_v27 = vld [vmem:[%s7851_s3 + $0x2e8] sm:$0xff] }
 0x33a   :  { %2763 = vmatpush.msrb.mxu0 %v7076_v51  ;;  %2795 = vmatpush.msrb.mxu1 %v7081_v27 }
 0x33b   :  { %3939 = vmatmul.msk.f32.gmra.mxu0 %vm2334_vm3, %v7045_v25  ;;  %3945 = vmatmul.msk.f32.gmra.mxu1 %vm2334_vm3, %v7045_v25 }
 0x33c   :  { %4018 = vmatmul.msk.f32.gmra.mxu2 %vm2334_vm3, %v7045_v25  ;;  %4024 = vmatmul.msk.f32.gmra.mxu3 %vm2334_vm3, %v7045_v25 }
 0x33d   :  { %2991 = vmatpush.msra.mxu2 %v6888_v35  ;;  %3023 = vmatpush.msra.mxu3 %v6893_v26  ;;  %v7100_v35 = vld [vmem:[%s7851_s3 + $0x2d0] sm:$0xff]  ;;  %v7105_v26 = vld [vmem:[%s7851_s3 + $0x2d8] sm:$0xff] }
 0x33e   :  { %2764 = vmatpush.msrb.mxu0 %v7100_v35  ;;  %2796 = vmatpush.msrb.mxu1 %v7105_v26 }
 0x33f   :  { %v2245_v20 = vpop.f32.mrf.mxu2  ;;  %2992 = vmatpush.msra.mxu2 %v6906_v8  ;;  %3024 = vmatpush.msra.mxu3 %v6911_v0  ;;  %v7112_v8 = vld [vmem:[%s7851_s3 + $0x2c0] sm:$0xff]  ;;  %v7117_v0 = vld [vmem:[%s7851_s3 + $0x2c8] sm:$0xff] }
 0x340   :  { %v2283_v5 = vpop.f32.mrf.mxu3  ;;  %2765 = vmatpush.msrb.mxu0 %v7112_v8  ;;  %2797 = vmatpush.msrb.mxu1 %v7117_v0 }
 0x341   :  { %v7085_v57 = vadd.f32 %v2283_v5, %v2245_v20 }
 0x343   :  { %3981 = vmatmul.msk.f32.vlgmr.msra.gmra.mxu0 %vm2334_vm3, %v6527_v63  ;;  %3987 = vmatmul.msk.f32.vlgmr.msra.gmra.mxu1 %vm2334_vm3, %v6527_v63 }
 0x344   :  { %4019 = vmatmul.msk.f32.gmra.mxu2 %vm2334_vm3, %v7085_v57  ;;  %4025 = vmatmul.msk.f32.gmra.mxu3 %vm2334_vm3, %v7085_v57 }
 0x345   :  { %4072 = vmatpush.msk.msra.mxu0 %vm2350_vm2, %v6248_v47  ;;  %4078 = vmatpush.msk.msra.mxu1 %vm2350_vm2, %v6253_v60  ;;  %v2134_v47 = vpop.f32.mrf.mxu0  ;;  %v2172_v60 = vpop.f32.mrf.mxu1 }
 0x347   :  { %2919 = vmatpush.msra.mxu0 %v6270_v39  ;;  %2951 = vmatpush.msra.mxu1 %v6275_v32  ;;  %v7183_v39 = vadd.f32 %v2172_v60, %v2134_v47  ;;  %v7211_v32 = vpop.f32.mrf.mxu2 }
 0x349   :  { %2920 = vmatpush.msra.mxu0 %v6286_v40  ;;  %2952 = vmatpush.msra.mxu1 %v6291_v61  ;;  %v7213_v40 = vpop.f32.mrf.mxu3  ;;  %v8068_v61 = vld [vmem:[#allocation24_spill] sm:$0xff] }
 0x34b   :  { %3982 = vmatmul.msk.f32.gmra.mxu0 %vm2334_vm3, %v6624_v4  ;;  %3988 = vmatmul.msk.f32.gmra.mxu1 %vm2334_vm3, %v6624_v4 }
 0x34c   :  { %4061 = vmatmul.msk.f32.vlgmr.msrb.gmra.mxu2 %vm2334_vm3, %v6527_v63  ;;  %4067 = vmatmul.msk.f32.vlgmr.msrb.gmra.mxu3 %vm2334_vm3, %v6527_v63 }
 0x34d   :  { %4108 = vmatpush.msk.msrb.mxu2 %vm2350_vm2, %v6926_v13  ;;  %4114 = vmatpush.msk.msrb.mxu3 %vm2350_vm2, %v6931_v45  ;;  %v2175_v63 = vpop.f32.mrf.mxu1 }
 0x34e   :  { %2921 = vmatpush.msra.mxu0 %v6302_v19  ;;  %2953 = vmatpush.msra.mxu1 %v6307_v9 }
 0x34f   :  { %3134 = vmatpush.msrb.mxu2 %v6936_v30  ;;  %3166 = vmatpush.msrb.mxu3 %v6945_v7  ;;  %v7233_v19 = vpop.f32.mrf.mxu2 }
 0x350   :  { %2922 = vmatpush.msra.mxu0 %v6317_v58  ;;  %2954 = vmatpush.msra.mxu1 %v6322_v49  ;;  %v8069_v58 = vld [vmem:[#allocation7_spill] sm:$0xff]  ;;  %v8070_v49 = vld [vmem:[#allocation6_spill] sm:$0xff] }
 0x351   :  { %3135 = vmatpush.msrb.mxu2 %v6966_v52  ;;  %3167 = vmatpush.msrb.mxu3 %v6971_v1  ;;  %v7235_v9 = vpop.f32.mrf.mxu3 }
 0x352   :  { %2923 = vmatpush.msra.mxu0 %v6331_v6  ;;  %2955 = vmatpush.msra.mxu1 %v6336_v16  ;;  %v8071_v6 = vld [vmem:[#allocation27_spill] sm:$0xff] }
 0x353   :  { %3983 = vmatmul.msk.f32.gmra.mxu0 %vm2334_vm3, %v6665_v34  ;;  %3989 = vmatmul.msk.f32.gmra.mxu1 %vm2334_vm3, %v6665_v34  ;;  %v8072_v16 = vld [vmem:[#allocation15_spill] sm:$0xff] }
 0x354   :  { %4062 = vmatmul.msk.f32.gmra.mxu2 %vm2334_vm3, %v6624_v4  ;;  %4068 = vmatmul.msk.f32.gmra.mxu3 %vm2334_vm3, %v6624_v4 }
 0x355   :  { %3136 = vmatpush.msrb.mxu2 %v6980_v41  ;;  %3168 = vmatpush.msrb.mxu3 %v6985_v54 }
 0x356   :  { %2924 = vmatpush.msra.mxu0 %v6355_v17  ;;  %2956 = vmatpush.msra.mxu1 %v6348_v37  ;;  %v8073_v37 = vld [vmem:[#allocation25_spill] sm:$0xff]  ;;  %v8074_v17 = vld [vmem:[#allocation31_spill] sm:$0xff] }
 0x357   :  { %3137 = vmatpush.msrb.mxu2 %v6996_v24  ;;  %3169 = vmatpush.msrb.mxu3 %v7001_v53 }
 0x358   :  { %2925 = vmatpush.msra.mxu0 %v6369_v21  ;;  %2957 = vmatpush.msra.mxu1 %v6374_v3  ;;  %v8075_v21 = vld [vmem:[#allocation32_spill] sm:$0xff] }
 0x359   :  { %3138 = vmatpush.msrb.mxu2 %v7022_v23  ;;  %3170 = vmatpush.msrb.mxu3 %v7027_v14  ;;  %v8076_v3 = vld [vmem:[#allocation8_spill] sm:$0xff] }
 0x35a   :  { %2926 = vmatpush.msra.mxu0 %v6384_v42  ;;  %2958 = vmatpush.msra.mxu1 %v6389_v50  ;;  %v7253_v42 = vpop.f32.mrf.mxu2  ;;  %v7255_v50 = vpop.f32.mrf.mxu3 }
 0x35b   :  { %3984 = vmatmul.msk.f32.gmra.mxu0 %vm2334_vm3, %v6671_v28  ;;  %3990 = vmatmul.msk.f32.gmra.mxu1 %vm2334_vm3, %v6671_v28 }
 0x35c   :  { %4063 = vmatmul.msk.f32.gmra.mxu2 %vm2334_vm3, %v6665_v34  ;;  %4069 = vmatmul.msk.f32.gmra.mxu3 %vm2334_vm3, %v6665_v34 }
 0x35d   :  { %3139 = vmatpush.msrb.mxu2 %v7036_v48  ;;  %3171 = vmatpush.msrb.mxu3 %v7041_v15 }
 0x35e   :  { %2927 = vmatpush.msra.mxu0 %v6398_v59  ;;  %2959 = vmatpush.msra.mxu1 %v6403_v38  ;;  %v8077_v59 = vld [vmem:[#allocation16_spill] sm:$0xff]  ;;  %v8078_v38 = vld [vmem:[#allocation9_spill] sm:$0xff] }
 0x35f   :  { %3140 = vmatpush.msrb.mxu2 %v7062_v18  ;;  %3172 = vmatpush.msrb.mxu3 %v7067_v43  ;;  %v2287_v18 = vadd.f32 %v7213_v40, %v7211_v32 }
 0x360   :  { %2928 = vmatpush.msra.mxu0 %v6422_v12  ;;  %2960 = vmatpush.msra.mxu1 %v6415_v10  ;;  %v8079_v10 = vld [vmem:[#allocation17_spill] sm:$0xff]  ;;  %v8080_v12 = vld [vmem:[#allocation18_spill] sm:$0xff] }
 0x361   :  { %3141 = vmatpush.msrb.mxu2 %v7076_v51  ;;  %3173 = vmatpush.msrb.mxu3 %v7081_v27 }
 0x363   :  { %3985 = vmatmul.msk.f32.gmra.mxu0 %vm2334_vm3, %v7183_v39  ;;  %3991 = vmatmul.msk.f32.gmra.mxu1 %vm2334_vm3, %v7183_v39 }
 0x364   :  { %4064 = vmatmul.msk.f32.gmra.mxu2 %vm2334_vm3, %v6671_v28  ;;  %4070 = vmatmul.msk.f32.gmra.mxu3 %vm2334_vm3, %v6671_v28 }
 0x365   :  { %3142 = vmatpush.msrb.mxu2 %v7100_v35  ;;  %3174 = vmatpush.msrb.mxu3 %v7105_v26 }
 0x367   :  { %3143 = vmatpush.msrb.mxu2 %v7112_v8  ;;  %3175 = vmatpush.msrb.mxu3 %v7117_v0 }
 0x36b   :  { %4049 = vmatmul.msk.f32.vlgmr.msrb.gmra.mxu0 %vm2334_vm3, %v6624_v4  ;;  %4055 = vmatmul.msk.f32.vlgmr.msrb.gmra.mxu1 %vm2334_vm3, %v6624_v4 }
 0x36c   :  { %4065 = vmatmul.msk.f32.gmra.mxu2 %vm2334_vm3, %v7183_v39  ;;  %4071 = vmatmul.msk.f32.gmra.mxu3 %vm2334_vm3, %v7183_v39 }
 0x36d   :  { %4096 = vmatpush.msk.msrb.mxu0 %vm2350_vm2, %v6525_v62  ;;  %4102 = vmatpush.msk.msrb.mxu1 %vm2350_vm2, %v6539_v36  ;;  %v2137_v62 = vpop.f32.mrf.mxu0  ;;  %v8081_v36 = vld [vmem:[#allocation19_spill] sm:$0xff] }
 0x36f   :  { %3057 = vmatpush.msrb.mxu0 %v6553_v55  ;;  %3089 = vmatpush.msrb.mxu1 %v6566_v46  ;;  %v8082_v55 = vld [vmem:[#allocation10_spill] sm:$0xff]  ;;  %v7271_v46 = vadd.f32 %v2175_v63, %v2137_v62 }
 0x371   :  { %3058 = vmatpush.msrb.mxu0 %v6579_v33  ;;  %3090 = vmatpush.msrb.mxu1 %v6591_v29  ;;  %v7273_v33 = vpop.f32.mrf.mxu2  ;;  %v7275_v29 = vpop.f32.mrf.mxu3 }
 0x373   :  { %4050 = vmatmul.msk.f32.gmra.mxu0 %vm2334_vm3, %v6665_v34  ;;  %4056 = vmatmul.msk.f32.gmra.mxu1 %vm2334_vm3, %v6665_v34 }
 0x374   :  { %4085 = vmatmul.msk.f32.vlgmr.msra.gmra.mxu2 %vm2334_vm3, %v6901_v31  ;;  %4091 = vmatmul.msk.f32.vlgmr.msra.gmra.mxu3 %vm2334_vm3, %v6901_v31 }
 0x375   :  { %3059 = vmatpush.msrb.mxu0 %v6603_v22  ;;  %3091 = vmatpush.msrb.mxu1 %v8068_v61 }
 0x377   :  { %3060 = vmatpush.msrb.mxu0 %v8069_v58  ;;  %3092 = vmatpush.msrb.mxu1 %v8070_v49 }
 0x379   :  { %3061 = vmatpush.msrb.mxu0 %v8071_v6  ;;  %3093 = vmatpush.msrb.mxu1 %v8072_v16  ;;  %v7293_v22 = vpop.f32.mrf.mxu2  ;;  %v7295_v13 = vpop.f32.mrf.mxu3 }
 0x37b   :  { %4051 = vmatmul.msk.f32.gmra.mxu0 %vm2334_vm3, %v6671_v28  ;;  %4057 = vmatmul.msk.f32.gmra.mxu1 %vm2334_vm3, %v6671_v28 }
 0x37c   :  { %4086 = vmatmul.msk.f32.gmra.mxu2 %vm2334_vm3, %v6955_v56  ;;  %4092 = vmatmul.msk.f32.gmra.mxu3 %vm2334_vm3, %v6955_v56 }
 0x37d   :  { %3062 = vmatpush.msrb.mxu0 %v8073_v37  ;;  %3094 = vmatpush.msrb.mxu1 %v8074_v17 }
 0x37f   :  { %3063 = vmatpush.msrb.mxu0 %v8075_v21  ;;  %3095 = vmatpush.msrb.mxu1 %v8076_v3 }
 0x381   :  { %3064 = vmatpush.msrb.mxu0 %v8077_v59  ;;  %3096 = vmatpush.msrb.mxu1 %v8078_v38  ;;  %v7311_v7 = vpop.f32.mrf.mxu3 }
 0x383   :  { %4052 = vmatmul.msk.f32.gmra.mxu0 %vm2334_vm3, %v7183_v39  ;;  %4058 = vmatmul.msk.f32.gmra.mxu1 %vm2334_vm3, %v7183_v39 }
 0x384   :  { %4087 = vmatmul.msk.f32.gmra.mxu2 %vm2334_vm3, %v7005_v11  ;;  %4093 = vmatmul.msk.f32.gmra.mxu3 %vm2334_vm3, %v7005_v11 }
 0x385   :  { %3065 = vmatpush.msrb.mxu0 %v8079_v10  ;;  %3097 = vmatpush.msrb.mxu1 %v8080_v12 }
 0x387   :  { %3066 = vmatpush.msrb.mxu0 %v8081_v36  ;;  %3098 = vmatpush.msrb.mxu1 %v8082_v55 }
 0x38b   :  { %4053 = vmatmul.msk.f32.gmra.mxu0 %vm2334_vm3, %v7271_v46  ;;  %4059 = vmatmul.msk.f32.gmra.mxu1 %vm2334_vm3, %v7271_v46 }
 0x38c   :  { %4088 = vmatmul.msk.f32.gmra.mxu2 %vm2334_vm3, %v7045_v25  ;;  %4094 = vmatmul.msk.f32.gmra.mxu3 %vm2334_vm3, %v7045_v25 }
 0x393   :  { %4073 = vmatmul.msk.f32.vlgmr.msra.gmra.mxu0 %vm2334_vm3, %v6867_v2  ;;  %4079 = vmatmul.msk.f32.vlgmr.msra.gmra.mxu1 %vm2334_vm3, %v6867_v2  ;;  %v7309_v2 = vpop.f32.mrf.mxu2 }
 0x394   :  { %4089 = vmatmul.msk.f32.gmra.mxu2 %vm2334_vm3, %v7085_v57  ;;  %4095 = vmatmul.msk.f32.gmra.mxu3 %vm2334_vm3, %v7085_v57 }
 0x398   :  { %v7297_v45 = vpop.f32.mrf.mxu0  ;;  %v7299_v30 = vpop.f32.mrf.mxu1 }
 0x399   :  { %v2460_v62 = vadd.f32 %v7233_v19, %v7297_v45  ;;  %v2492_v63 = vadd.f32 %v7235_v9, %v7299_v30 }
 0x39b   :  { %4074 = vmatmul.msk.f32.gmra.mxu0 %vm2334_vm3, %v6901_v31  ;;  %4080 = vmatmul.msk.f32.gmra.mxu1 %vm2334_vm3, %v6901_v31 }
 0x39c   :  { %4109 = vmatmul.msk.f32.vlgmr.msrb.gmra.mxu2 %vm2334_vm3, %v6955_v56  ;;  %4115 = vmatmul.msk.f32.vlgmr.msrb.gmra.mxu3 %vm2334_vm3, %v6955_v56 }
 0x3a0   :  { %v7313_v52 = vpop.f32.mrf.mxu0  ;;  %v7315_v1 = vpop.f32.mrf.mxu1 }
 0x3a1   :  { %v2463_v19 = vadd.f32 %v7253_v42, %v7313_v52  ;;  %v2495_v9 = vadd.f32 %v7255_v50, %v7315_v1 }
 0x3a3   :  { %4075 = vmatmul.msk.f32.gmra.mxu0 %vm2334_vm3, %v6955_v56  ;;  %4081 = vmatmul.msk.f32.gmra.mxu1 %vm2334_vm3, %v6955_v56 }
 0x3a4   :  { %4110 = vmatmul.msk.f32.gmra.mxu2 %vm2334_vm3, %v7005_v11  ;;  %4116 = vmatmul.msk.f32.gmra.mxu3 %vm2334_vm3, %v7005_v11 }
 0x3a7   :  { %v7325_v31 = vpop.f32.mrf.mxu2  ;;  %v7327_v41 = vpop.f32.mrf.mxu3 }
 0x3a8   :  { %v2380_v54 = vpop.f32.mrf.mxu0  ;;  %v2412_v24 = vpop.f32.mrf.mxu1 }
 0x3a9   :  { %v2498_v26 = vadd.f32 %v7275_v29, %v2412_v24 }
 0x3ab   :  { %4076 = vmatmul.msk.f32.gmra.mxu0 %vm2334_vm3, %v7005_v11  ;;  %4082 = vmatmul.msk.f32.gmra.mxu1 %vm2334_vm3, %v7005_v11 }
 0x3ac   :  { %4111 = vmatmul.msk.f32.gmra.mxu2 %vm2334_vm3, %v7045_v25  ;;  %4117 = vmatmul.msk.f32.gmra.mxu3 %vm2334_vm3, %v7045_v25 }
 0x3af   :  { %v7337_v56 = vpop.f32.mrf.mxu2  ;;  %v7339_v53 = vpop.f32.mrf.mxu3 }
 0x3b0   :  { %v2383_v23 = vpop.f32.mrf.mxu0  ;;  %v2415_v14 = vpop.f32.mrf.mxu1 }
 0x3b1   :  { %v2469_v61 = vadd.f32 %v7293_v22, %v2383_v23  ;;  %v2501_v58 = vadd.f32 %v7295_v13, %v2415_v14 }
 0x3b3   :  { %4077 = vmatmul.msk.f32.gmra.mxu0 %vm2334_vm3, %v7045_v25  ;;  %4083 = vmatmul.msk.f32.gmra.mxu1 %vm2334_vm3, %v7045_v25 }
 0x3b4   :  { %4112 = vmatmul.msk.f32.gmra.mxu2 %vm2334_vm3, %v7085_v57  ;;  %4118 = vmatmul.msk.f32.gmra.mxu3 %vm2334_vm3, %v7085_v57 }
 0x3b7   :  { %v2667_v11 = vpop.f32.mrf.mxu2  ;;  %v2699_v44 = vpop.f32.mrf.mxu3 }
 0x3b8   :  { %v2386_v48 = vpop.f32.mrf.mxu0  ;;  %v2418_v15 = vpop.f32.mrf.mxu1 }
 0x3b9   :  { %v2472_v59 = vadd.f32 %v7309_v2, %v2386_v48  ;;  %v2504_v38 = vadd.f32 %v7311_v7, %v2418_v15 }
 0x3bb   :  { %4097 = vmatmul.msk.f32.vlgmr.msrb.gmra.mxu0 %vm2334_vm3, %v6624_v4  ;;  %4103 = vmatmul.msk.f32.vlgmr.msrb.gmra.mxu1 %vm2334_vm3, %v6624_v4  ;;  %v2466_v4 = vadd.f32 %v7273_v33, %v2380_v54 }
 0x3bc   :  { %4113 = vmatmul.msk.f32.gmra.mxu2 %vm2334_vm3, %v2287_v18  ;;  %4119 = vmatmul.msk.f32.gmra.mxu3 %vm2334_vm3, %v2287_v18 }
 0x3bf   :  { %v2670_v25 = vpop.f32.mrf.mxu2  ;;  %v2702_v43 = vpop.f32.mrf.mxu3 }
 0x3c0   :  { %v2555_v20 = vpop.f32.mrf.mxu0  ;;  %v2587_v5 = vpop.f32.mrf.mxu1 }
 0x3c1   :  { %v2602_v29 = vadd.f32 %v2555_v20, %v2460_v62  ;;  %v2603_v22 = vadd.f32 %v2587_v5, %v2492_v63 }
 0x3c3   :  { %4098 = vmatmul.msk.f32.gmra.mxu0 %vm2334_vm3, %v6665_v34  ;;  %4104 = vmatmul.msk.f32.gmra.mxu1 %vm2334_vm3, %v6665_v34  ;;  %v2708_v7 = vadd.f32 %v7325_v31, %v2602_v29  ;;  %v2709_v54 = vadd.f32 %v7327_v41, %v2603_v22 }
 0x3c7   :  { %v2673_v51 = vpop.f32.mrf.mxu2  ;;  %v2705_v27 = vpop.f32.mrf.mxu3 }
 0x3c8   :  { %v2558_v57 = vpop.f32.mrf.mxu0  ;;  %v2590_v35 = vpop.f32.mrf.mxu1 }
 0x3c9   :  { %v2604_v14 = vadd.f32 %v2558_v57, %v2463_v19  ;;  %v102_v19 = vld [vmem:[%s7854_s6 + $0x10] sm:$0xff] }
 0x3cb   :  { %4099 = vmatmul.msk.f32.gmra.mxu0 %vm2334_vm3, %v6671_v28  ;;  %4105 = vmatmul.msk.f32.gmra.mxu1 %vm2334_vm3, %v6671_v28  ;;  %v2710_v31 = vadd.f32 %v7337_v56, %v2604_v14 }
 0x3cf   :  { %v7367_v8 = vpop.f32.mrf.mxu2  ;;  %v7369_v0 = vpop.f32.mrf.mxu3 }
 0x3d0   :  { %v2561_v47 = vpop.f32.mrf.mxu0  ;;  %v2593_v34 = vpop.f32.mrf.mxu1 }
 0x3d1   :  { %v2606_v60 = vadd.f32 %v2561_v47, %v2466_v4  ;;  %v2607_v32 = vadd.f32 %v2593_v34, %v2498_v26  ;;  %v115_v4 = vld [vmem:[%s7854_s6 + $0x78] sm:$0xff]  ;;  %v114_v47 = vld [vmem:[%s7854_s6 + $0x70] sm:$0xff]  ;;  %v113_v34 = vld [vmem:[%s7854_s6 + $0x68] sm:$0xff] }
 0x3d2   :  { %v119_v26 = vld [vmem:[%s7854_s6 + $0x98] sm:$0xff]  ;;  %3247 = vmatpush.msra.mxu0 %v115_v4  ;;  %v78_v4 = vld [vmem:[%s7852_s4] sm:$0x3]  ;;  %s3577_s4 = sshll.u32 %s7861_s13, 4  ;;  %s3578_s4 = int_to_ptr.hbm [resolvable:$true] %s3577_s4 }
 0x3d3   :  { %4100 = vmatmul.msk.f32.gmra.mxu0 %vm2334_vm3, %v7183_v39  ;;  %4106 = vmatmul.msk.f32.gmra.mxu1 %vm2334_vm3, %v7183_v39  ;;  %v2712_v40 = vadd.f32 %v2667_v11, %v2606_v60  ;;  %v2713_v28 = vadd.f32 %v2699_v44, %v2607_v32  ;;  %v2605_v11 = vadd.f32 %v2590_v35, %v2495_v9  ;;  %v101_v9 = vld [vmem:[%s7854_s6 + $0x8] sm:$0xff] }
 0x3d4   :  { %3291 = vmatpush.msra.mxu1 %v119_v26  ;;  %3248 = vmatpush.msra.mxu0 %v114_v47 }
 0x3d5   :  { %v2711_v41 = vadd.f32 %v7339_v53, %v2605_v11 }
 0x3d6   :  { %3249 = vmatpush.msra.mxu0 %v113_v34  ;;  %v7524_v34 = vperm.slane %v78_v4, 0 }
 0x3d7   :  { %v7377_v49 = vpop.f32.mrf.mxu2  ;;  %v7379_v6 = vpop.f32.mrf.mxu3 }
 0x3d8   :  { %v2564_v16 = vpop.f32.mrf.mxu0  ;;  %v2596_v37 = vpop.f32.mrf.mxu1 }
 0x3d9   :  { %v2608_v17 = vadd.f32 %v2564_v16, %v2469_v61  ;;  %v2609_v21 = vadd.f32 %v2596_v37, %v2501_v58  ;;  %v112_v16 = vld [vmem:[%s7854_s6 + $0x60] sm:$0xff]  ;;  %v111_v37 = vld [vmem:[%s7854_s6 + $0x58] sm:$0xff] }
 0x3da   :  { %3250 = vmatpush.msra.mxu0 %v112_v16 }
 0x3db   :  { %4101 = vmatmul.msk.f32.gmra.mxu0 %vm2334_vm3, %v7271_v46  ;;  %4107 = vmatmul.msk.f32.gmra.mxu1 %vm2334_vm3, %v7271_v46  ;;  %v2714_v39 = vadd.f32 %v2670_v25, %v2608_v17  ;;  %v2715_v3 = vadd.f32 %v2702_v43, %v2609_v21  ;;  %v118_v17 = vld [vmem:[%s7854_s6 + $0x90] sm:$0xff] }
 0x3dc   :  { %3292 = vmatpush.msra.mxu1 %v118_v17  ;;  %v110_v21 = vld [vmem:[%s7854_s6 + $0x50] sm:$0xff]  ;;  %3251 = vmatpush.msra.mxu0 %v111_v37 }
 0x3de   :  { %3252 = vmatpush.msra.mxu0 %v110_v21 }
 0x3df   :  { %v7391_v36 = vpop.f32.mrf.mxu2  ;;  %v7393_v55 = vpop.f32.mrf.mxu3 }
 0x3e0   :  { %v2567_v10 = vpop.f32.mrf.mxu0  ;;  %v2599_v12 = vpop.f32.mrf.mxu1 }
 0x3e1   :  { %v2610_v33 = vadd.f32 %v2567_v10, %v2472_v59  ;;  %v2611_v46 = vadd.f32 %v2599_v12, %v2504_v38  ;;  %v108_v38 = vld [vmem:[%s7854_s6 + $0x40] sm:$0xff]  ;;  %v107_v10 = vld [vmem:[%s7854_s6 + $0x38] sm:$0xff]  ;;  %v117_v12 = vld [vmem:[%s7854_s6 + $0x88] sm:$0xff] }
 0x3e2   :  { %3293 = vmatpush.msra.mxu1 %v117_v12 }
 0x3e3   :  { %v2716_v13 = vadd.f32 %v2673_v51, %v2610_v33  ;;  %v2717_v2 = vadd.f32 %v2705_v27, %v2611_v46  ;;  %v106_v33 = vld [vmem:[%s7854_s6 + $0x30] sm:$0xff] }
 0x3e7   :  { %v7405_v44 = vpop.f32.mrf.mxu2  ;;  %v7407_v48 = vpop.f32.mrf.mxu3 }
 0x3e8   :  { %v2767_v24 = vpop.f32.mrf.mxu0  ;;  %v2799_v23 = vpop.f32.mrf.mxu1 }
 0x3e9   :  { %v7401_v45 = vadd.f32 %v2767_v24, %v2708_v7  ;;  %v7403_v30 = vadd.f32 %v2799_v23, %v2709_v54  ;;  %v104_v7 = vld [vmem:[%s7854_s6 + $0x20] sm:$0xff]  ;;  %v103_v23 = vld [vmem:[%s7854_s6 + $0x18] sm:$0xff] }
 0x3eb   :  { %v2829_v21 = vadd.f32 %v7524_v34, %v7401_v45 }
 0x3ed   :  { %4286 = vtanh.f32 %v2829_v21 }
 0x3ef   :  { %v7415_v50 = vpop.f32.mrf.mxu2  ;;  %v7417_v1 = vpop.f32.mrf.mxu3 }
 0x3f0   :  { %v2770_v15 = vpop.f32.mrf.mxu0  ;;  %v2802_v18 = vpop.f32.mrf.mxu1 }
 0x3f1   :  { %v7411_v42 = vadd.f32 %v2770_v15, %v2710_v31  ;;  %v7413_v52 = vadd.f32 %v2802_v18, %v2711_v41  ;;  %v116_v31 = vld [vmem:[%s7854_s6 + $0x80] sm:$0xff] }
 0x3f2   :  { %v100_v41 = vld [vmem:[%s7854_s6] sm:$0xff]  ;;  %3294 = vmatpush.msra.mxu1 %v116_v31 }
 0x3f7   :  { %v7423_v51 = vpop.f32.mrf.mxu2  ;;  %v7425_v56 = vpop.f32.mrf.mxu3 }
 0x3f8   :  { %v2773_v25 = vpop.f32.mrf.mxu0  ;;  %v2805_v43 = vpop.f32.mrf.mxu1 }
 0x3f9   :  { %v7419_v20 = vadd.f32 %v2773_v25, %v2712_v40  ;;  %v7421_v5 = vadd.f32 %v2805_v43, %v2713_v28 }
 0x3ff   :  { %v7443_v40 = vpop.f32.mrf.mxu2  ;;  %v7445_v28 = vpop.f32.mrf.mxu3 }
 0x400   :  { %v2776_v53 = vpop.f32.mrf.mxu0  ;;  %v2808_v27 = vpop.f32.mrf.mxu1 }
 0x401   :  { %v7427_v57 = vadd.f32 %v2776_v53, %v2714_v39  ;;  %v7429_v35 = vadd.f32 %v2808_v27, %v2715_v3  ;;  %v109_v39 = vld [vmem:[%s7854_s6 + $0x48] sm:$0xff] }
 0x402   :  { %3253 = vmatpush.msra.mxu0 %v109_v39 }
 0x404   :  { %3254 = vmatpush.msra.mxu0 %v108_v38 }
 0x406   :  { %3255 = vmatpush.msra.mxu0 %v107_v10 }
 0x407   :  { %v7475_v62 = vpop.f32.mrf.mxu2  ;;  %v7477_v63 = vpop.f32.mrf.mxu3 }
 0x408   :  { %v2779_v60 = vpop.f32.mrf.mxu0  ;;  %v2811_v32 = vpop.f32.mrf.mxu1  ;;  %3256 = vmatpush.msra.mxu0 %v106_v33 }
 0x409   :  { %v7447_v61 = vadd.f32 %v2779_v60, %v2716_v13  ;;  %v7449_v58 = vadd.f32 %v2811_v32, %v2717_v2  ;;  %v105_v2 = vld [vmem:[%s7854_s6 + $0x28] sm:$0xff]  ;;  %v7526_v60 = vperm.slane %v78_v4, 1 }
 0x40a   :  { %3257 = vmatpush.msra.mxu0 %v105_v2 }
 0x40c   :  { %3258 = vmatpush.msra.mxu0 %v104_v7  ;;  %v2832_v7 = vadd.f32 %v7526_v60, %v7413_v52 }
 0x40e   :  { %3259 = vmatpush.msra.mxu0 %v103_v23  ;;  %v4287_v23 = vpop.eup %4286 }
 0x40f   :  { %v7482_v22 = vpop.f32.mrf.mxu2  ;;  %v7484_v13 = vpop.f32.mrf.mxu3 }
 0x410   :  { %v2930_v3 = vpop.f32.mrf.mxu0  ;;  %v2962_v59 = vpop.f32.mrf.mxu1  ;;  %3260 = vmatpush.msra.mxu0 %v102_v19 }
 0x411   :  { %v2931_v26 = vadd.f32 %v2930_v3, %v7367_v8  ;;  %v2963_v47 = vadd.f32 %v2962_v59, %v7369_v0  ;;  %v2830_v8 = vadd.f32 %v7526_v60, %v7403_v30 }
 0x412   :  { %3261 = vmatpush.msra.mxu0 %v101_v9 }
 0x413   :  { %v3041_v32 = vadd.f32 %v7423_v51, %v2931_v26  ;;  %v3042_v16 = vadd.f32 %v7425_v56, %v2963_v47  ;;  %4288 = vtanh.f32 %v2830_v8 }
 0x414   :  { %3262 = vmatpush.msra.mxu0 %v100_v41 }
 0x417   :  { %v7501_v14 = vpop.f32.mrf.mxu2  ;;  %v7503_v11 = vpop.f32.mrf.mxu3 }
 0x418   :  { %v2933_v46 = vpop.f32.mrf.mxu0  ;;  %v2965_v29 = vpop.f32.mrf.mxu1 }
 0x419   :  { %v2934_v0 = vadd.f32 %v2933_v46, %v7377_v49  ;;  %v2966_v3 = vadd.f32 %v2965_v29, %v7379_v6  ;;  %v2831_v6 = vadd.f32 %v7524_v34, %v7411_v42  ;;  %v4289_v41 = vpop.eup %4288 }
 0x41b   :  { %v3043_v45 = vadd.f32 %v7443_v40, %v2934_v0  ;;  %v3044_v2 = vadd.f32 %v7445_v28, %v2966_v3  ;;  %v4132_v0 = vld [vmem:[%s7855_s7 + $0x88] sm:$0xff] }
 0x41c   :  { %v4146_v3 = vld [vmem:[%s7855_s7 + $0xe8] sm:$0xff] }
 0x41d   :  { %3399 = vmatpush.msra.mxu2 %v4146_v3 }
 0x41f   :  { %v3145_v53 = vpop.f32.mrf.mxu2  ;;  %v3177_v27 = vpop.f32.mrf.mxu3 }
 0x420   :  { %v2936_v54 = vpop.f32.mrf.mxu0  ;;  %v2968_v24 = vpop.f32.mrf.mxu1 }
 0x421   :  { %v2937_v19 = vadd.f32 %v2936_v54, %v7391_v36  ;;  %v2969_v9 = vadd.f32 %v2968_v24, %v7393_v55 }
 0x423   :  { %v3045_v36 = vadd.f32 %v7475_v62, %v2937_v19  ;;  %v3046_v55 = vadd.f32 %v7477_v63, %v2969_v9  ;;  %v4133_v62 = vld [vmem:[%s7855_s7 + $0x90] sm:$0xff]  ;;  %v2834_v63 = vadd.f32 %v7526_v60, %v7421_v5 }
 0x427   :  { %v3148_v59 = vpop.f32.mrf.mxu2  ;;  %v3180_v10 = vpop.f32.mrf.mxu3 }
 0x428   :  { %v7511_v15 = vpop.f32.mrf.mxu0  ;;  %v7513_v18 = vpop.f32.mrf.mxu1 }
 0x430   :  { %v7515_v25 = vpop.f32.mrf.mxu0  ;;  %v7517_v43 = vpop.f32.mrf.mxu1 }
 0x438   :  { %v3068_v37 = vpop.f32.mrf.mxu0  ;;  %v3100_v17 = vpop.f32.mrf.mxu1 }
 0x439   :  { %v3115_v39 = vadd.f32 %v3068_v37, %v3041_v32  ;;  %v3116_v38 = vadd.f32 %v3100_v17, %v3042_v16  ;;  %v2833_v32 = vadd.f32 %v7524_v34, %v7419_v20  ;;  %v4134_v17 = vld [vmem:[%s7855_s7 + $0x98] sm:$0xff]  ;;  %v2940_v20 = vadd.f32 %v7511_v15, %v7405_v44 }
 0x43a   :  { %3342 = vmatpush.msra.mxu3 %v4134_v17 }
 0x43b   :  { %v3192_v12 = vadd.f32 %v3145_v53, %v3115_v39  ;;  %v3193_v51 = vadd.f32 %v3177_v27, %v3116_v38  ;;  %v3151_v53 = vpop.f32.mrf.mxu2  ;;  %v3183_v27 = vpop.f32.mrf.mxu3  ;;  %v2972_v39 = vadd.f32 %v7513_v18, %v7407_v48  ;;  %v4131_v48 = vld [vmem:[%s7855_s7 + $0x80] sm:$0xff] }
 0x43c   :  { %3343 = vmatpush.msra.mxu3 %v4133_v62  ;;  %v4145_v18 = vld [vmem:[%s7855_s7 + $0xe0] sm:$0xff] }
 0x43d   :  { %v3202_v56 = vadd.f32 %v3192_v12, %v7524_v34  ;;  %v3203_v33 = vadd.f32 %v3193_v51, %v7526_v60  ;;  %3400 = vmatpush.msra.mxu2 %v4145_v18  ;;  %v4144_v51 = vld [vmem:[%s7855_s7 + $0xd8] sm:$0xff]  ;;  %v3316_v18 = vld [vmem:[%s7855_s7 + $0x28] sm:$0xff] }
 0x43e   :  { %3344 = vmatpush.msra.mxu3 %v4132_v0  ;;  %v3318_v0 = vld [vmem:[%s7855_s7 + $0x38] sm:$0xff] }
 0x43f   :  { %4290 = vtanh.f32 %v3202_v56  ;;  %v4168_v56 = vld [vmem:[%s7855_s7 + $0x188] sm:$0xff]  ;;  %3401 = vmatpush.msra.mxu2 %v4144_v51  ;;  %v4167_v51 = vld [vmem:[%s7855_s7 + $0x180] sm:$0xff] }
 0x440   :  { %4292 = vtanh.f32 %v3203_v33  ;;  %v3071_v30 = vpop.f32.mrf.mxu0  ;;  %v3103_v49 = vpop.f32.mrf.mxu1  ;;  %3469 = vmatpush.msrb.mxu0 %v4168_v56  ;;  %3345 = vmatpush.msra.mxu3 %v4131_v48  ;;  %v3314_v56 = vld [vmem:[%s7855_s7 + $0x18] sm:$0xff] }
 0x441   :  { %v3117_v46 = vadd.f32 %v3071_v30, %v3043_v45  ;;  %v3118_v29 = vadd.f32 %v3103_v49, %v3044_v2  ;;  %4294 = vtanh.f32 %v2831_v6  ;;  %v3047_v2 = vadd.f32 %v7482_v22, %v2940_v20  ;;  %v4130_v6 = vld [vmem:[%s7855_s7 + $0x78] sm:$0xff]  ;;  %v4129_v22 = vld [vmem:[%s7855_s7 + $0x70] sm:$0xff] }
 0x442   :  { %4296 = vtanh.f32 %v2832_v7  ;;  %v3048_v30 = vadd.f32 %v7484_v13, %v2972_v39  ;;  %v2835_v7 = vadd.f32 %v7524_v34, %v7427_v57  ;;  %v2836_v13 = vadd.f32 %v7526_v60, %v7429_v35  ;;  %3346 = vmatpush.msra.mxu3 %v4130_v6  ;;  %3470 = vmatpush.msrb.mxu0 %v4167_v51  ;;  %v3311_v6 = vld [vmem:[%s7855_s7] sm:$0xff]  ;;  %v3540_v51 = vld [vmem:[%s7859_s11 + $0x58] sm:$0xff] }
 0x443   :  { %v3194_v31 = vadd.f32 %v3148_v59, %v3117_v46  ;;  %v3195_v40 = vadd.f32 %v3180_v10, %v3118_v29  ;;  %v3154_v33 = vpop.f32.mrf.mxu2  ;;  %v3186_v45 = vpop.f32.mrf.mxu3  ;;  %v2975_v57 = vadd.f32 %v7517_v43, %v7417_v1 }
 0x444   :  { %3347 = vmatpush.msra.mxu3 %v4129_v22  ;;  %v4137_v22 = vld [vmem:[%s7855_s7 + $0xa0] sm:$0xff] }
 0x445   :  { %v4291_v28 = vpop.eup %4290  ;;  %v3204_v4 = vadd.f32 %v3194_v31, %v7524_v34  ;;  %v3205_v42 = vadd.f32 %v3195_v40, %v7526_v60  ;;  %v2943_v31 = vadd.f32 %v7515_v25, %v7415_v50  ;;  %v4127_v50 = vld [vmem:[%s7855_s7 + $0x60] sm:$0xff] }
 0x446   :  { %v4293_v26 = vpop.eup %4292  ;;  %v3222_v47 = vadd.f32 %v4291_v28, %v4287_v23  ;;  %v4128_v28 = vld [vmem:[%s7855_s7 + $0x68] sm:$0xff] }
 0x447   :  { %v3223_v52 = vadd.f32 %v4293_v26, %v4289_v41  ;;  %4298 = vtanh.f32 %v3204_v4  ;;  %v4295_v21 = vpop.eup %4294  ;;  %3348 = vmatpush.msra.mxu3 %v4128_v28  ;;  %v3049_v43 = vadd.f32 %v7501_v14, %v2943_v31  ;;  %v4125_v14 = vld [vmem:[%s7855_s7 + $0x50] sm:$0xff]  ;;  %v4159_v28 = vld [vmem:[%s7855_s7 + $0x140] sm:$0xff] }
 0x448   :  { %4300 = vtanh.f32 %v3205_v42  ;;  %v3074_v54 = vpop.f32.mrf.mxu0  ;;  %v3106_v24 = vpop.f32.mrf.mxu1  ;;  %3263 = vmatmul.f32.vlgmr.msra.gmra.mxu0 %v3222_v47  ;;  %v3050_v42 = vadd.f32 %v7503_v11, %v2975_v57  ;;  %v4126_v47 = vld [vmem:[%s7855_s7 + $0x58] sm:$0xff]  ;;  %v2838_v11 = vadd.f32 %v7526_v60, %v7449_v58  ;;  %v4161_v31 = vld [vmem:[%s7855_s7 + $0x150] sm:$0xff] }
 0x449   :  { %v3119_v16 = vadd.f32 %v3074_v54, %v3045_v36  ;;  %v3120_v37 = vadd.f32 %v3106_v24, %v3046_v55  ;;  %4120 = vmatmul.msk.f32.vlgmr.msra.gmra.mxu1 %vm137_vm0, %v3223_v52  ;;  %v4297_v59 = vpop.eup %4296  ;;  %4302 = vtanh.f32 %v2833_v32  ;;  %3349 = vmatpush.msra.mxu3 %v4127_v50  ;;  %v2837_v55 = vadd.f32 %v7524_v34, %v7447_v61  ;;  %v3501_v50 = vld [vmem:[%s7857_s9 + $0x60] sm:$0xff] }
 0x44a   :  { %4304 = vtanh.f32 %v2834_v63 }
 0x44b   :  { %v3196_v38 = vadd.f32 %v3151_v53, %v3119_v16  ;;  %v3197_v8 = vadd.f32 %v3183_v27, %v3120_v37  ;;  %v3157_v32 = vpop.f32.mrf.mxu2  ;;  %v3189_v16 = vpop.f32.mrf.mxu3  ;;  %3350 = vmatpush.msra.mxu3 %v4126_v47  ;;  %v3320_v37 = vld [vmem:[%s7855_s7 + $0x48] sm:$0xff]  ;;  %v3499_v47 = vld [vmem:[%s7857_s9 + $0x50] sm:$0xff] }
 0x44d   :  { %v4299_v5 = vpop.eup %4298  ;;  %v3206_v44 = vadd.f32 %v3196_v38, %v7524_v34  ;;  %v3207_v15 = vadd.f32 %v3197_v8, %v7526_v60  ;;  %3351 = vmatpush.msra.mxu3 %v4125_v14 }
 0x44e   :  { %v4301_v10 = vpop.eup %4300  ;;  %v3224_v12 = vadd.f32 %v4299_v5, %v4295_v21  ;;  %v3319_v21 = vld [vmem:[%s7855_s7 + $0x40] sm:$0xff] }
 0x44f   :  { %4306 = vtanh.f32 %v3206_v44  ;;  %v3225_v49 = vadd.f32 %v4301_v10, %v4297_v59  ;;  %v4303_v9 = vpop.eup %4302  ;;  %3365 = vmatpush.msrb.mxu3 %v3320_v37  ;;  %v3317_v59 = vld [vmem:[%s7855_s7 + $0x30] sm:$0xff] }
 0x450   :  { %4308 = vtanh.f32 %v3207_v15  ;;  %v3077_v46 = vpop.f32.mrf.mxu0  ;;  %v3109_v29 = vpop.f32.mrf.mxu1  ;;  %3266 = vmatmul.f32.gmra.mxu0 %v3224_v12  ;;  %v4143_v10 = vld [vmem:[%s7855_s7 + $0xd0] sm:$0xff]  ;;  %v3315_v12 = vld [vmem:[%s7855_s7 + $0x20] sm:$0xff] }
 0x451   :  { %v3121_v23 = vadd.f32 %v3077_v46, %v3047_v2  ;;  %v3122_v19 = vadd.f32 %v3109_v29, %v3048_v30  ;;  %4121 = vmatmul.msk.f32.gmra.mxu1 %vm137_vm0, %v3225_v49  ;;  %v4305_v53 = vpop.eup %4304  ;;  %4310 = vtanh.f32 %v2835_v7  ;;  %3366 = vmatpush.msrb.mxu3 %v3319_v21  ;;  %v4166_v2 = vld [vmem:[%s7855_s7 + $0x178] sm:$0xff]  ;;  %v3312_v30 = vld [vmem:[%s7855_s7 + $0x8] sm:$0xff]  ;;  %v4141_v49 = vld [vmem:[%s7855_s7 + $0xc0] sm:$0xff] }
 0x452   :  { %4312 = vtanh.f32 %v2836_v13  ;;  %3402 = vmatpush.msra.mxu2 %v4143_v10  ;;  %3471 = vmatpush.msrb.mxu0 %v4166_v2  ;;  %v4165_v46 = vld [vmem:[%s7855_s7 + $0x170] sm:$0xff]  ;;  %v4140_v29 = vld [vmem:[%s7855_s7 + $0xb8] sm:$0xff]  ;;  %v4163_v13 = vld [vmem:[%s7855_s7 + $0x160] sm:$0xff] }
 0x453   :  { %v3198_v40 = vadd.f32 %v3154_v33, %v3121_v23  ;;  %v3199_v41 = vadd.f32 %v3186_v45, %v3122_v19  ;;  %3367 = vmatpush.msrb.mxu3 %v3318_v0  ;;  %v4142_v33 = vld [vmem:[%s7855_s7 + $0xc8] sm:$0xff]  ;;  %v3313_v45 = vld [vmem:[%s7855_s7 + $0x10] sm:$0xff]  ;;  %v3496_v0 = vld [vmem:[%s7857_s9 + $0x38] sm:$0xff] }
 0x454   :  { %3403 = vmatpush.msra.mxu2 %v4142_v33  ;;  %3472 = vmatpush.msrb.mxu0 %v4165_v46  ;;  %v4139_v7 = vld [vmem:[%s7855_s7 + $0xb0] sm:$0xff]  ;;  %v4164_v23 = vld [vmem:[%s7855_s7 + $0x168] sm:$0xff]  ;;  %v3537_v2 = vld [vmem:[%s7859_s11 + $0x40] sm:$0xff] }
 0x455   :  { %v4307_v27 = vpop.eup %4306  ;;  %v3208_v35 = vadd.f32 %v3198_v40, %v7524_v34  ;;  %v3209_v4 = vadd.f32 %v3199_v41, %v7526_v60  ;;  %3368 = vmatpush.msrb.mxu3 %v3317_v59  ;;  %v4138_v19 = vld [vmem:[%s7855_s7 + $0xa8] sm:$0xff]  ;;  %v3539_v33 = vld [vmem:[%s7859_s11 + $0x50] sm:$0xff] }
 0x456   :  { %v4309_v25 = vpop.eup %4308  ;;  %v3226_v1 = vadd.f32 %v4307_v27, %v4303_v9  ;;  %3404 = vmatpush.msra.mxu2 %v4141_v49  ;;  %3473 = vmatpush.msrb.mxu0 %v4164_v23  ;;  %v4162_v9 = vld [vmem:[%s7855_s7 + $0x158] sm:$0xff]  ;;  %v4160_v40 = vld [vmem:[%s7855_s7 + $0x148] sm:$0xff]  ;;  %v3503_v27 = vld [vmem:[%s7857_s9 + $0x70] sm:$0xff] }
 0x457   :  { %4314 = vtanh.f32 %v3208_v35  ;;  %v3227_v26 = vadd.f32 %v4309_v25, %v4305_v53  ;;  %v4311_v17 = vpop.eup %4310  ;;  %3369 = vmatpush.msrb.mxu3 %v3316_v18  ;;  %v3504_v53 = vld [vmem:[%s7857_s9 + $0x78] sm:$0xff]  ;;  %v3502_v35 = vld [vmem:[%s7857_s9 + $0x68] sm:$0xff]  ;;  %v3543_v18 = vld [vmem:[%s7859_s11 + $0x70] sm:$0xff] }
 0x458   :  { %4316 = vtanh.f32 %v3209_v4  ;;  %v3080_v52 = vpop.f32.mrf.mxu0  ;;  %v3112_v36 = vpop.f32.mrf.mxu1  ;;  %3269 = vmatmul.f32.gmra.mxu0 %v3226_v1  ;;  %3405 = vmatpush.msra.mxu2 %v4140_v29  ;;  %v3494_v59 = vld [vmem:[%s7857_s9 + $0x28] sm:$0xff]  ;;  %v3535_v49 = vld [vmem:[%s7859_s11 + $0x30] sm:$0xff]  ;;  %v3532_v23 = vld [vmem:[%s7859_s11 + $0x18] sm:$0xff] }
 0x459   :  { %v3123_v54 = vadd.f32 %v3080_v52, %v3049_v43  ;;  %v3124_v24 = vadd.f32 %v3112_v36, %v3050_v42  ;;  %4122 = vmatmul.msk.f32.gmra.mxu1 %vm137_vm0, %v3227_v26  ;;  %v4313_v63 = vpop.eup %4312  ;;  %4318 = vtanh.f32 %v2837_v55  ;;  %3370 = vmatpush.msrb.mxu3 %v3315_v12  ;;  %v4157_v43 = vld [vmem:[%s7855_s7 + $0x138] sm:$0xff]  ;;  %v4156_v26 = vld [vmem:[%s7855_s7 + $0x130] sm:$0xff]  ;;  %v4155_v52 = vld [vmem:[%s7855_s7 + $0x128] sm:$0xff] }
 0x45a   :  { %4320 = vtanh.f32 %v2838_v11  ;;  %3406 = vmatpush.msra.mxu2 %v4139_v7  ;;  %3474 = vmatpush.msrb.mxu0 %v4163_v13  ;;  %v3500_v42 = vld [vmem:[%s7857_s9 + $0x58] sm:$0xff]  ;;  %v4154_v55 = vld [vmem:[%s7855_s7 + $0x120] sm:$0xff]  ;;  %v3542_v10 = vld [vmem:[%s7859_s11 + $0x68] sm:$0xff] }
 0x45b   :  { %v3200_v61 = vadd.f32 %v3157_v32, %v3123_v54  ;;  %v3201_v62 = vadd.f32 %v3189_v16, %v3124_v24  ;;  %3371 = vmatpush.msrb.mxu3 %v3314_v56  ;;  %3509 = vmatpush.msrb.mxu1 %v3504_v53  ;;  %v4153_v11 = vld [vmem:[%s7855_s7 + $0x118] sm:$0xff]  ;;  %v4152_v32 = vld [vmem:[%s7855_s7 + $0x110] sm:$0xff]  ;;  %v4151_v16 = vld [vmem:[%s7855_s7 + $0x108] sm:$0xff] }
 0x45c   :  { %3407 = vmatpush.msra.mxu2 %v4138_v19  ;;  %3475 = vmatpush.msrb.mxu0 %v4162_v9  ;;  %v3541_v12 = vld [vmem:[%s7859_s11 + $0x60] sm:$0xff]  ;;  %v3534_v46 = vld [vmem:[%s7859_s11 + $0x28] sm:$0xff]  ;;  %v3531_v13 = vld [vmem:[%s7859_s11 + $0x10] sm:$0xff] }
 0x45d   :  { %v4315_v20 = vpop.eup %4314  ;;  %v3210_v58 = vadd.f32 %v3200_v61, %v7524_v34  ;;  %v3211_v39 = vadd.f32 %v3201_v62, %v7526_v60  ;;  %3372 = vmatpush.msrb.mxu3 %v3313_v45  ;;  %3510 = vmatpush.msrb.mxu1 %v3503_v27  ;;  %v4149_v62 = vld [vmem:[%s7855_s7 + $0xf8] sm:$0xff]  ;;  %v3538_v45 = vld [vmem:[%s7859_s11 + $0x48] sm:$0xff]  ;;  %v3533_v7 = vld [vmem:[%s7859_s11 + $0x20] sm:$0xff] }
 0x45e   :  { %v4317_v38 = vpop.eup %4316  ;;  %v3228_v8 = vadd.f32 %v4315_v20, %v4311_v17  ;;  %3408 = vmatpush.msra.mxu2 %v4137_v22  ;;  %3476 = vmatpush.msrb.mxu0 %v4161_v31  ;;  %v4150_v17 = vld [vmem:[%s7855_s7 + $0x100] sm:$0xff]  ;;  %v3530_v53 = vld [vmem:[%s7859_s11 + $0x8] sm:$0xff] }
 0x45f   :  { %4322 = vtanh.f32 %v3210_v58  ;;  %v3229_v3 = vadd.f32 %v4317_v38, %v4313_v63  ;;  %v4319_v34 = vpop.eup %4318  ;;  %3373 = vmatpush.msrb.mxu3 %v3312_v30  ;;  %3511 = vmatpush.msrb.mxu1 %v3502_v35  ;;  %v4148_v63 = vld [vmem:[%s7855_s7 + $0xf0] sm:$0xff]  ;;  %v3498_v38 = vld [vmem:[%s7857_s9 + $0x48] sm:$0xff]  ;;  %v3536_v30 = vld [vmem:[%s7859_s11 + $0x38] sm:$0xff] }
 0x460   :  { %4324 = vtanh.f32 %v3211_v39  ;;  %3272 = vmatmul.f32.gmra.mxu0 %v3228_v8  ;;  %v4321_v60 = vpop.eup %4320  ;;  %v3497_v8 = vld [vmem:[%s7857_s9 + $0x40] sm:$0xff] }
 0x461   :  { %4123 = vmatmul.msk.f32.gmra.mxu1 %vm137_vm0, %v3229_v3  ;;  %3374 = vmatpush.msrb.mxu3 %v3311_v6  ;;  %v3495_v3 = vld [vmem:[%s7857_s9 + $0x30] sm:$0xff]  ;;  %v3529_v27 = vld [vmem:[%s7859_s11] sm:$0xff] }
 0x462   :  { %3477 = vmatpush.msrb.mxu0 %v4160_v40  ;;  %3512 = vmatpush.msrb.mxu1 %v3501_v50  ;;  %v4172_v35 = vld [vmem:[%s7858_s10] ss:$0 sm:$0xff] }
 0x464   :  { %3478 = vmatpush.msrb.mxu0 %v4159_v28  ;;  %3513 = vmatpush.msrb.mxu1 %v3500_v42 }
 0x465   :  { %v4323_v5 = vpop.eup %4322 }
 0x466   :  { %v4325_v44 = vpop.eup %4324  ;;  %v3230_v15 = vadd.f32 %v4323_v5, %v4319_v34  ;;  %3514 = vmatpush.msrb.mxu1 %v3499_v47  ;;  %v3493_v34 = vld [vmem:[%s7857_s9 + $0x20] sm:$0xff]  ;;  %v3491_v5 = vld [vmem:[%s7857_s9 + $0x10] sm:$0xff] }
 0x467   :  { %v3231_v48 = vadd.f32 %v4325_v44, %v4321_v60  ;;  %v3492_v60 = vld [vmem:[%s7857_s9 + $0x18] sm:$0xff]  ;;  %v3490_v44 = vld [vmem:[%s7857_s9 + $0x8] sm:$0xff] }
 0x468   :  { %3275 = vmatmul.f32.gmra.mxu0 %v3230_v15  ;;  %3515 = vmatpush.msrb.mxu1 %v3498_v38  ;;  %v3489_v15 = vld [vmem:[%s7857_s9] sm:$0xff] }
 0x469   :  { %4124 = vmatmul.msk.f32.gmra.mxu1 %vm137_vm0, %v3231_v48  ;;  %v3544_v48 = vld [vmem:[%s7859_s11 + $0x78] sm:$0xff] }
 0x46a   :  { %3516 = vmatpush.msrb.mxu1 %v3497_v8  ;;  %3549 = vmatpush.msrb.mxu2 %v3544_v48 }
 0x46c   :  { %3517 = vmatpush.msrb.mxu1 %v3496_v0  ;;  %3550 = vmatpush.msrb.mxu2 %v3543_v18 }
 0x46e   :  { %3518 = vmatpush.msrb.mxu1 %v3495_v3  ;;  %3551 = vmatpush.msrb.mxu2 %v3542_v10 }
 0x470   :  { %3519 = vmatpush.msrb.mxu1 %v3494_v59  ;;  %3552 = vmatpush.msrb.mxu2 %v3541_v12 }
 0x472   :  { %3520 = vmatpush.msrb.mxu1 %v3493_v34  ;;  %3553 = vmatpush.msrb.mxu2 %v3540_v51 }
 0x474   :  { %3521 = vmatpush.msrb.mxu1 %v3492_v60  ;;  %3554 = vmatpush.msrb.mxu2 %v3539_v33 }
 0x476   :  { %3522 = vmatpush.msrb.mxu1 %v3491_v5  ;;  %3555 = vmatpush.msrb.mxu2 %v3538_v45 }
 0x478   :  { %3523 = vmatpush.msrb.mxu1 %v3490_v44  ;;  %3556 = vmatpush.msrb.mxu2 %v3537_v2 }
 0x47a   :  { %3524 = vmatpush.msrb.mxu1 %v3489_v15  ;;  %3557 = vmatpush.msrb.mxu2 %v3536_v30 }
 0x47c   :  { %3558 = vmatpush.msrb.mxu2 %v3535_v49 }
 0x47e   :  { %3559 = vmatpush.msrb.mxu2 %v3534_v46 }
 0x480   :  { %3560 = vmatpush.msrb.mxu2 %v3533_v7 }
 0x482   :  { %3561 = vmatpush.msrb.mxu2 %v3532_v23 }
 0x484   :  { %3562 = vmatpush.msrb.mxu2 %v3531_v13 }
 0x486   :  { %3563 = vmatpush.msrb.mxu2 %v3530_v53 }
 0x488   :  { %3564 = vmatpush.msrb.mxu2 %v3529_v27 }
 0x4c5   :  { %v3264_v57 = vpop.f32.mrf.mxu0 }
 0x4c6   :  { %v3296_v41 = vpop.f32.mrf.mxu1 }
 0x4c7   :  { %v3297_v24 = vadd.f32 %v3296_v41, %v3264_v57  ;;  %v4171_v57 = vld [vmem:[%s7856_s8] ss:$0 sm:$0xff] }
 0x4cd   :  { %v3267_v4 = vpop.f32.mrf.mxu0 }
 0x4ce   :  { %v3299_v25 = vpop.f32.mrf.mxu1 }
 0x4cf   :  { %v3300_v1 = vadd.f32 %v3299_v25, %v3267_v4  ;;  %v4173_v25 = vld [vmem:[%s7860_s12] ss:$0 sm:$0xff] }
 0x4d1   :  { %4135 = vmatmul.msk.f32.vlgmr.msra.gmra.mxu3 %vm3332_vm4, %v3300_v1 }
 0x4d2   :  { %3434 = vmatpush.msra.mxu3 %v4157_v43 }
 0x4d4   :  { %3435 = vmatpush.msra.mxu3 %v4156_v26 }
 0x4d5   :  { %v3270_v36 = vpop.f32.mrf.mxu0 }
 0x4d6   :  { %3436 = vmatpush.msra.mxu3 %v4155_v52  ;;  %v3302_v54 = vpop.f32.mrf.mxu1 }
 0x4d7   :  { %v3303_v14 = vadd.f32 %v3302_v54, %v3270_v36 }
 0x4d8   :  { %3437 = vmatpush.msra.mxu3 %v4154_v55 }
 0x4d9   :  { %4136 = vmatmul.msk.f32.vlgmr.msrb.gmra.mxu3 %vm3332_vm4, %v3297_v24  ;;  %4147 = vmatmul.msk.f32.vlgmr.msra.gmra.mxu2 %vm3332_vm4, %v3303_v14 }
 0x4da   :  { %3438 = vmatpush.msra.mxu3 %v4153_v11 }
 0x4dc   :  { %3439 = vmatpush.msra.mxu3 %v4152_v32 }
 0x4dd   :  { %v3273_v37 = vpop.f32.mrf.mxu0 }
 0x4de   :  { %3440 = vmatpush.msra.mxu3 %v4151_v16  ;;  %v3305_v61 = vpop.f32.mrf.mxu1 }
 0x4df   :  { %v3306_v21 = vadd.f32 %v3305_v61, %v3273_v37 }
 0x4e0   :  { %3441 = vmatpush.msra.mxu3 %v4150_v17 }
 0x4e2   :  { %3442 = vmatpush.msra.mxu3 %v4149_v62 }
 0x4e4   :  { %3443 = vmatpush.msra.mxu3 %v4148_v63 }
 0x4e5   :  { %4158 = vmatmul.msk.f32.vlgmr.msra.gmra.mxu3 %vm3332_vm4, %v3306_v21  ;;  %v3276_v20 = vpop.f32.mrf.mxu0 }
 0x4e6   :  { %v3308_v58 = vpop.f32.mrf.mxu1 }
 0x4e7   :  { %v3309_v39 = vadd.f32 %v3308_v58, %v3276_v20 }
 0x4e9   :  { %4169 = vmatmul.msk.f32.vlgmr.msrb.gmra.mxu0 %vm3332_vm4, %v3309_v39 }
 0x554   :  { %v3353_v56 = vpop.f32.mrf.mxu3 }
 0x55c   :  { %v3376_v6 = vpop.f32.mrf.mxu3  ;;  %v3410_v19 = vpop.f32.mrf.mxu2 }
 0x55d   :  { %v3377_v29 = vadd.f32 %v3376_v6, %v3353_v56 }
 0x55f   :  { %v3413_v22 = vadd.f32 %v3410_v19, %v3377_v29 }
 0x566   :  { %v3480_v40 = vpop.f32.mrf.mxu0 }
 0x568   :  { %v3445_v9 = vpop.f32.mrf.mxu3 }
 0x569   :  { %v3448_v31 = vadd.f32 %v3445_v9, %v3413_v22 }
 0x56b   :  { %v3483_v41 = vadd.f32 %v3480_v40, %v3448_v31 }
 0x56d   :  { %v3488_v28 = vadd.f32 %v4171_v57, %v3483_v41 }
 0x56f   :  { %3525 = vmatmul.f32.vlgmr.msrb.gmra.mxu1 %v3488_v28 }
 0x5ec   :  { %v3526_v4 = vpop.f32.mrf.mxu1 }
 0x5ed   :  { %v3527_v50 = vadd.f32 %v4172_v35, %v3526_v4 }
 0x5ef   :  { %3565 = vmatmul.f32.vlgmr.msrb.gmra.mxu2 %v3527_v50 }
 0x672   :  { %v3566_v1 = vpop.f32.mrf.mxu2 }
 0x673   :  { %v3567_v43 = vadd.f32 %v4173_v25, %v3566_v1 }
 0x675   :  { %3569 = vst [vmem:[#allocation2] sm:$0xff] %v3567_v43 }
 0x676   :  { %3580 = dma.vmem_to_hbm [thread:$0]  %s3576_s14, 128, %s3578_s4, [#allocation3]  }
 0x677   :  { %4400 = dma.done.wait [#allocation3], 128  }
 0x678   :  { %4401 = vsyncadd [#allocation3], 4294967168 }
 0x679   :  { %3585 = vsyncpa [#allocation3], 1 }

</bundles_post_ra>
